<compile_context>
chip_gen: v7x
topology: tpu7x:2x2x1
jax: 0.10.0
libtpu: 0.0.40
codegen_flags: <defaults>
</compile_context>

<pallas_src>
import jax
import jax.numpy as jnp
from jax.experimental import pallas as pl
from jax.experimental.pallas import tpu as pltpu


# ----------------------------------------------------------------------------
# Fused kernel: 2-layer LSTM recurrence + output projection + log_softmax.
#   grid = (num_batch_blocks,)  ("parallel" -> megacore-shardable).
#   xg_ref : (BB, S, 4H)  precomputed layer-0 input gates (embedding folded in)
#   o_ref  : (BB, S, V)   log-probabilities
# ----------------------------------------------------------------------------
def _fused_lstm_lm_kernel(xg_ref, whh0_ref, w1_ref, b1_ref, wout_ref, bout_ref,
                          o_ref, h_scr):
    BB, S, _ = xg_ref.shape
    H = whh0_ref.shape[0]
    V = wout_ref.shape[1]

    whh0 = whh0_ref[...]      # (H, 4H)   layer-0 recurrent weight
    w1 = w1_ref[...]          # (2H, 4H)  layer-1 stacked [W_ih1; W_hh1]
    b1 = b1_ref[...]          # (1, 4H)

    def gates_to_hc(gates, c_prev):
        # PyTorch gate order: [i | f | g | o] along the 4H axis.
        i = jax.nn.sigmoid(gates[:, 0 * H:1 * H])
        f = jax.nn.sigmoid(gates[:, 1 * H:2 * H])
        g = jnp.tanh(gates[:, 2 * H:3 * H])
        o = jax.nn.sigmoid(gates[:, 3 * H:4 * H])
        c = f * c_prev + i * g
        h = o * jnp.tanh(c)
        return h, c

    # hx=None in the PyTorch module -> zero initial state.
    h0 = jnp.zeros((BB, H), jnp.float32)
    c0 = jnp.zeros((BB, H), jnp.float32)
    h1 = jnp.zeros((BB, H), jnp.float32)
    c1 = jnp.zeros((BB, H), jnp.float32)

    # S is small and static: fully unrolled time loop, state stays in vregs.
    for t in range(S):
        # layer 0: input gates are precomputed; only recurrent matmul remains.
        g0 = xg_ref[:, t, :] + jnp.dot(h0, whh0,
                                       preferred_element_type=jnp.float32)
        h0, c0 = gates_to_hc(g0, c0)
        # layer 1: single fused matmul over the concatenated [h0, h1_prev].
        inp1 = jnp.concatenate([h0, h1], axis=-1)             # (BB, 2H)
        g1 = jnp.dot(inp1, w1, preferred_element_type=jnp.float32) + b1
        h1, c1 = gates_to_hc(g1, c1)
        h_scr[:, t, :] = h1                                    # VMEM scratch

    # Epilogue: one well-shaped projection + stable log_softmax, lane-dense store.
    y = h_scr[...].reshape(BB * S, H)
    logits = (jnp.dot(y, wout_ref[...], preferred_element_type=jnp.float32)
              + bout_ref[...])
    m = jnp.max(logits, axis=-1, keepdims=True)
    lse = jnp.log(jnp.sum(jnp.exp(logits - m), axis=-1, keepdims=True)) + m
    o_ref[...] = (logits - lse).reshape(BB, S, V)


# ----------------------------------------------------------------------------
# Wrapper
# ----------------------------------------------------------------------------
def custom_model_forward(tokens, params):
    """tokens: (B, S) int32 indices -> (B, S, V) float32 log-probabilities."""
    emb = params["embedding"]            # (V, E)
    wih0_t = params["wih0_t"]            # (E, 4H)
    b0 = params["b0"]                    # (1, 4H)

    # Fold embedding lookup + layer-0 input projection into one table gather:
    #   fused_tab[v] = emb[v] @ W_ih0^T + b0
    fused_tab = jnp.dot(emb, wih0_t, preferred_element_type=jnp.float32) + b0
    xg = jnp.take(fused_tab, tokens, axis=0)       # (B, S, 4H), plain-JAX gather

    B, S = tokens.shape
    H = params["whh0_t"].shape[0]
    V = params["w_out_t"].shape[1]

    # Pad batch up to a sublane multiple so vector ops / MXU rows are full.
    BB = 8
    B_pad = ((B + BB - 1) // BB) * BB
    if B_pad != B:
        xg = jnp.pad(xg, ((0, B_pad - B), (0, 0), (0, 0)))

    # Stack layer-1 input & recurrent weights for the fused per-step matmul.
    w1_t = jnp.concatenate([params["wih1_t"], params["whh1_t"]], axis=0)  # (2H, 4H)

    out = pl.pallas_call(
        _fused_lstm_lm_kernel,
        out_shape=jax.ShapeDtypeStruct((B_pad, S, V), jnp.float32),
        grid=(B_pad // BB,),
        in_specs=[
            pl.BlockSpec((BB, S, 4 * H), lambda b: (b, 0, 0)),   # xg
            pl.BlockSpec((H, 4 * H), lambda b: (0, 0)),          # W_hh_l0^T
            pl.BlockSpec((2 * H, 4 * H), lambda b: (0, 0)),      # [W_ih1; W_hh1]^T
            pl.BlockSpec((1, 4 * H), lambda b: (0, 0)),          # b_l1
            pl.BlockSpec((H, V), lambda b: (0, 0)),              # W_out^T
            pl.BlockSpec((1, V), lambda b: (0, 0)),              # b_out
        ],
        out_specs=pl.BlockSpec((BB, S, V), lambda b: (b, 0, 0)),
        scratch_shapes=[
            pltpu.VMEM((BB, S, H), jnp.float32),   # per-timestep top-layer h
        ],
        compiler_params=pltpu.CompilerParams(
            dimension_semantics=("parallel",)),    # batch blocks are independent
    )(xg, params["whh0_t"], w1_t, params["b1"],
      params["w_out_t"], params["b_out"])

    return out[:B]


# ----------------------------------------------------------------------------
# Pure-JAX reference (mirrors the PyTorch forward exactly)
# ----------------------------------------------------------------------------
def reference_forward(tokens, params):
    x = jnp.take(params["embedding"], tokens, axis=0)        # (B, S, E)
    x = jnp.transpose(x, (1, 0, 2))                           # (S, B, E)
    B = x.shape[1]
    H = params["whh0_t"].shape[0]

    def layer(inputs, wih_t, whh_t, b):
        def step(carry, x_t):
            h, c = carry
            gates = x_t @ wih_t + h @ whh_t + b
            i = jax.nn.sigmoid(gates[:, 0 * H:1 * H])
            f = jax.nn.sigmoid(gates[:, 1 * H:2 * H])
            g = jnp.tanh(gates[:, 2 * H:3 * H])
            o = jax.nn.sigmoid(gates[:, 3 * H:4 * H])
            c = f * c + i * g
            h = o * jnp.tanh(c)
            return (h, c), h
        init = (jnp.zeros((B, H), jnp.float32), jnp.zeros((B, H), jnp.float32))
        _, ys = jax.lax.scan(step, init, inputs)
        return ys

    h0 = layer(x, params["wih0_t"], params["whh0_t"], params["b0"])
    h1 = layer(h0, params["wih1_t"], params["whh1_t"], params["b1"])
    y = jnp.transpose(h1, (1, 0, 2))                           # (B, S, H)
    logits = y @ params["w_out_t"] + params["b_out"]
    return jax.nn.log_softmax(logits, axis=-1)


# ----------------------------------------------------------------------------
# Deterministic parameter construction (synthetic weights, no checkpoint load)
# ----------------------------------------------------------------------------
def make_params(key, embedding_dim, rnn_size, output_dim):
    E, H, V = embedding_dim, rnn_size, output_dim
    ks = jax.random.split(key, 12)
    s = 1.0 / jnp.sqrt(H)
    u = lambda k, shape: jax.random.uniform(k, shape, jnp.float32, -s, s)
    return {
        "embedding": jax.random.normal(ks[0], (V, E), jnp.float32) * 0.1,
        # LSTM layer 0 (weights stored transposed: (in, 4H))
        "wih0_t": u(ks[1], (E, 4 * H)),
        "whh0_t": u(ks[2], (H, 4 * H)),
        "b0": (u(ks[3], (1, 4 * H)) + u(ks[4], (1, 4 * H))),   # b_ih + b_hh
        # LSTM layer 1
        "wih1_t": u(ks[5], (H, 4 * H)),
        "whh1_t": u(ks[6], (H, 4 * H)),
        "b1": (u(ks[7], (1, 4 * H)) + u(ks[8], (1, 4 * H))),
        # Output linear (H, V) + bias
        "w_out_t": u(ks[9], (H, V)),
        "b_out": u(ks[10], (1, V)),
    }


if __name__ == "__main__":
    # Small shapes consistent with the module's forward.
    B, S = 2, 8
    embedding_dim, rnn_size, output_dim = 32, 32, 128

    key = jax.random.PRNGKey(0)
    k_tok, k_par = jax.random.split(key)
    tokens = jax.random.randint(k_tok, (B, S), 0, output_dim, dtype=jnp.int32)
    params = make_params(k_par, embedding_dim, rnn_size, output_dim)

    out = jax.jit(custom_model_forward)(tokens, params)
    out = jax.block_until_ready(out)

    assert out.shape == (B, S, output_dim), out.shape
    assert bool(jnp.all(jnp.isfinite(out)))
    # log_softmax property: probabilities sum to 1
    assert bool(jnp.allclose(jnp.exp(out).sum(-1), 1.0, atol=1e-4))
    # match pure-JAX reference of the PyTorch module
    ref = reference_forward(tokens, params)
    assert bool(jnp.allclose(out, ref, atol=1e-3, rtol=1e-3))

    print("KERNEL_OK")
</pallas_src>

<mosaic_0001>
module attributes {stable_mosaic.version = 11 : i64} {
  func.func @_fused_lstm_lm_kernel(%arg0: i32, %arg1: memref<8x8x128xf32, #tpu.memory_space<vmem>>, %arg2: memref<32x128xf32, #tpu.memory_space<vmem>>, %arg3: memref<64x128xf32, #tpu.memory_space<vmem>>, %arg4: memref<1x128xf32, #tpu.memory_space<vmem>>, %arg5: memref<32x128xf32, #tpu.memory_space<vmem>>, %arg6: memref<1x128xf32, #tpu.memory_space<vmem>>, %arg7: memref<8x8x128xf32, #tpu.memory_space<vmem>>, %arg8: memref<8x8x32xf32, #tpu.memory_space<vmem>>) attributes {dimension_semantics = [#tpu.dimension_semantics<parallel>], iteration_bounds = array<i64: 1>, scalar_prefetch = 0 : i64, scratch_operands = 1 : i64, tpu.core_type = #tpu.core_type<tc>, window_params = [{transform_indices = @transform_0, window_bounds = array<i64: 8, 8, 128>}, {pipeline_mode = #tpu.pipeline_mode<synchronous>, transform_indices = @transform_1, window_bounds = array<i64: 32, 128>}, {pipeline_mode = #tpu.pipeline_mode<synchronous>, transform_indices = @transform_2, window_bounds = array<i64: 64, 128>}, {pipeline_mode = #tpu.pipeline_mode<synchronous>, transform_indices = @transform_3, window_bounds = array<i64: 1, 128>}, {pipeline_mode = #tpu.pipeline_mode<synchronous>, transform_indices = @transform_4, window_bounds = array<i64: 32, 128>}, {pipeline_mode = #tpu.pipeline_mode<synchronous>, transform_indices = @transform_5, window_bounds = array<i64: 1, 128>}, {transform_indices = @transform_6, window_bounds = array<i64: 8, 8, 128>}]} {
    %c0 = arith.constant 0 : index
    %c0_0 = arith.constant 0 : index
    %0 = vector.load %arg2[%c0, %c0_0] : memref<32x128xf32, #tpu.memory_space<vmem>>, vector<32x128xf32>
    %c0_1 = arith.constant 0 : index
    %c0_2 = arith.constant 0 : index
    %1 = vector.load %arg3[%c0_1, %c0_2] : memref<64x128xf32, #tpu.memory_space<vmem>>, vector<64x128xf32>
    %c0_3 = arith.constant 0 : index
    %c0_4 = arith.constant 0 : index
    %2 = vector.load %arg4[%c0_3, %c0_4] : memref<1x128xf32, #tpu.memory_space<vmem>>, vector<1x128xf32>
    %cst = arith.constant 0.000000e+00 : f32
    %3 = vector.broadcast %cst : f32 to vector<8x32xf32>
    %cst_5 = arith.constant 0.000000e+00 : f32
    %4 = vector.broadcast %cst_5 : f32 to vector<8x32xf32>
    %cst_6 = arith.constant 0.000000e+00 : f32
    %5 = vector.broadcast %cst_6 : f32 to vector<8x32xf32>
    %cst_7 = arith.constant 0.000000e+00 : f32
    %6 = vector.broadcast %cst_7 : f32 to vector<8x32xf32>
    %c0_8 = arith.constant 0 : index
    %c0_9 = arith.constant 0 : index
    %c0_10 = arith.constant 0 : index
    %7 = vector.load %arg1[%c0_8, %c0_9, %c0_10] : memref<8x8x128xf32, #tpu.memory_space<vmem>>, vector<8x1x128xf32>
    %8 = vector.shape_cast %7 : vector<8x1x128xf32> to vector<8x128xf32>
    %cst_11 = arith.constant dense<0.000000e+00> : vector<8x128xf32>
    %9 = tpu.matmul %3, %0, %cst_11 {dimension_numbers = #tpu.dot_dimension_numbers<[1], [0], [0], [1], [0, 0, 1, 1], [], []>} : vector<8x32xf32>, vector<32x128xf32>, vector<8x128xf32> -> vector<8x128xf32>
    %10 = arith.addf %8, %9 : vector<8x128xf32>
    %11 = vector.extract_strided_slice %10 {offsets = [0, 0], sizes = [8, 32], strides = [1, 1]} : vector<8x128xf32> to vector<8x32xf32>
    %12 = arith.negf %11 : vector<8x32xf32>
    %13 = math.exp %12 : vector<8x32xf32>
    %cst_12 = arith.constant 1.000000e+00 : f32
    %14 = vector.broadcast %cst_12 : f32 to vector<8x32xf32>
    %15 = arith.addf %14, %13 : vector<8x32xf32>
    %16 = arith.divf %14, %15 : vector<8x32xf32>
    %17 = vector.extract_strided_slice %10 {offsets = [0, 32], sizes = [8, 32], strides = [1, 1]} : vector<8x128xf32> to vector<8x32xf32>
    %18 = arith.negf %17 : vector<8x32xf32>
    %19 = math.exp %18 : vector<8x32xf32>
    %cst_13 = arith.constant 1.000000e+00 : f32
    %20 = vector.broadcast %cst_13 : f32 to vector<8x32xf32>
    %21 = arith.addf %20, %19 : vector<8x32xf32>
    %22 = arith.divf %20, %21 : vector<8x32xf32>
    %23 = vector.extract_strided_slice %10 {offsets = [0, 64], sizes = [8, 32], strides = [1, 1]} : vector<8x128xf32> to vector<8x32xf32>
    %24 = math.tanh %23 : vector<8x32xf32>
    %25 = vector.extract_strided_slice %10 {offsets = [0, 96], sizes = [8, 32], strides = [1, 1]} : vector<8x128xf32> to vector<8x32xf32>
    %26 = arith.negf %25 : vector<8x32xf32>
    %27 = math.exp %26 : vector<8x32xf32>
    %cst_14 = arith.constant 1.000000e+00 : f32
    %28 = vector.broadcast %cst_14 : f32 to vector<8x32xf32>
    %29 = arith.addf %28, %27 : vector<8x32xf32>
    %30 = arith.divf %28, %29 : vector<8x32xf32>
    %31 = arith.mulf %22, %4 : vector<8x32xf32>
    %32 = arith.mulf %16, %24 : vector<8x32xf32>
    %33 = arith.addf %31, %32 : vector<8x32xf32>
    %34 = math.tanh %33 : vector<8x32xf32>
    %35 = arith.mulf %30, %34 : vector<8x32xf32>
    %36 = tpu.concatenate %35, %5 in 1 : vector<8x32xf32>, vector<8x32xf32> -> vector<8x64xf32>
    %cst_15 = arith.constant dense<0.000000e+00> : vector<8x128xf32>
    %37 = tpu.matmul %36, %1, %cst_15 {dimension_numbers = #tpu.dot_dimension_numbers<[1], [0], [0], [1], [0, 0, 1, 1], [], []>} : vector<8x64xf32>, vector<64x128xf32>, vector<8x128xf32> -> vector<8x128xf32>
    %38 = vector.broadcast %2 : vector<1x128xf32> to vector<8x128xf32>
    %39 = arith.addf %37, %38 : vector<8x128xf32>
    %40 = vector.extract_strided_slice %39 {offsets = [0, 0], sizes = [8, 32], strides = [1, 1]} : vector<8x128xf32> to vector<8x32xf32>
    %41 = arith.negf %40 : vector<8x32xf32>
    %42 = math.exp %41 : vector<8x32xf32>
    %cst_16 = arith.constant 1.000000e+00 : f32
    %43 = vector.broadcast %cst_16 : f32 to vector<8x32xf32>
    %44 = arith.addf %43, %42 : vector<8x32xf32>
    %45 = arith.divf %43, %44 : vector<8x32xf32>
    %46 = vector.extract_strided_slice %39 {offsets = [0, 32], sizes = [8, 32], strides = [1, 1]} : vector<8x128xf32> to vector<8x32xf32>
    %47 = arith.negf %46 : vector<8x32xf32>
    %48 = math.exp %47 : vector<8x32xf32>
    %cst_17 = arith.constant 1.000000e+00 : f32
    %49 = vector.broadcast %cst_17 : f32 to vector<8x32xf32>
    %50 = arith.addf %49, %48 : vector<8x32xf32>
    %51 = arith.divf %49, %50 : vector<8x32xf32>
    %52 = vector.extract_strided_slice %39 {offsets = [0, 64], sizes = [8, 32], strides = [1, 1]} : vector<8x128xf32> to vector<8x32xf32>
    %53 = math.tanh %52 : vector<8x32xf32>
    %54 = vector.extract_strided_slice %39 {offsets = [0, 96], sizes = [8, 32], strides = [1, 1]} : vector<8x128xf32> to vector<8x32xf32>
    %55 = arith.negf %54 : vector<8x32xf32>
    %56 = math.exp %55 : vector<8x32xf32>
    %cst_18 = arith.constant 1.000000e+00 : f32
    %57 = vector.broadcast %cst_18 : f32 to vector<8x32xf32>
    %58 = arith.addf %57, %56 : vector<8x32xf32>
    %59 = arith.divf %57, %58 : vector<8x32xf32>
    %60 = arith.mulf %51, %6 : vector<8x32xf32>
    %61 = arith.mulf %45, %53 : vector<8x32xf32>
    %62 = arith.addf %60, %61 : vector<8x32xf32>
    %63 = math.tanh %62 : vector<8x32xf32>
    %64 = arith.mulf %59, %63 : vector<8x32xf32>
    %c0_19 = arith.constant 0 : index
    %c0_20 = arith.constant 0 : index
    %c0_21 = arith.constant 0 : index
    %65 = vector.load %arg8[%c0_19, %c0_20, %c0_21] : memref<8x8x32xf32, #tpu.memory_space<vmem>>, vector<8x1x32xf32>
    %66 = vector.shape_cast %65 : vector<8x1x32xf32> to vector<8x32xf32>
    %67 = vector.shape_cast %64 : vector<8x32xf32> to vector<8x1x32xf32>
    tpu.vector_store %arg8[%c0_19, %c0_20, %c0_21], %67 {strides = array<i32>} : memref<8x8x32xf32, #tpu.memory_space<vmem>>, vector<8x1x32xf32>,
    %c0_22 = arith.constant 0 : index
    %c1 = arith.constant 1 : index
    %c0_23 = arith.constant 0 : index
    %68 = vector.load %arg1[%c0_22, %c1, %c0_23] : memref<8x8x128xf32, #tpu.memory_space<vmem>>, vector<8x1x128xf32>
    %69 = vector.shape_cast %68 : vector<8x1x128xf32> to vector<8x128xf32>
    %cst_24 = arith.constant dense<0.000000e+00> : vector<8x128xf32>
    %70 = tpu.matmul %35, %0, %cst_24 {dimension_numbers = #tpu.dot_dimension_numbers<[1], [0], [0], [1], [0, 0, 1, 1], [], []>} : vector<8x32xf32>, vector<32x128xf32>, vector<8x128xf32> -> vector<8x128xf32>
    %71 = arith.addf %69, %70 : vector<8x128xf32>
    %72 = vector.extract_strided_slice %71 {offsets = [0, 0], sizes = [8, 32], strides = [1, 1]} : vector<8x128xf32> to vector<8x32xf32>
    %73 = arith.negf %72 : vector<8x32xf32>
    %74 = math.exp %73 : vector<8x32xf32>
    %cst_25 = arith.constant 1.000000e+00 : f32
    %75 = vector.broadcast %cst_25 : f32 to vector<8x32xf32>
    %76 = arith.addf %75, %74 : vector<8x32xf32>
    %77 = arith.divf %75, %76 : vector<8x32xf32>
    %78 = vector.extract_strided_slice %71 {offsets = [0, 32], sizes = [8, 32], strides = [1, 1]} : vector<8x128xf32> to vector<8x32xf32>
    %79 = arith.negf %78 : vector<8x32xf32>
    %80 = math.exp %79 : vector<8x32xf32>
    %cst_26 = arith.constant 1.000000e+00 : f32
    %81 = vector.broadcast %cst_26 : f32 to vector<8x32xf32>
    %82 = arith.addf %81, %80 : vector<8x32xf32>
    %83 = arith.divf %81, %82 : vector<8x32xf32>
    %84 = vector.extract_strided_slice %71 {offsets = [0, 64], sizes = [8, 32], strides = [1, 1]} : vector<8x128xf32> to vector<8x32xf32>
    %85 = math.tanh %84 : vector<8x32xf32>
    %86 = vector.extract_strided_slice %71 {offsets = [0, 96], sizes = [8, 32], strides = [1, 1]} : vector<8x128xf32> to vector<8x32xf32>
    %87 = arith.negf %86 : vector<8x32xf32>
    %88 = math.exp %87 : vector<8x32xf32>
    %cst_27 = arith.constant 1.000000e+00 : f32
    %89 = vector.broadcast %cst_27 : f32 to vector<8x32xf32>
    %90 = arith.addf %89, %88 : vector<8x32xf32>
    %91 = arith.divf %89, %90 : vector<8x32xf32>
    %92 = arith.mulf %83, %33 : vector<8x32xf32>
    %93 = arith.mulf %77, %85 : vector<8x32xf32>
    %94 = arith.addf %92, %93 : vector<8x32xf32>
    %95 = math.tanh %94 : vector<8x32xf32>
    %96 = arith.mulf %91, %95 : vector<8x32xf32>
    %97 = tpu.concatenate %96, %64 in 1 : vector<8x32xf32>, vector<8x32xf32> -> vector<8x64xf32>
    %cst_28 = arith.constant dense<0.000000e+00> : vector<8x128xf32>
    %98 = tpu.matmul %97, %1, %cst_28 {dimension_numbers = #tpu.dot_dimension_numbers<[1], [0], [0], [1], [0, 0, 1, 1], [], []>} : vector<8x64xf32>, vector<64x128xf32>, vector<8x128xf32> -> vector<8x128xf32>
    %99 = vector.broadcast %2 : vector<1x128xf32> to vector<8x128xf32>
    %100 = arith.addf %98, %99 : vector<8x128xf32>
    %101 = vector.extract_strided_slice %100 {offsets = [0, 0], sizes = [8, 32], strides = [1, 1]} : vector<8x128xf32> to vector<8x32xf32>
    %102 = arith.negf %101 : vector<8x32xf32>
    %103 = math.exp %102 : vector<8x32xf32>
    %cst_29 = arith.constant 1.000000e+00 : f32
    %104 = vector.broadcast %cst_29 : f32 to vector<8x32xf32>
    %105 = arith.addf %104, %103 : vector<8x32xf32>
    %106 = arith.divf %104, %105 : vector<8x32xf32>
    %107 = vector.extract_strided_slice %100 {offsets = [0, 32], sizes = [8, 32], strides = [1, 1]} : vector<8x128xf32> to vector<8x32xf32>
    %108 = arith.negf %107 : vector<8x32xf32>
    %109 = math.exp %108 : vector<8x32xf32>
    %cst_30 = arith.constant 1.000000e+00 : f32
    %110 = vector.broadcast %cst_30 : f32 to vector<8x32xf32>
    %111 = arith.addf %110, %109 : vector<8x32xf32>
    %112 = arith.divf %110, %111 : vector<8x32xf32>
    %113 = vector.extract_strided_slice %100 {offsets = [0, 64], sizes = [8, 32], strides = [1, 1]} : vector<8x128xf32> to vector<8x32xf32>
    %114 = math.tanh %113 : vector<8x32xf32>
    %115 = vector.extract_strided_slice %100 {offsets = [0, 96], sizes = [8, 32], strides = [1, 1]} : vector<8x128xf32> to vector<8x32xf32>
    %116 = arith.negf %115 : vector<8x32xf32>
    %117 = math.exp %116 : vector<8x32xf32>
    %cst_31 = arith.constant 1.000000e+00 : f32
    %118 = vector.broadcast %cst_31 : f32 to vector<8x32xf32>
    %119 = arith.addf %118, %117 : vector<8x32xf32>
    %120 = arith.divf %118, %119 : vector<8x32xf32>
    %121 = arith.mulf %112, %62 : vector<8x32xf32>
    %122 = arith.mulf %106, %114 : vector<8x32xf32>
    %123 = arith.addf %121, %122 : vector<8x32xf32>
    %124 = math.tanh %123 : vector<8x32xf32>
    %125 = arith.mulf %120, %124 : vector<8x32xf32>
    %c0_32 = arith.constant 0 : index
    %c1_33 = arith.constant 1 : index
    %c0_34 = arith.constant 0 : index
    %126 = vector.load %arg8[%c0_32, %c1_33, %c0_34] : memref<8x8x32xf32, #tpu.memory_space<vmem>>, vector<8x1x32xf32>
    %127 = vector.shape_cast %126 : vector<8x1x32xf32> to vector<8x32xf32>
    %128 = vector.shape_cast %125 : vector<8x32xf32> to vector<8x1x32xf32>
    tpu.vector_store %arg8[%c0_32, %c1_33, %c0_34], %128 {strides = array<i32>} : memref<8x8x32xf32, #tpu.memory_space<vmem>>, vector<8x1x32xf32>,
    %c0_35 = arith.constant 0 : index
    %c2 = arith.constant 2 : index
    %c0_36 = arith.constant 0 : index
    %129 = vector.load %arg1[%c0_35, %c2, %c0_36] : memref<8x8x128xf32, #tpu.memory_space<vmem>>, vector<8x1x128xf32>
    %130 = vector.shape_cast %129 : vector<8x1x128xf32> to vector<8x128xf32>
    %cst_37 = arith.constant dense<0.000000e+00> : vector<8x128xf32>
    %131 = tpu.matmul %96, %0, %cst_37 {dimension_numbers = #tpu.dot_dimension_numbers<[1], [0], [0], [1], [0, 0, 1, 1], [], []>} : vector<8x32xf32>, vector<32x128xf32>, vector<8x128xf32> -> vector<8x128xf32>
    %132 = arith.addf %130, %131 : vector<8x128xf32>
    %133 = vector.extract_strided_slice %132 {offsets = [0, 0], sizes = [8, 32], strides = [1, 1]} : vector<8x128xf32> to vector<8x32xf32>
    %134 = arith.negf %133 : vector<8x32xf32>
    %135 = math.exp %134 : vector<8x32xf32>
    %cst_38 = arith.constant 1.000000e+00 : f32
    %136 = vector.broadcast %cst_38 : f32 to vector<8x32xf32>
    %137 = arith.addf %136, %135 : vector<8x32xf32>
    %138 = arith.divf %136, %137 : vector<8x32xf32>
    %139 = vector.extract_strided_slice %132 {offsets = [0, 32], sizes = [8, 32], strides = [1, 1]} : vector<8x128xf32> to vector<8x32xf32>
    %140 = arith.negf %139 : vector<8x32xf32>
    %141 = math.exp %140 : vector<8x32xf32>
    %cst_39 = arith.constant 1.000000e+00 : f32
    %142 = vector.broadcast %cst_39 : f32 to vector<8x32xf32>
    %143 = arith.addf %142, %141 : vector<8x32xf32>
    %144 = arith.divf %142, %143 : vector<8x32xf32>
    %145 = vector.extract_strided_slice %132 {offsets = [0, 64], sizes = [8, 32], strides = [1, 1]} : vector<8x128xf32> to vector<8x32xf32>
    %146 = math.tanh %145 : vector<8x32xf32>
    %147 = vector.extract_strided_slice %132 {offsets = [0, 96], sizes = [8, 32], strides = [1, 1]} : vector<8x128xf32> to vector<8x32xf32>
    %148 = arith.negf %147 : vector<8x32xf32>
    %149 = math.exp %148 : vector<8x32xf32>
    %cst_40 = arith.constant 1.000000e+00 : f32
    %150 = vector.broadcast %cst_40 : f32 to vector<8x32xf32>
    %151 = arith.addf %150, %149 : vector<8x32xf32>
    %152 = arith.divf %150, %151 : vector<8x32xf32>
    %153 = arith.mulf %144, %94 : vector<8x32xf32>
    %154 = arith.mulf %138, %146 : vector<8x32xf32>
    %155 = arith.addf %153, %154 : vector<8x32xf32>
    %156 = math.tanh %155 : vector<8x32xf32>
    %157 = arith.mulf %152, %156 : vector<8x32xf32>
    %158 = tpu.concatenate %157, %125 in 1 : vector<8x32xf32>, vector<8x32xf32> -> vector<8x64xf32>
    %cst_41 = arith.constant dense<0.000000e+00> : vector<8x128xf32>
    %159 = tpu.matmul %158, %1, %cst_41 {dimension_numbers = #tpu.dot_dimension_numbers<[1], [0], [0], [1], [0, 0, 1, 1], [], []>} : vector<8x64xf32>, vector<64x128xf32>, vector<8x128xf32> -> vector<8x128xf32>
    %160 = vector.broadcast %2 : vector<1x128xf32> to vector<8x128xf32>
    %161 = arith.addf %159, %160 : vector<8x128xf32>
    %162 = vector.extract_strided_slice %161 {offsets = [0, 0], sizes = [8, 32], strides = [1, 1]} : vector<8x128xf32> to vector<8x32xf32>
    %163 = arith.negf %162 : vector<8x32xf32>
    %164 = math.exp %163 : vector<8x32xf32>
    %cst_42 = arith.constant 1.000000e+00 : f32
    %165 = vector.broadcast %cst_42 : f32 to vector<8x32xf32>
    %166 = arith.addf %165, %164 : vector<8x32xf32>
    %167 = arith.divf %165, %166 : vector<8x32xf32>
    %168 = vector.extract_strided_slice %161 {offsets = [0, 32], sizes = [8, 32], strides = [1, 1]} : vector<8x128xf32> to vector<8x32xf32>
    %169 = arith.negf %168 : vector<8x32xf32>
    %170 = math.exp %169 : vector<8x32xf32>
    %cst_43 = arith.constant 1.000000e+00 : f32
    %171 = vector.broadcast %cst_43 : f32 to vector<8x32xf32>
    %172 = arith.addf %171, %170 : vector<8x32xf32>
    %173 = arith.divf %171, %172 : vector<8x32xf32>
    %174 = vector.extract_strided_slice %161 {offsets = [0, 64], sizes = [8, 32], strides = [1, 1]} : vector<8x128xf32> to vector<8x32xf32>
    %175 = math.tanh %174 : vector<8x32xf32>
    %176 = vector.extract_strided_slice %161 {offsets = [0, 96], sizes = [8, 32], strides = [1, 1]} : vector<8x128xf32> to vector<8x32xf32>
    %177 = arith.negf %176 : vector<8x32xf32>
    %178 = math.exp %177 : vector<8x32xf32>
    %cst_44 = arith.constant 1.000000e+00 : f32
    %179 = vector.broadcast %cst_44 : f32 to vector<8x32xf32>
    %180 = arith.addf %179, %178 : vector<8x32xf32>
    %181 = arith.divf %179, %180 : vector<8x32xf32>
    %182 = arith.mulf %173, %123 : vector<8x32xf32>
    %183 = arith.mulf %167, %175 : vector<8x32xf32>
    %184 = arith.addf %182, %183 : vector<8x32xf32>
    %185 = math.tanh %184 : vector<8x32xf32>
    %186 = arith.mulf %181, %185 : vector<8x32xf32>
    %c0_45 = arith.constant 0 : index
    %c2_46 = arith.constant 2 : index
    %c0_47 = arith.constant 0 : index
    %187 = vector.load %arg8[%c0_45, %c2_46, %c0_47] : memref<8x8x32xf32, #tpu.memory_space<vmem>>, vector<8x1x32xf32>
    %188 = vector.shape_cast %187 : vector<8x1x32xf32> to vector<8x32xf32>
    %189 = vector.shape_cast %186 : vector<8x32xf32> to vector<8x1x32xf32>
    tpu.vector_store %arg8[%c0_45, %c2_46, %c0_47], %189 {strides = array<i32>} : memref<8x8x32xf32, #tpu.memory_space<vmem>>, vector<8x1x32xf32>,
    %c0_48 = arith.constant 0 : index
    %c3 = arith.constant 3 : index
    %c0_49 = arith.constant 0 : index
    %190 = vector.load %arg1[%c0_48, %c3, %c0_49] : memref<8x8x128xf32, #tpu.memory_space<vmem>>, vector<8x1x128xf32>
    %191 = vector.shape_cast %190 : vector<8x1x128xf32> to vector<8x128xf32>
    %cst_50 = arith.constant dense<0.000000e+00> : vector<8x128xf32>
    %192 = tpu.matmul %157, %0, %cst_50 {dimension_numbers = #tpu.dot_dimension_numbers<[1], [0], [0], [1], [0, 0, 1, 1], [], []>} : vector<8x32xf32>, vector<32x128xf32>, vector<8x128xf32> -> vector<8x128xf32>
    %193 = arith.addf %191, %192 : vector<8x128xf32>
    %194 = vector.extract_strided_slice %193 {offsets = [0, 0], sizes = [8, 32], strides = [1, 1]} : vector<8x128xf32> to vector<8x32xf32>
    %195 = arith.negf %194 : vector<8x32xf32>
    %196 = math.exp %195 : vector<8x32xf32>
    %cst_51 = arith.constant 1.000000e+00 : f32
    %197 = vector.broadcast %cst_51 : f32 to vector<8x32xf32>
    %198 = arith.addf %197, %196 : vector<8x32xf32>
    %199 = arith.divf %197, %198 : vector<8x32xf32>
    %200 = vector.extract_strided_slice %193 {offsets = [0, 32], sizes = [8, 32], strides = [1, 1]} : vector<8x128xf32> to vector<8x32xf32>
    %201 = arith.negf %200 : vector<8x32xf32>
    %202 = math.exp %201 : vector<8x32xf32>
    %cst_52 = arith.constant 1.000000e+00 : f32
    %203 = vector.broadcast %cst_52 : f32 to vector<8x32xf32>
    %204 = arith.addf %203, %202 : vector<8x32xf32>
    %205 = arith.divf %203, %204 : vector<8x32xf32>
    %206 = vector.extract_strided_slice %193 {offsets = [0, 64], sizes = [8, 32], strides = [1, 1]} : vector<8x128xf32> to vector<8x32xf32>
    %207 = math.tanh %206 : vector<8x32xf32>
    %208 = vector.extract_strided_slice %193 {offsets = [0, 96], sizes = [8, 32], strides = [1, 1]} : vector<8x128xf32> to vector<8x32xf32>
    %209 = arith.negf %208 : vector<8x32xf32>
    %210 = math.exp %209 : vector<8x32xf32>
    %cst_53 = arith.constant 1.000000e+00 : f32
    %211 = vector.broadcast %cst_53 : f32 to vector<8x32xf32>
    %212 = arith.addf %211, %210 : vector<8x32xf32>
    %213 = arith.divf %211, %212 : vector<8x32xf32>
    %214 = arith.mulf %205, %155 : vector<8x32xf32>
    %215 = arith.mulf %199, %207 : vector<8x32xf32>
    %216 = arith.addf %214, %215 : vector<8x32xf32>
    %217 = math.tanh %216 : vector<8x32xf32>
    %218 = arith.mulf %213, %217 : vector<8x32xf32>
    %219 = tpu.concatenate %218, %186 in 1 : vector<8x32xf32>, vector<8x32xf32> -> vector<8x64xf32>
    %cst_54 = arith.constant dense<0.000000e+00> : vector<8x128xf32>
    %220 = tpu.matmul %219, %1, %cst_54 {dimension_numbers = #tpu.dot_dimension_numbers<[1], [0], [0], [1], [0, 0, 1, 1], [], []>} : vector<8x64xf32>, vector<64x128xf32>, vector<8x128xf32> -> vector<8x128xf32>
    %221 = vector.broadcast %2 : vector<1x128xf32> to vector<8x128xf32>
    %222 = arith.addf %220, %221 : vector<8x128xf32>
    %223 = vector.extract_strided_slice %222 {offsets = [0, 0], sizes = [8, 32], strides = [1, 1]} : vector<8x128xf32> to vector<8x32xf32>
    %224 = arith.negf %223 : vector<8x32xf32>
    %225 = math.exp %224 : vector<8x32xf32>
    %cst_55 = arith.constant 1.000000e+00 : f32
    %226 = vector.broadcast %cst_55 : f32 to vector<8x32xf32>
    %227 = arith.addf %226, %225 : vector<8x32xf32>
    %228 = arith.divf %226, %227 : vector<8x32xf32>
    %229 = vector.extract_strided_slice %222 {offsets = [0, 32], sizes = [8, 32], strides = [1, 1]} : vector<8x128xf32> to vector<8x32xf32>
    %230 = arith.negf %229 : vector<8x32xf32>
    %231 = math.exp %230 : vector<8x32xf32>
    %cst_56 = arith.constant 1.000000e+00 : f32
    %232 = vector.broadcast %cst_56 : f32 to vector<8x32xf32>
    %233 = arith.addf %232, %231 : vector<8x32xf32>
    %234 = arith.divf %232, %233 : vector<8x32xf32>
    %235 = vector.extract_strided_slice %222 {offsets = [0, 64], sizes = [8, 32], strides = [1, 1]} : vector<8x128xf32> to vector<8x32xf32>
    %236 = math.tanh %235 : vector<8x32xf32>
    %237 = vector.extract_strided_slice %222 {offsets = [0, 96], sizes = [8, 32], strides = [1, 1]} : vector<8x128xf32> to vector<8x32xf32>
    %238 = arith.negf %237 : vector<8x32xf32>
    %239 = math.exp %238 : vector<8x32xf32>
    %cst_57 = arith.constant 1.000000e+00 : f32
    %240 = vector.broadcast %cst_57 : f32 to vector<8x32xf32>
    %241 = arith.addf %240, %239 : vector<8x32xf32>
    %242 = arith.divf %240, %241 : vector<8x32xf32>
    %243 = arith.mulf %234, %184 : vector<8x32xf32>
    %244 = arith.mulf %228, %236 : vector<8x32xf32>
    %245 = arith.addf %243, %244 : vector<8x32xf32>
    %246 = math.tanh %245 : vector<8x32xf32>
    %247 = arith.mulf %242, %246 : vector<8x32xf32>
    %c0_58 = arith.constant 0 : index
    %c3_59 = arith.constant 3 : index
    %c0_60 = arith.constant 0 : index
    %248 = vector.load %arg8[%c0_58, %c3_59, %c0_60] : memref<8x8x32xf32, #tpu.memory_space<vmem>>, vector<8x1x32xf32>
    %249 = vector.shape_cast %248 : vector<8x1x32xf32> to vector<8x32xf32>
    %250 = vector.shape_cast %247 : vector<8x32xf32> to vector<8x1x32xf32>
    tpu.vector_store %arg8[%c0_58, %c3_59, %c0_60], %250 {strides = array<i32>} : memref<8x8x32xf32, #tpu.memory_space<vmem>>, vector<8x1x32xf32>,
    %c0_61 = arith.constant 0 : index
    %c4 = arith.constant 4 : index
    %c0_62 = arith.constant 0 : index
    %251 = vector.load %arg1[%c0_61, %c4, %c0_62] : memref<8x8x128xf32, #tpu.memory_space<vmem>>, vector<8x1x128xf32>
    %252 = vector.shape_cast %251 : vector<8x1x128xf32> to vector<8x128xf32>
    %cst_63 = arith.constant dense<0.000000e+00> : vector<8x128xf32>
    %253 = tpu.matmul %218, %0, %cst_63 {dimension_numbers = #tpu.dot_dimension_numbers<[1], [0], [0], [1], [0, 0, 1, 1], [], []>} : vector<8x32xf32>, vector<32x128xf32>, vector<8x128xf32> -> vector<8x128xf32>
    %254 = arith.addf %252, %253 : vector<8x128xf32>
    %255 = vector.extract_strided_slice %254 {offsets = [0, 0], sizes = [8, 32], strides = [1, 1]} : vector<8x128xf32> to vector<8x32xf32>
    %256 = arith.negf %255 : vector<8x32xf32>
    %257 = math.exp %256 : vector<8x32xf32>
    %cst_64 = arith.constant 1.000000e+00 : f32
    %258 = vector.broadcast %cst_64 : f32 to vector<8x32xf32>
    %259 = arith.addf %258, %257 : vector<8x32xf32>
    %260 = arith.divf %258, %259 : vector<8x32xf32>
    %261 = vector.extract_strided_slice %254 {offsets = [0, 32], sizes = [8, 32], strides = [1, 1]} : vector<8x128xf32> to vector<8x32xf32>
    %262 = arith.negf %261 : vector<8x32xf32>
    %263 = math.exp %262 : vector<8x32xf32>
    %cst_65 = arith.constant 1.000000e+00 : f32
    %264 = vector.broadcast %cst_65 : f32 to vector<8x32xf32>
    %265 = arith.addf %264, %263 : vector<8x32xf32>
    %266 = arith.divf %264, %265 : vector<8x32xf32>
    %267 = vector.extract_strided_slice %254 {offsets = [0, 64], sizes = [8, 32], strides = [1, 1]} : vector<8x128xf32> to vector<8x32xf32>
    %268 = math.tanh %267 : vector<8x32xf32>
    %269 = vector.extract_strided_slice %254 {offsets = [0, 96], sizes = [8, 32], strides = [1, 1]} : vector<8x128xf32> to vector<8x32xf32>
    %270 = arith.negf %269 : vector<8x32xf32>
    %271 = math.exp %270 : vector<8x32xf32>
    %cst_66 = arith.constant 1.000000e+00 : f32
    %272 = vector.broadcast %cst_66 : f32 to vector<8x32xf32>
    %273 = arith.addf %272, %271 : vector<8x32xf32>
    %274 = arith.divf %272, %273 : vector<8x32xf32>
    %275 = arith.mulf %266, %216 : vector<8x32xf32>
    %276 = arith.mulf %260, %268 : vector<8x32xf32>
    %277 = arith.addf %275, %276 : vector<8x32xf32>
    %278 = math.tanh %277 : vector<8x32xf32>
    %279 = arith.mulf %274, %278 : vector<8x32xf32>
    %280 = tpu.concatenate %279, %247 in 1 : vector<8x32xf32>, vector<8x32xf32> -> vector<8x64xf32>
    %cst_67 = arith.constant dense<0.000000e+00> : vector<8x128xf32>
    %281 = tpu.matmul %280, %1, %cst_67 {dimension_numbers = #tpu.dot_dimension_numbers<[1], [0], [0], [1], [0, 0, 1, 1], [], []>} : vector<8x64xf32>, vector<64x128xf32>, vector<8x128xf32> -> vector<8x128xf32>
    %282 = vector.broadcast %2 : vector<1x128xf32> to vector<8x128xf32>
    %283 = arith.addf %281, %282 : vector<8x128xf32>
    %284 = vector.extract_strided_slice %283 {offsets = [0, 0], sizes = [8, 32], strides = [1, 1]} : vector<8x128xf32> to vector<8x32xf32>
    %285 = arith.negf %284 : vector<8x32xf32>
    %286 = math.exp %285 : vector<8x32xf32>
    %cst_68 = arith.constant 1.000000e+00 : f32
    %287 = vector.broadcast %cst_68 : f32 to vector<8x32xf32>
    %288 = arith.addf %287, %286 : vector<8x32xf32>
    %289 = arith.divf %287, %288 : vector<8x32xf32>
    %290 = vector.extract_strided_slice %283 {offsets = [0, 32], sizes = [8, 32], strides = [1, 1]} : vector<8x128xf32> to vector<8x32xf32>
    %291 = arith.negf %290 : vector<8x32xf32>
    %292 = math.exp %291 : vector<8x32xf32>
    %cst_69 = arith.constant 1.000000e+00 : f32
    %293 = vector.broadcast %cst_69 : f32 to vector<8x32xf32>
    %294 = arith.addf %293, %292 : vector<8x32xf32>
    %295 = arith.divf %293, %294 : vector<8x32xf32>
    %296 = vector.extract_strided_slice %283 {offsets = [0, 64], sizes = [8, 32], strides = [1, 1]} : vector<8x128xf32> to vector<8x32xf32>
    %297 = math.tanh %296 : vector<8x32xf32>
    %298 = vector.extract_strided_slice %283 {offsets = [0, 96], sizes = [8, 32], strides = [1, 1]} : vector<8x128xf32> to vector<8x32xf32>
    %299 = arith.negf %298 : vector<8x32xf32>
    %300 = math.exp %299 : vector<8x32xf32>
    %cst_70 = arith.constant 1.000000e+00 : f32
    %301 = vector.broadcast %cst_70 : f32 to vector<8x32xf32>
    %302 = arith.addf %301, %300 : vector<8x32xf32>
    %303 = arith.divf %301, %302 : vector<8x32xf32>
    %304 = arith.mulf %295, %245 : vector<8x32xf32>
    %305 = arith.mulf %289, %297 : vector<8x32xf32>
    %306 = arith.addf %304, %305 : vector<8x32xf32>
    %307 = math.tanh %306 : vector<8x32xf32>
    %308 = arith.mulf %303, %307 : vector<8x32xf32>
    %c0_71 = arith.constant 0 : index
    %c4_72 = arith.constant 4 : index
    %c0_73 = arith.constant 0 : index
    %309 = vector.load %arg8[%c0_71, %c4_72, %c0_73] : memref<8x8x32xf32, #tpu.memory_space<vmem>>, vector<8x1x32xf32>
    %310 = vector.shape_cast %309 : vector<8x1x32xf32> to vector<8x32xf32>
    %311 = vector.shape_cast %308 : vector<8x32xf32> to vector<8x1x32xf32>
    tpu.vector_store %arg8[%c0_71, %c4_72, %c0_73], %311 {strides = array<i32>} : memref<8x8x32xf32, #tpu.memory_space<vmem>>, vector<8x1x32xf32>,
    %c0_74 = arith.constant 0 : index
    %c5 = arith.constant 5 : index
    %c0_75 = arith.constant 0 : index
    %312 = vector.load %arg1[%c0_74, %c5, %c0_75] : memref<8x8x128xf32, #tpu.memory_space<vmem>>, vector<8x1x128xf32>
    %313 = vector.shape_cast %312 : vector<8x1x128xf32> to vector<8x128xf32>
    %cst_76 = arith.constant dense<0.000000e+00> : vector<8x128xf32>
    %314 = tpu.matmul %279, %0, %cst_76 {dimension_numbers = #tpu.dot_dimension_numbers<[1], [0], [0], [1], [0, 0, 1, 1], [], []>} : vector<8x32xf32>, vector<32x128xf32>, vector<8x128xf32> -> vector<8x128xf32>
    %315 = arith.addf %313, %314 : vector<8x128xf32>
    %316 = vector.extract_strided_slice %315 {offsets = [0, 0], sizes = [8, 32], strides = [1, 1]} : vector<8x128xf32> to vector<8x32xf32>
    %317 = arith.negf %316 : vector<8x32xf32>
    %318 = math.exp %317 : vector<8x32xf32>
    %cst_77 = arith.constant 1.000000e+00 : f32
    %319 = vector.broadcast %cst_77 : f32 to vector<8x32xf32>
    %320 = arith.addf %319, %318 : vector<8x32xf32>
    %321 = arith.divf %319, %320 : vector<8x32xf32>
    %322 = vector.extract_strided_slice %315 {offsets = [0, 32], sizes = [8, 32], strides = [1, 1]} : vector<8x128xf32> to vector<8x32xf32>
    %323 = arith.negf %322 : vector<8x32xf32>
    %324 = math.exp %323 : vector<8x32xf32>
    %cst_78 = arith.constant 1.000000e+00 : f32
    %325 = vector.broadcast %cst_78 : f32 to vector<8x32xf32>
    %326 = arith.addf %325, %324 : vector<8x32xf32>
    %327 = arith.divf %325, %326 : vector<8x32xf32>
    %328 = vector.extract_strided_slice %315 {offsets = [0, 64], sizes = [8, 32], strides = [1, 1]} : vector<8x128xf32> to vector<8x32xf32>
    %329 = math.tanh %328 : vector<8x32xf32>
    %330 = vector.extract_strided_slice %315 {offsets = [0, 96], sizes = [8, 32], strides = [1, 1]} : vector<8x128xf32> to vector<8x32xf32>
    %331 = arith.negf %330 : vector<8x32xf32>
    %332 = math.exp %331 : vector<8x32xf32>
    %cst_79 = arith.constant 1.000000e+00 : f32
    %333 = vector.broadcast %cst_79 : f32 to vector<8x32xf32>
    %334 = arith.addf %333, %332 : vector<8x32xf32>
    %335 = arith.divf %333, %334 : vector<8x32xf32>
    %336 = arith.mulf %327, %277 : vector<8x32xf32>
    %337 = arith.mulf %321, %329 : vector<8x32xf32>
    %338 = arith.addf %336, %337 : vector<8x32xf32>
    %339 = math.tanh %338 : vector<8x32xf32>
    %340 = arith.mulf %335, %339 : vector<8x32xf32>
    %341 = tpu.concatenate %340, %308 in 1 : vector<8x32xf32>, vector<8x32xf32> -> vector<8x64xf32>
    %cst_80 = arith.constant dense<0.000000e+00> : vector<8x128xf32>
    %342 = tpu.matmul %341, %1, %cst_80 {dimension_numbers = #tpu.dot_dimension_numbers<[1], [0], [0], [1], [0, 0, 1, 1], [], []>} : vector<8x64xf32>, vector<64x128xf32>, vector<8x128xf32> -> vector<8x128xf32>
    %343 = vector.broadcast %2 : vector<1x128xf32> to vector<8x128xf32>
    %344 = arith.addf %342, %343 : vector<8x128xf32>
    %345 = vector.extract_strided_slice %344 {offsets = [0, 0], sizes = [8, 32], strides = [1, 1]} : vector<8x128xf32> to vector<8x32xf32>
    %346 = arith.negf %345 : vector<8x32xf32>
    %347 = math.exp %346 : vector<8x32xf32>
    %cst_81 = arith.constant 1.000000e+00 : f32
    %348 = vector.broadcast %cst_81 : f32 to vector<8x32xf32>
    %349 = arith.addf %348, %347 : vector<8x32xf32>
    %350 = arith.divf %348, %349 : vector<8x32xf32>
    %351 = vector.extract_strided_slice %344 {offsets = [0, 32], sizes = [8, 32], strides = [1, 1]} : vector<8x128xf32> to vector<8x32xf32>
    %352 = arith.negf %351 : vector<8x32xf32>
    %353 = math.exp %352 : vector<8x32xf32>
    %cst_82 = arith.constant 1.000000e+00 : f32
    %354 = vector.broadcast %cst_82 : f32 to vector<8x32xf32>
    %355 = arith.addf %354, %353 : vector<8x32xf32>
    %356 = arith.divf %354, %355 : vector<8x32xf32>
    %357 = vector.extract_strided_slice %344 {offsets = [0, 64], sizes = [8, 32], strides = [1, 1]} : vector<8x128xf32> to vector<8x32xf32>
    %358 = math.tanh %357 : vector<8x32xf32>
    %359 = vector.extract_strided_slice %344 {offsets = [0, 96], sizes = [8, 32], strides = [1, 1]} : vector<8x128xf32> to vector<8x32xf32>
    %360 = arith.negf %359 : vector<8x32xf32>
    %361 = math.exp %360 : vector<8x32xf32>
    %cst_83 = arith.constant 1.000000e+00 : f32
    %362 = vector.broadcast %cst_83 : f32 to vector<8x32xf32>
    %363 = arith.addf %362, %361 : vector<8x32xf32>
    %364 = arith.divf %362, %363 : vector<8x32xf32>
    %365 = arith.mulf %356, %306 : vector<8x32xf32>
    %366 = arith.mulf %350, %358 : vector<8x32xf32>
    %367 = arith.addf %365, %366 : vector<8x32xf32>
    %368 = math.tanh %367 : vector<8x32xf32>
    %369 = arith.mulf %364, %368 : vector<8x32xf32>
    %c0_84 = arith.constant 0 : index
    %c5_85 = arith.constant 5 : index
    %c0_86 = arith.constant 0 : index
    %370 = vector.load %arg8[%c0_84, %c5_85, %c0_86] : memref<8x8x32xf32, #tpu.memory_space<vmem>>, vector<8x1x32xf32>
    %371 = vector.shape_cast %370 : vector<8x1x32xf32> to vector<8x32xf32>
    %372 = vector.shape_cast %369 : vector<8x32xf32> to vector<8x1x32xf32>
    tpu.vector_store %arg8[%c0_84, %c5_85, %c0_86], %372 {strides = array<i32>} : memref<8x8x32xf32, #tpu.memory_space<vmem>>, vector<8x1x32xf32>,
    %c0_87 = arith.constant 0 : index
    %c6 = arith.constant 6 : index
    %c0_88 = arith.constant 0 : index
    %373 = vector.load %arg1[%c0_87, %c6, %c0_88] : memref<8x8x128xf32, #tpu.memory_space<vmem>>, vector<8x1x128xf32>
    %374 = vector.shape_cast %373 : vector<8x1x128xf32> to vector<8x128xf32>
    %cst_89 = arith.constant dense<0.000000e+00> : vector<8x128xf32>
    %375 = tpu.matmul %340, %0, %cst_89 {dimension_numbers = #tpu.dot_dimension_numbers<[1], [0], [0], [1], [0, 0, 1, 1], [], []>} : vector<8x32xf32>, vector<32x128xf32>, vector<8x128xf32> -> vector<8x128xf32>
    %376 = arith.addf %374, %375 : vector<8x128xf32>
    %377 = vector.extract_strided_slice %376 {offsets = [0, 0], sizes = [8, 32], strides = [1, 1]} : vector<8x128xf32> to vector<8x32xf32>
    %378 = arith.negf %377 : vector<8x32xf32>
    %379 = math.exp %378 : vector<8x32xf32>
    %cst_90 = arith.constant 1.000000e+00 : f32
    %380 = vector.broadcast %cst_90 : f32 to vector<8x32xf32>
    %381 = arith.addf %380, %379 : vector<8x32xf32>
    %382 = arith.divf %380, %381 : vector<8x32xf32>
    %383 = vector.extract_strided_slice %376 {offsets = [0, 32], sizes = [8, 32], strides = [1, 1]} : vector<8x128xf32> to vector<8x32xf32>
    %384 = arith.negf %383 : vector<8x32xf32>
    %385 = math.exp %384 : vector<8x32xf32>
    %cst_91 = arith.constant 1.000000e+00 : f32
    %386 = vector.broadcast %cst_91 : f32 to vector<8x32xf32>
    %387 = arith.addf %386, %385 : vector<8x32xf32>
    %388 = arith.divf %386, %387 : vector<8x32xf32>
    %389 = vector.extract_strided_slice %376 {offsets = [0, 64], sizes = [8, 32], strides = [1, 1]} : vector<8x128xf32> to vector<8x32xf32>
    %390 = math.tanh %389 : vector<8x32xf32>
    %391 = vector.extract_strided_slice %376 {offsets = [0, 96], sizes = [8, 32], strides = [1, 1]} : vector<8x128xf32> to vector<8x32xf32>
    %392 = arith.negf %391 : vector<8x32xf32>
    %393 = math.exp %392 : vector<8x32xf32>
    %cst_92 = arith.constant 1.000000e+00 : f32
    %394 = vector.broadcast %cst_92 : f32 to vector<8x32xf32>
    %395 = arith.addf %394, %393 : vector<8x32xf32>
    %396 = arith.divf %394, %395 : vector<8x32xf32>
    %397 = arith.mulf %388, %338 : vector<8x32xf32>
    %398 = arith.mulf %382, %390 : vector<8x32xf32>
    %399 = arith.addf %397, %398 : vector<8x32xf32>
    %400 = math.tanh %399 : vector<8x32xf32>
    %401 = arith.mulf %396, %400 : vector<8x32xf32>
    %402 = tpu.concatenate %401, %369 in 1 : vector<8x32xf32>, vector<8x32xf32> -> vector<8x64xf32>
    %cst_93 = arith.constant dense<0.000000e+00> : vector<8x128xf32>
    %403 = tpu.matmul %402, %1, %cst_93 {dimension_numbers = #tpu.dot_dimension_numbers<[1], [0], [0], [1], [0, 0, 1, 1], [], []>} : vector<8x64xf32>, vector<64x128xf32>, vector<8x128xf32> -> vector<8x128xf32>
    %404 = vector.broadcast %2 : vector<1x128xf32> to vector<8x128xf32>
    %405 = arith.addf %403, %404 : vector<8x128xf32>
    %406 = vector.extract_strided_slice %405 {offsets = [0, 0], sizes = [8, 32], strides = [1, 1]} : vector<8x128xf32> to vector<8x32xf32>
    %407 = arith.negf %406 : vector<8x32xf32>
    %408 = math.exp %407 : vector<8x32xf32>
    %cst_94 = arith.constant 1.000000e+00 : f32
    %409 = vector.broadcast %cst_94 : f32 to vector<8x32xf32>
    %410 = arith.addf %409, %408 : vector<8x32xf32>
    %411 = arith.divf %409, %410 : vector<8x32xf32>
    %412 = vector.extract_strided_slice %405 {offsets = [0, 32], sizes = [8, 32], strides = [1, 1]} : vector<8x128xf32> to vector<8x32xf32>
    %413 = arith.negf %412 : vector<8x32xf32>
    %414 = math.exp %413 : vector<8x32xf32>
    %cst_95 = arith.constant 1.000000e+00 : f32
    %415 = vector.broadcast %cst_95 : f32 to vector<8x32xf32>
    %416 = arith.addf %415, %414 : vector<8x32xf32>
    %417 = arith.divf %415, %416 : vector<8x32xf32>
    %418 = vector.extract_strided_slice %405 {offsets = [0, 64], sizes = [8, 32], strides = [1, 1]} : vector<8x128xf32> to vector<8x32xf32>
    %419 = math.tanh %418 : vector<8x32xf32>
    %420 = vector.extract_strided_slice %405 {offsets = [0, 96], sizes = [8, 32], strides = [1, 1]} : vector<8x128xf32> to vector<8x32xf32>
    %421 = arith.negf %420 : vector<8x32xf32>
    %422 = math.exp %421 : vector<8x32xf32>
    %cst_96 = arith.constant 1.000000e+00 : f32
    %423 = vector.broadcast %cst_96 : f32 to vector<8x32xf32>
    %424 = arith.addf %423, %422 : vector<8x32xf32>
    %425 = arith.divf %423, %424 : vector<8x32xf32>
    %426 = arith.mulf %417, %367 : vector<8x32xf32>
    %427 = arith.mulf %411, %419 : vector<8x32xf32>
    %428 = arith.addf %426, %427 : vector<8x32xf32>
    %429 = math.tanh %428 : vector<8x32xf32>
    %430 = arith.mulf %425, %429 : vector<8x32xf32>
    %c0_97 = arith.constant 0 : index
    %c6_98 = arith.constant 6 : index
    %c0_99 = arith.constant 0 : index
    %431 = vector.load %arg8[%c0_97, %c6_98, %c0_99] : memref<8x8x32xf32, #tpu.memory_space<vmem>>, vector<8x1x32xf32>
    %432 = vector.shape_cast %431 : vector<8x1x32xf32> to vector<8x32xf32>
    %433 = vector.shape_cast %430 : vector<8x32xf32> to vector<8x1x32xf32>
    tpu.vector_store %arg8[%c0_97, %c6_98, %c0_99], %433 {strides = array<i32>} : memref<8x8x32xf32, #tpu.memory_space<vmem>>, vector<8x1x32xf32>,
    %c0_100 = arith.constant 0 : index
    %c7 = arith.constant 7 : index
    %c0_101 = arith.constant 0 : index
    %434 = vector.load %arg1[%c0_100, %c7, %c0_101] : memref<8x8x128xf32, #tpu.memory_space<vmem>>, vector<8x1x128xf32>
    %435 = vector.shape_cast %434 : vector<8x1x128xf32> to vector<8x128xf32>
    %cst_102 = arith.constant dense<0.000000e+00> : vector<8x128xf32>
    %436 = tpu.matmul %401, %0, %cst_102 {dimension_numbers = #tpu.dot_dimension_numbers<[1], [0], [0], [1], [0, 0, 1, 1], [], []>} : vector<8x32xf32>, vector<32x128xf32>, vector<8x128xf32> -> vector<8x128xf32>
    %437 = arith.addf %435, %436 : vector<8x128xf32>
    %438 = vector.extract_strided_slice %437 {offsets = [0, 0], sizes = [8, 32], strides = [1, 1]} : vector<8x128xf32> to vector<8x32xf32>
    %439 = arith.negf %438 : vector<8x32xf32>
    %440 = math.exp %439 : vector<8x32xf32>
    %cst_103 = arith.constant 1.000000e+00 : f32
    %441 = vector.broadcast %cst_103 : f32 to vector<8x32xf32>
    %442 = arith.addf %441, %440 : vector<8x32xf32>
    %443 = arith.divf %441, %442 : vector<8x32xf32>
    %444 = vector.extract_strided_slice %437 {offsets = [0, 32], sizes = [8, 32], strides = [1, 1]} : vector<8x128xf32> to vector<8x32xf32>
    %445 = arith.negf %444 : vector<8x32xf32>
    %446 = math.exp %445 : vector<8x32xf32>
    %cst_104 = arith.constant 1.000000e+00 : f32
    %447 = vector.broadcast %cst_104 : f32 to vector<8x32xf32>
    %448 = arith.addf %447, %446 : vector<8x32xf32>
    %449 = arith.divf %447, %448 : vector<8x32xf32>
    %450 = vector.extract_strided_slice %437 {offsets = [0, 64], sizes = [8, 32], strides = [1, 1]} : vector<8x128xf32> to vector<8x32xf32>
    %451 = math.tanh %450 : vector<8x32xf32>
    %452 = vector.extract_strided_slice %437 {offsets = [0, 96], sizes = [8, 32], strides = [1, 1]} : vector<8x128xf32> to vector<8x32xf32>
    %453 = arith.negf %452 : vector<8x32xf32>
    %454 = math.exp %453 : vector<8x32xf32>
    %cst_105 = arith.constant 1.000000e+00 : f32
    %455 = vector.broadcast %cst_105 : f32 to vector<8x32xf32>
    %456 = arith.addf %455, %454 : vector<8x32xf32>
    %457 = arith.divf %455, %456 : vector<8x32xf32>
    %458 = arith.mulf %449, %399 : vector<8x32xf32>
    %459 = arith.mulf %443, %451 : vector<8x32xf32>
    %460 = arith.addf %458, %459 : vector<8x32xf32>
    %461 = math.tanh %460 : vector<8x32xf32>
    %462 = arith.mulf %457, %461 : vector<8x32xf32>
    %463 = tpu.concatenate %462, %430 in 1 : vector<8x32xf32>, vector<8x32xf32> -> vector<8x64xf32>
    %cst_106 = arith.constant dense<0.000000e+00> : vector<8x128xf32>
    %464 = tpu.matmul %463, %1, %cst_106 {dimension_numbers = #tpu.dot_dimension_numbers<[1], [0], [0], [1], [0, 0, 1, 1], [], []>} : vector<8x64xf32>, vector<64x128xf32>, vector<8x128xf32> -> vector<8x128xf32>
    %465 = vector.broadcast %2 : vector<1x128xf32> to vector<8x128xf32>
    %466 = arith.addf %464, %465 : vector<8x128xf32>
    %467 = vector.extract_strided_slice %466 {offsets = [0, 0], sizes = [8, 32], strides = [1, 1]} : vector<8x128xf32> to vector<8x32xf32>
    %468 = arith.negf %467 : vector<8x32xf32>
    %469 = math.exp %468 : vector<8x32xf32>
    %cst_107 = arith.constant 1.000000e+00 : f32
    %470 = vector.broadcast %cst_107 : f32 to vector<8x32xf32>
    %471 = arith.addf %470, %469 : vector<8x32xf32>
    %472 = arith.divf %470, %471 : vector<8x32xf32>
    %473 = vector.extract_strided_slice %466 {offsets = [0, 32], sizes = [8, 32], strides = [1, 1]} : vector<8x128xf32> to vector<8x32xf32>
    %474 = arith.negf %473 : vector<8x32xf32>
    %475 = math.exp %474 : vector<8x32xf32>
    %cst_108 = arith.constant 1.000000e+00 : f32
    %476 = vector.broadcast %cst_108 : f32 to vector<8x32xf32>
    %477 = arith.addf %476, %475 : vector<8x32xf32>
    %478 = arith.divf %476, %477 : vector<8x32xf32>
    %479 = vector.extract_strided_slice %466 {offsets = [0, 64], sizes = [8, 32], strides = [1, 1]} : vector<8x128xf32> to vector<8x32xf32>
    %480 = math.tanh %479 : vector<8x32xf32>
    %481 = vector.extract_strided_slice %466 {offsets = [0, 96], sizes = [8, 32], strides = [1, 1]} : vector<8x128xf32> to vector<8x32xf32>
    %482 = arith.negf %481 : vector<8x32xf32>
    %483 = math.exp %482 : vector<8x32xf32>
    %cst_109 = arith.constant 1.000000e+00 : f32
    %484 = vector.broadcast %cst_109 : f32 to vector<8x32xf32>
    %485 = arith.addf %484, %483 : vector<8x32xf32>
    %486 = arith.divf %484, %485 : vector<8x32xf32>
    %487 = arith.mulf %478, %428 : vector<8x32xf32>
    %488 = arith.mulf %472, %480 : vector<8x32xf32>
    %489 = arith.addf %487, %488 : vector<8x32xf32>
    %490 = math.tanh %489 : vector<8x32xf32>
    %491 = arith.mulf %486, %490 : vector<8x32xf32>
    %c0_110 = arith.constant 0 : index
    %c7_111 = arith.constant 7 : index
    %c0_112 = arith.constant 0 : index
    %492 = vector.load %arg8[%c0_110, %c7_111, %c0_112] : memref<8x8x32xf32, #tpu.memory_space<vmem>>, vector<8x1x32xf32>
    %493 = vector.shape_cast %492 : vector<8x1x32xf32> to vector<8x32xf32>
    %494 = vector.shape_cast %491 : vector<8x32xf32> to vector<8x1x32xf32>
    tpu.vector_store %arg8[%c0_110, %c7_111, %c0_112], %494 {strides = array<i32>} : memref<8x8x32xf32, #tpu.memory_space<vmem>>, vector<8x1x32xf32>,
    %c0_113 = arith.constant 0 : index
    %c0_114 = arith.constant 0 : index
    %c0_115 = arith.constant 0 : index
    %495 = vector.load %arg8[%c0_113, %c0_114, %c0_115] : memref<8x8x32xf32, #tpu.memory_space<vmem>>, vector<8x8x32xf32>
    %496 = vector.shape_cast %495 : vector<8x8x32xf32> to vector<64x32xf32>
    %c0_116 = arith.constant 0 : index
    %c0_117 = arith.constant 0 : index
    %497 = vector.load %arg5[%c0_116, %c0_117] : memref<32x128xf32, #tpu.memory_space<vmem>>, vector<32x128xf32>
    %cst_118 = arith.constant dense<0.000000e+00> : vector<64x128xf32>
    %498 = tpu.matmul %496, %497, %cst_118 {dimension_numbers = #tpu.dot_dimension_numbers<[1], [0], [0], [1], [0, 0, 1, 1], [], []>} : vector<64x32xf32>, vector<32x128xf32>, vector<64x128xf32> -> vector<64x128xf32>
    %c0_119 = arith.constant 0 : index
    %c0_120 = arith.constant 0 : index
    %499 = vector.load %arg6[%c0_119, %c0_120] : memref<1x128xf32, #tpu.memory_space<vmem>>, vector<1x128xf32>
    %500 = vector.broadcast %499 : vector<1x128xf32> to vector<64x128xf32>
    %501 = arith.addf %498, %500 : vector<64x128xf32>
    %cst_121 = arith.constant dense<0xFF800000> : vector<64xf32>
    %502 = vector.multi_reduction <maximumf>, %501, %cst_121 [1] : vector<64x128xf32> to vector<64xf32>
    %503 = vector.shape_cast %502 : vector<64xf32> to vector<64x1xf32>
    %504 = vector.broadcast %503 : vector<64x1xf32> to vector<64x128xf32>
    %505 = arith.subf %501, %504 : vector<64x128xf32>
    %506 = math.exp %505 : vector<64x128xf32>
    %cst_122 = arith.constant dense<0.000000e+00> : vector<64xf32>
    %507 = vector.multi_reduction <add>, %506, %cst_122 [1] : vector<64x128xf32> to vector<64xf32>
    %508 = vector.shape_cast %507 : vector<64xf32> to vector<64x1xf32>
    %509 = math.log %508 : vector<64x1xf32>
    %510 = arith.addf %509, %503 : vector<64x1xf32>
    %511 = vector.broadcast %510 : vector<64x1xf32> to vector<64x128xf32>
    %512 = arith.subf %501, %511 : vector<64x128xf32>
    %513 = vector.shape_cast %512 : vector<64x128xf32> to vector<8x8x128xf32>
    %c0_123 = arith.constant 0 : index
    %c0_124 = arith.constant 0 : index
    %c0_125 = arith.constant 0 : index
    %514 = vector.load %arg7[%c0_123, %c0_124, %c0_125] : memref<8x8x128xf32, #tpu.memory_space<vmem>>, vector<8x8x128xf32>
    tpu.vector_store %arg7[%c0_123, %c0_124, %c0_125], %513 {strides = array<i32>} : memref<8x8x128xf32, #tpu.memory_space<vmem>>, vector<8x8x128xf32>,
    return
  }
  func.func @transform_0(%arg0: i32) -> (i32, i32, i32) {
    %c0_i32 = arith.constant 0 : i32
    %c0_i32_0 = arith.constant 0 : i32
    %c0_i32_1 = arith.constant 0 : i32
    return %arg0, %c0_i32, %c0_i32_0 : i32, i32, i32
  }
  func.func @transform_1(%arg0: i32) -> (i32, i32) {
    %c0_i32 = arith.constant 0 : i32
    %c0_i32_0 = arith.constant 0 : i32
    %c0_i32_1 = arith.constant 0 : i32
    return %c0_i32, %c0_i32_0 : i32, i32
  }
  func.func @transform_2(%arg0: i32) -> (i32, i32) {
    %c0_i32 = arith.constant 0 : i32
    %c0_i32_0 = arith.constant 0 : i32
    %c0_i32_1 = arith.constant 0 : i32
    return %c0_i32, %c0_i32_0 : i32, i32
  }
  func.func @transform_3(%arg0: i32) -> (i32, i32) {
    %c0_i32 = arith.constant 0 : i32
    %c0_i32_0 = arith.constant 0 : i32
    %c0_i32_1 = arith.constant 0 : i32
    return %c0_i32, %c0_i32_0 : i32, i32
  }
  func.func @transform_4(%arg0: i32) -> (i32, i32) {
    %c0_i32 = arith.constant 0 : i32
    %c0_i32_0 = arith.constant 0 : i32
    %c0_i32_1 = arith.constant 0 : i32
    return %c0_i32, %c0_i32_0 : i32, i32
  }
  func.func @transform_5(%arg0: i32) -> (i32, i32) {
    %c0_i32 = arith.constant 0 : i32
    %c0_i32_0 = arith.constant 0 : i32
    %c0_i32_1 = arith.constant 0 : i32
    return %c0_i32, %c0_i32_0 : i32, i32
  }
  func.func @transform_6(%arg0: i32) -> (i32, i32, i32) {
    %c0_i32 = arith.constant 0 : i32
    %c0_i32_0 = arith.constant 0 : i32
    %c0_i32_1 = arith.constant 0 : i32
    return %arg0, %c0_i32, %c0_i32_0 : i32, i32, i32
  }
}

</mosaic_0001>

<bundles_post_ra>
// kernel: custom_model_forward.1
= control target key start
LH: loop header
LB: loop body
LE: loop exit
PB: predicated region body
PF: predicated region fallthrough
CT: control target
= control target key end

     0   :  { %v5835_v0 = vmov 0.0|0.0   ;;  %vm5836_vm0 = vmmov 0   ;;  %v5837_v4 = vmov 0.0   ;;  %s5838_s16 = smov 64   ;;  %s5839_s21 = smov 32   ;;  %vm343_vm1 = vcmask 1041409   ;;  %s7602_s1 = inlined_call_operand.vmem [shape: f32[32,128], index: 1, kind: input, shape index: {}]   ;;  %s7603_s0 = inlined_call_operand.vmem [shape: f32[8,8,128], index: 0, kind: input, shape index: {}]   ;;  %s7604_s2 = inlined_call_operand.vmem [shape: f32[64,128], index: 2, kind: input, shape index: {}]   ;;  %s7605_s3 = inlined_call_operand.vmem [shape: f32[1,128], index: 3, kind: input, shape index: {}]   ;;  %s7606_s4 = inlined_call_operand.vmem [shape: f32[32,128], index: 4, kind: input, shape index: {}]   ;;  %s7607_s5 = inlined_call_operand.vmem [shape: f32[1,128], index: 5, kind: input, shape index: {}]   ;;  %s7608_s6 = inlined_call_operand.vmem [shape: f32[8,8,128], index: 6, kind: output, shape index: {}]  }
   0x1   :  { %5067 = vmatprep.subr.bf16.mxu0 %v5835_v0  ;;  %v23_v1 = vld [vmem:[%s7602_s1] sm:$0xff]  ;;  %v24_v2 = vld [vmem:[%s7602_s1 + $0x8] sm:$0xff]  ;;  %v25_v3 = vld [vmem:[%s7602_s1 + $0x10] sm:$0xff]  ;;  %4815 = vmatprep.mubr.msk.f32.mxu0 %vm5836_vm0, %v5837_v4  ;;  %vm346_vm2 = vcmask 1042434   ;;  %vm349_vm3 = vcmask 1043459   ;;  %vm352_vm4 = vcmask 1044484  }
   0x2   :  { %v5888_v5 = vpack.c.bf16 %v24_v2, %v23_v1  ;;  %v26_v6 = vld [vmem:[%s7602_s1 + $0x18] sm:$0xff]  ;;  %5073 = vmatprep.subr.bf16.mxu1 %v5835_v0  ;;  %4834 = vmatprep.mubr.msk.f32.mxu1 %vm5836_vm0, %v5837_v4  ;;  %v36_v8 = vld [vmem:[%s7603_s0] sm:$0x1]  ;;  %v41_v16 = vld [vmem:[%s7603_s0 + $0x28] sm:$0x1]  ;;  %vm355_vm5 = vcmask 1045509  }
   0x3   :  { %v5897_v7 = vpack.c.bf16 %v26_v6, %v25_v3  ;;  %v39_v10 = vld [vmem:[%s7603_s0 + $0x18] sm:$0x1]  ;;  %v37_v21 = vld [vmem:[%s7603_s0 + $0x8] sm:$0x1]  ;;  %v38_v26 = vld [vmem:[%s7603_s0 + $0x10] sm:$0x1] }
   0x4   :  { %5069 = vmatpush3.bf16.msra.mxu0 %v5888_v5  ;;  %v43_v18 = vld [vmem:[%s7603_s0 + $0x38] sm:$0x1]  ;;  %v40_v30 = vld [vmem:[%s7603_s0 + $0x20] sm:$0x1]  ;;  %v42_v33 = vld [vmem:[%s7603_s0 + $0x30] sm:$0x1] }
   0x5   :  { %5070 = vmatprep.subr.bf16.mxu0 %v5835_v0  ;;  %vm358_vm6 = vcmask 1046534   ;;  %vm361_vm7 = vcmask 1047559   ;;  %vm44_vm8 = vcmask 261120   ;;  %vm373_vm9 = vcmask 523264  }
   0x6   :  { %vm577_vm10 = vcmask 253952  }
   0x8   :  { %5072 = vmatpush3.bf16.msra.mxu0 %v5897_v7 }
   0x9   :  { %5085 = vmatprep.subr.bf16.mxu0 %v5835_v0 }
   0xb   :  { %4816 = vmatmul.mubr.f32.vlgmr.msra.gmra.mrb[0].mxu0 %v5837_v4 }
   0xc   :  { %5087 = vmatpush3.bf16.msra.mxu0 %v5888_v5  ;;  %4845 = vmatprep.mubr.msk.f32.mxu0 %vm5836_vm0, %v5837_v4 }
   0xd   :  { %5088 = vmatprep.subr.bf16.mxu0 %v5835_v0 }
  0x10   :  { %5090 = vmatpush3.bf16.msra.mxu0 %v5897_v7 }
  0x11   :  { %5091 = vmatprep.subr.bf16.mxu0 %v5835_v0 }
  0xde   :  { %v114_v9 = vpop.f32.mrb[0].mxu0 }
  0xdf   :  { %v121_v11 = vrot.slane %v114_v9, 3  ;;  %v4817_v12 = vpop.f32.mrb[1].mxu0  ;;  %v134_v13 = vadd.f32 %v114_v9, %v36_v8  ;;  %v123_v15 = vrot.slane %v114_v9, 5  ;;  %v125_v17 = vrot.slane %v114_v9, 7 }
  0xe0   :  { %v119_v20 = vrot.slane %v114_v9, 1  ;;  %v120_v24 = vrot.slane %v114_v9, 2  ;;  %v122_v28 = vrot.slane %v114_v9, 4  ;;  %v124_v31 = vrot.slane %v114_v9, 6 }
  0xe1   :  { %v137_v14 = vadd.f32 %v121_v11, %v39_v10  ;;  %5225 = vtanh.f32 %v134_v13  ;;  %v139_v19 = vadd.f32 %v123_v15, %v41_v16  ;;  %v141_v22 = vadd.f32 %v125_v17, %v43_v18 }
  0xe2   :  { %v135_v25 = vadd.f32 %v119_v20, %v37_v21  ;;  %v136_v29 = vadd.f32 %v120_v24, %v38_v26  ;;  %v138_v32 = vadd.f32 %v122_v28, %v40_v30  ;;  %v140_v35 = vadd.f32 %v124_v31, %v42_v33 }
  0xe3   :  { %5227 = vtanh.f32 %v137_v14  ;;  %v4586_v41 = vmul.f32 -1.442695, %v134_v13  ;;  %v4589_v46 = vmul.f32 -1.442695, %v137_v14  ;;  %v4591_v48 = vmul.f32 -1.442695, %v139_v19 }
  0xe4   :  { %5229 = vtanh.f32 %v139_v19  ;;  %v4587_v43 = vmul.f32 -1.442695, %v135_v25  ;;  %v4588_v45 = vmul.f32 -1.442695, %v136_v29  ;;  %v4590_v47 = vmul.f32 -1.442695, %v138_v32 }
  0xe5   :  { %5231 = vtanh.f32 %v141_v22  ;;  %v4592_v49 = vmul.f32 -1.442695, %v140_v35  ;;  %v4593_v51 = vmul.f32 -1.442695, %v141_v22 }
  0xe6   :  { %5233 = vtanh.f32 %v135_v25 }
  0xe7   :  { %5235 = vtanh.f32 %v136_v29 }
  0xe8   :  { %5237 = vtanh.f32 %v138_v32 }
  0xe9   :  { %5239 = vtanh.f32 %v140_v35 }
  0xea   :  { %5241 = vpow2.f32 %v4586_v41 }
  0xeb   :  { %v5226_v23 = vpop.eup %5225  ;;  %5243 = vpow2.f32 %v4587_v43 }
  0xec   :  { %214 = vrot.lane.b32.xlu1 %v5226_v23, %s5838_s16 }
  0xed   :  { %v5228_v27 = vpop.eup %5227 }
  0xee   :  { %v5230_v34 = vpop.eup %5229 }
  0xef   :  { %v5232_v36 = vpop.eup %5231 }
  0xf0   :  { %220 = vrot.lane.b32.xlu1 %v5228_v27, %s5838_s16  ;;  %v5234_v37 = vpop.eup %5233 }
  0xf1   :  { %216 = vrot.lane.b32.xlu0 %v5234_v37, %s5838_s16  ;;  %v5236_v38 = vpop.eup %5235 }
  0xf2   :  { %v5238_v39 = vpop.eup %5237 }
  0xf3   :  { %v5240_v40 = vpop.eup %5239 }
  0xf4   :  { %224 = vrot.lane.b32.xlu1 %v5230_v34, %s5838_s16  ;;  %v5242_v42 = vpop.eup %5241 }
  0xf5   :  { %218 = vrot.lane.b32.xlu0 %v5236_v38, %s5838_s16  ;;  %v166_v44 = vadd.f32 1.0, %v5242_v42  ;;  %v5244_v50 = vpop.eup %5243 }
  0xf6   :  { %v167_v53 = vadd.f32 1.0, %v5244_v50 }
  0xf7   :  { %5245 = vrcp.f32 %v166_v44 }
  0xf8   :  { %228 = vrot.lane.b32.xlu1 %v5232_v36, %s5838_s16  ;;  %5247 = vpow2.f32 %v4588_v45 }
  0xf9   :  { %222 = vrot.lane.b32.xlu0 %v5238_v39, %s5838_s16  ;;  %5249 = vpow2.f32 %v4589_v46 }
  0xfa   :  { %5251 = vpow2.f32 %v4590_v47 }
  0xfb   :  { %5253 = vpow2.f32 %v4591_v48 }
  0xfc   :  { %5255 = vpow2.f32 %v4592_v49 }
  0xfd   :  { %226 = vrot.lane.b32.xlu0 %v5240_v40, %s5838_s16  ;;  %5257 = vpow2.f32 %v4593_v51 }
  0xfe   :  { %5259 = vrcp.f32 %v167_v53 }
 0x101   :  { %v5941_v52 = vpop.eup %5245 }
 0x102   :  { %v5248_v55 = vpop.eup %5247  ;;  %v198_v29 = vmul.f32 0.0, %v5941_v52 }
 0x103   :  { %v5250_v57 = vpop.eup %5249  ;;  %v168_v58 = vadd.f32 1.0, %v5248_v55 }
 0x104   :  { %v5252_v59 = vpop.eup %5251  ;;  %v169_v60 = vadd.f32 1.0, %v5250_v57 }
 0x105   :  { %v5254_v61 = vpop.eup %5253  ;;  %5261 = vrcp.f32 %v168_v58  ;;  %v170_v62 = vadd.f32 1.0, %v5252_v59  ;;  %v27_v59 = vld [vmem:[%s7604_s2] sm:$0xff] }
 0x106   :  { %v5256_v63 = vpop.eup %5255  ;;  %5263 = vrcp.f32 %v169_v60  ;;  %v171_v1 = vadd.f32 1.0, %v5254_v61  ;;  %v28_v60 = vld [vmem:[%s7604_s2 + $0x8] sm:$0xff]  ;;  %v29_v61 = vld [vmem:[%s7604_s2 + $0x10] sm:$0xff] }
 0x107   :  { %5265 = vrcp.f32 %v170_v62  ;;  %v172_v2 = vadd.f32 1.0, %v5256_v63  ;;  %v5258_v3 = vpop.eup %5257  ;;  %v6019_v62 = vpack.c.bf16 %v28_v60, %v27_v59  ;;  %v30_v63 = vld [vmem:[%s7604_s2 + $0x18] sm:$0xff] }
 0x108   :  { %v5945_v6 = vpop.eup %5259  ;;  %5267 = vrcp.f32 %v171_v1  ;;  %v173_v11 = vadd.f32 1.0, %v5258_v3  ;;  %v6026_v3 = vpack.c.bf16 %v30_v63, %v29_v61  ;;  %v587_v61 = vld [vmem:[%s7603_s0 + $0x9] sm:$0x1] }
 0x109   :  { %5269 = vrcp.f32 %v172_v2  ;;  %v199_v33 = vmul.f32 0.0, %v5945_v6  ;;  %5075 = vmatpush3.bf16.msra.mxu1 %v6019_v62 }
 0x10a   :  { %5271 = vrcp.f32 %v173_v11  ;;  %5076 = vmatprep.subr.bf16.mxu1 %v5835_v0 }
 0x10d   :  { %5078 = vmatpush3.bf16.msra.mxu1 %v6026_v3 }
 0x10e   :  { %5079 = vmatprep.subr.bf16.mxu1 %v5835_v0 }
 0x10f   :  { %v5949_v12 = vpop.eup %5261 }
 0x110   :  { %v5952_v15 = vpop.eup %5263  ;;  %v200_v36 = vmul.f32 0.0, %v5949_v12 }
 0x111   :  { %v5955_v16 = vpop.eup %5265  ;;  %v201_v39 = vmul.f32 0.0, %v5952_v15 }
 0x112   :  { %v5959_v21 = vpop.eup %5267  ;;  %v202_v40 = vmul.f32 0.0, %v5955_v16 }
 0x113   :  { %v5963_v22 = vpop.eup %5269  ;;  %v203_v45 = vmul.f32 0.0, %v5959_v21 }
 0x114   :  { %v5969_v27 = vpop.eup %5271  ;;  %v204_v46 = vmul.f32 0.0, %v5963_v22 }
 0x115   :  { %v205_v53 = vmul.f32 0.0, %v5969_v27 }
 0x15e   :  { %v215_v54 = vpop.permute.xlu1 %214 }
 0x15f   :  { %v238_v56 = vmul.f32 %v5941_v52, %v215_v54 }
 0x161   :  { %254 = vrot.lane.b32.xlu0 %v238_v56, %s5839_s21 }
 0x162   :  { %v221_v10 = vpop.permute.xlu1 %220 }
 0x163   :  { %v217_v8 = vpop.permute.xlu0 %216  ;;  %v241_v19 = vmul.f32 %v5952_v15, %v221_v10 }
 0x164   :  { %v239_v9 = vmul.f32 %v5945_v6, %v217_v8  ;;  %v31_v8 = vld [vmem:[%s7604_s2 + $0x20] sm:$0xff] }
 0x166   :  { %256 = vrot.lane.b32.xlu0 %v239_v9, %s5839_s21  ;;  %v225_v17 = vpop.permute.xlu1 %224  ;;  %v32_v9 = vld [vmem:[%s7604_s2 + $0x28] sm:$0xff] }
 0x167   :  { %v219_v13 = vpop.permute.xlu0 %218  ;;  %v243_v24 = vmul.f32 %v5959_v21, %v225_v17  ;;  %v6038_v11 = vpack.c.bf16 %v32_v9, %v31_v8  ;;  %v590_v9 = vld [vmem:[%s7603_s0 + $0x21] sm:$0x1] }
 0x168   :  { %v240_v14 = vmul.f32 %v5949_v12, %v219_v13  ;;  %v33_v13 = vld [vmem:[%s7604_s2 + $0x30] sm:$0xff] }
 0x169   :  { %5081 = vmatpush3.bf16.msra.mxu1 %v6038_v11 }
 0x16a   :  { %258 = vrot.lane.b32.xlu1 %v240_v14, %s5839_s21  ;;  %v229_v26 = vpop.permute.xlu1 %228  ;;  %v34_v14 = vld [vmem:[%s7604_s2 + $0x38] sm:$0xff]  ;;  %5082 = vmatprep.subr.bf16.mxu1 %v5835_v0 }
 0x16b   :  { %v223_v18 = vpop.permute.xlu0 %222  ;;  %v245_v28 = vmul.f32 %v5969_v27, %v229_v26  ;;  %v6048_v17 = vpack.c.bf16 %v34_v14, %v33_v13  ;;  %v589_v14 = vld [vmem:[%s7603_s0 + $0x19] sm:$0x1] }
 0x16c   :  { %v242_v20 = vmul.f32 %v5955_v16, %v223_v18 }
 0x16d   :  { %5084 = vmatpush3.bf16.msra.mxu1 %v6048_v17 }
 0x16e   :  { %260 = vrot.lane.b32.xlu1 %v241_v19, %s5839_s21  ;;  %262 = vrot.lane.b32.xlu0 %v242_v20, %s5839_s21 }
 0x16f   :  { %v227_v23 = vpop.permute.xlu0 %226  ;;  %5103 = vmatprep.subr.bf16.mxu1 %v5835_v0 }
 0x170   :  { %v244_v25 = vmul.f32 %v5963_v22, %v227_v23 }
 0x172   :  { %264 = vrot.lane.b32.xlu1 %v243_v24, %s5839_s21  ;;  %266 = vrot.lane.b32.xlu0 %v244_v25, %s5839_s21 }
 0x176   :  { %268 = vrot.lane.b32.xlu1 %v245_v28, %s5839_s21 }
 0x1d3   :  { %v255_v30 = vpop.permute.xlu0 %254 }
 0x1d4   :  { %v5974_v31 = vadd.f32 %v255_v30, %v198_v29 }
 0x1d6   :  { %5273 = vtanh.f32 %v5974_v31 }
 0x1d8   :  { %v257_v34 = vpop.permute.xlu0 %256 }
 0x1d9   :  { %v5979_v35 = vadd.f32 %v257_v34, %v199_v33 }
 0x1db   :  { %5275 = vtanh.f32 %v5979_v35 }
 0x1dc   :  { %v259_v37 = vpop.permute.xlu1 %258 }
 0x1dd   :  { %v5983_v38 = vadd.f32 %v259_v37, %v200_v36 }
 0x1df   :  { %5277 = vtanh.f32 %v5983_v38 }
 0x1e0   :  { %v5274_v32 = vpop.eup %5273  ;;  %v261_v41 = vpop.permute.xlu1 %260 }
 0x1e1   :  { %302 = vrot.lane.b32.xlu0 %v5274_v32, %s5838_s16  ;;  %v263_v42 = vpop.permute.xlu0 %262  ;;  %v5988_v43 = vadd.f32 %v261_v41, %v201_v39 }
 0x1e2   :  { %v5990_v44 = vadd.f32 %v263_v42, %v202_v40 }
 0x1e3   :  { %5279 = vtanh.f32 %v5988_v43 }
 0x1e4   :  { %5281 = vtanh.f32 %v5990_v44  ;;  %v265_v47 = vpop.permute.xlu1 %264 }
 0x1e5   :  { %v267_v48 = vpop.permute.xlu0 %266  ;;  %v5276_v49 = vpop.eup %5275  ;;  %v5996_v50 = vadd.f32 %v265_v47, %v203_v45 }
 0x1e6   :  { %v5998_v51 = vadd.f32 %v267_v48, %v204_v46  ;;  %304 = vrot.lane.b32.xlu0 %v5276_v49, %s5838_s16 }
 0x1e7   :  { %5283 = vtanh.f32 %v5996_v50 }
 0x1e8   :  { %5285 = vtanh.f32 %v5998_v51  ;;  %v269_v54 = vpop.permute.xlu1 %268 }
 0x1e9   :  { %v5278_v55 = vpop.eup %5277  ;;  %v6004_v56 = vadd.f32 %v269_v54, %v205_v53 }
 0x1ea   :  { %306 = vrot.lane.b32.xlu1 %v5278_v55, %s5838_s16 }
 0x1eb   :  { %5287 = vtanh.f32 %v6004_v56 }
 0x1ed   :  { %v5280_v57 = vpop.eup %5279 }
 0x1ee   :  { %v5282_v58 = vpop.eup %5281  ;;  %308 = vrot.lane.b32.xlu1 %v5280_v57, %s5838_s16 }
 0x1ef   :  { %310 = vrot.lane.b32.xlu0 %v5282_v58, %s5838_s16 }
 0x1f1   :  { %v5284_v1 = vpop.eup %5283 }
 0x1f2   :  { %v5286_v2 = vpop.eup %5285  ;;  %312 = vrot.lane.b32.xlu1 %v5284_v1, %s5838_s16  ;;  %v588_v1 = vld [vmem:[%s7603_s0 + $0x11] sm:$0x1] }
 0x1f3   :  { %314 = vrot.lane.b32.xlu0 %v5286_v2, %s5838_s16 }
 0x1f5   :  { %v5288_v10 = vpop.eup %5287 }
 0x1f6   :  { %316 = vrot.lane.b32.xlu1 %v5288_v10, %s5838_s16 }
 0x253   :  { %v303_v18 = vpop.permute.xlu0 %302 }
 0x254   :  { %v326_v26 = vmul.f32 %v5941_v52, %v303_v18 }
 0x258   :  { %v305_v19 = vpop.permute.xlu0 %304 }
 0x259   :  { %v327_v20 = vmul.f32 %v5945_v6, %v305_v19 }
 0x25b   :  { %v342_v24 = vrot.slane %v327_v20, 7 }
 0x25c   :  { %v307_v23 = vpop.permute.xlu1 %306 }
 0x25d   :  { %v328_v25 = vmul.f32 %v5949_v12, %v307_v23  ;;  %v344_v30 = vsel %vm343_vm1, %v342_v24, %v326_v26  ;;  %v592_v23 = vld [vmem:[%s7603_s0 + $0x31] sm:$0x1]  ;;  %v591_v26 = vld [vmem:[%s7603_s0 + $0x29] sm:$0x1] }
 0x25f   :  { %v345_v28 = vrot.slane %v328_v25, 6 }
 0x260   :  { %v309_v29 = vpop.permute.xlu1 %308 }
 0x261   :  { %v329_v32 = vmul.f32 %v5952_v15, %v309_v29  ;;  %v311_v33 = vpop.permute.xlu0 %310  ;;  %v347_v6 = vsel %vm346_vm2, %v345_v28, %v344_v30 }
 0x262   :  { %v330_v34 = vmul.f32 %v5955_v16, %v311_v33 }
 0x263   :  { %v348_v36 = vrot.slane %v329_v32, 5  ;;  %v593_v32 = vld [vmem:[%s7603_s0 + $0x39] sm:$0x1] }
 0x264   :  { %v351_v37 = vrot.slane %v330_v34, 4  ;;  %v313_v39 = vpop.permute.xlu1 %312 }
 0x265   :  { %v350_v12 = vsel %vm349_vm3, %v348_v36, %v347_v6  ;;  %v331_v52 = vmul.f32 %v5959_v21, %v313_v39  ;;  %v315_v40 = vpop.permute.xlu0 %314 }
 0x266   :  { %v332_v41 = vmul.f32 %v5963_v22, %v315_v40  ;;  %v353_v15 = vsel %vm352_vm4, %v351_v37, %v350_v12 }
 0x267   :  { %v354_v42 = vrot.slane %v331_v52, 3 }
 0x268   :  { %v357_v45 = vrot.slane %v332_v41, 2  ;;  %v317_v46 = vpop.permute.xlu1 %316 }
 0x269   :  { %v333_v16 = vmul.f32 %v5969_v27, %v317_v46  ;;  %v356_v47 = vsel %vm355_vm5, %v354_v42, %v353_v15  ;;  %v586_v27 = vld [vmem:[%s7603_s0 + $0x1] sm:$0x1] }
 0x26a   :  { %v359_v49 = vsel %vm358_vm6, %v357_v45, %v356_v47 }
 0x26b   :  { %v360_v48 = vrot.slane %v333_v16, 1 }
 0x26d   :  { %v362_v21 = vsel %vm361_vm7, %v360_v48, %v359_v49 }
 0x26e   :  { %363 = vrot.lane.b32.xlu0 %v362_v21, %s5839_s21 }
 0x2e0   :  { %v364_v22 = vpop.permute.xlu0 %363 }
 0x2e1   :  { %4846 = vmatmul.mubr.msk.f32.vlgmr.msra.gmra.mrb[2].mxu0 %vm44_vm8, %v364_v22  ;;  %v366_v53 = vsel %vm44_vm8, %v364_v22, 0.0 }
 0x2e2   :  { %4835 = vmatmul.mubr.msk.f32.vlgmr.msra.gmra.mrb[0].mxu1 %vm373_vm9, %v366_v53  ;;  %5093 = vmatpush3.bf16.msra.mxu0 %v6019_v62 }
 0x2e3   :  { %5105 = vmatpush3.bf16.msra.mxu1 %v5888_v5  ;;  %4875 = vmatprep.mubr.msk.f32.mxu1 %vm5836_vm0, %v5837_v4 }
 0x2e4   :  { %5106 = vmatprep.subr.bf16.mxu1 %v5835_v0  ;;  %5094 = vmatprep.subr.bf16.mxu0 %v5835_v0 }
 0x2e5   :  { %4864 = vmatprep.mubr.msk.f32.mxu0 %vm5836_vm0, %v5837_v4 }
 0x2e6   :  { %5096 = vmatpush3.bf16.msra.mxu0 %v6026_v3 }
 0x2e7   :  { %5108 = vmatpush3.bf16.msra.mxu1 %v5897_v7  ;;  %5097 = vmatprep.subr.bf16.mxu0 %v5835_v0 }
 0x2e8   :  { %5109 = vmatprep.subr.bf16.mxu1 %v5835_v0 }
 0x2ea   :  { %5099 = vmatpush3.bf16.msra.mxu0 %v6038_v11 }
 0x2eb   :  { %5100 = vmatprep.subr.bf16.mxu0 %v5835_v0 }
 0x2ee   :  { %5102 = vmatpush3.bf16.msra.mxu0 %v6048_v17 }
 0x2ef   :  { %5121 = vmatprep.subr.bf16.mxu0 %v5835_v0 }
 0x3b4   :  { %v662_v54 = vpop.f32.mrb[2].mxu0 }
 0x3b5   :  { %v6091_v55 = vpop.f32.mrb[0].mxu1  ;;  %v4847_v57 = vpop.f32.mrb[3].mxu0  ;;  %v682_v58 = vadd.f32 %v662_v54, %v586_v27  ;;  %v667_v60 = vrot.slane %v662_v54, 1  ;;  %v668_v63 = vrot.slane %v662_v54, 2  ;;  %v670_v2 = vrot.slane %v662_v54, 4 }
 0x3b6   :  { %v4836_v59 = vpop.f32.mrb[1].mxu1  ;;  %v669_v10 = vrot.slane %v662_v54, 3  ;;  %v672_v18 = vrot.slane %v662_v54, 6  ;;  %v671_v24 = vrot.slane %v662_v54, 5  ;;  %v673_v29 = vrot.slane %v662_v54, 7 }
 0x3b7   :  { %5289 = vtanh.f32 %v682_v58  ;;  %v683_v8 = vadd.f32 %v667_v60, %v587_v61  ;;  %v684_v13 = vadd.f32 %v668_v63, %v588_v1  ;;  %v686_v19 = vadd.f32 %v670_v2, %v590_v9 }
 0x3b8   :  { %v685_v25 = vadd.f32 %v669_v10, %v589_v14  ;;  %v688_v28 = vadd.f32 %v672_v18, %v592_v23  ;;  %v687_v30 = vadd.f32 %v671_v24, %v591_v26  ;;  %v689_v33 = vadd.f32 %v673_v29, %v593_v32 }
 0x3b9   :  { %5291 = vtanh.f32 %v683_v8  ;;  %v4598_v40 = vmul.f32 -1.442695, %v682_v58  ;;  %v4599_v41 = vmul.f32 -1.442695, %v683_v8  ;;  %v4600_v42 = vmul.f32 -1.442695, %v684_v13 }
 0x3ba   :  { %5293 = vtanh.f32 %v684_v13  ;;  %v4602_v15 = vmul.f32 -1.442695, %v686_v19  ;;  %v4601_v46 = vmul.f32 -1.442695, %v685_v25  ;;  %v4604_v16 = vmul.f32 -1.442695, %v688_v28 }
 0x3bb   :  { %5295 = vtanh.f32 %v686_v19  ;;  %v4603_v48 = vmul.f32 -1.442695, %v687_v30  ;;  %v4605_v49 = vmul.f32 -1.442695, %v689_v33  ;;  %v6129_v13 = vld [vmem:[%s7605_s3] ss:$0 sm:$0xff] }
 0x3bc   :  { %5297 = vtanh.f32 %v685_v25  ;;  %v444_v19 = vadd.f32 %v6129_v13, %v6091_v55 }
 0x3bd   :  { %5299 = vtanh.f32 %v688_v28 }
 0x3be   :  { %5301 = vtanh.f32 %v687_v30 }
 0x3bf   :  { %5303 = vtanh.f32 %v689_v33 }
 0x3c0   :  { %5305 = vpow2.f32 %v4598_v40 }
 0x3c1   :  { %v5290_v20 = vpop.eup %5289  ;;  %5307 = vpow2.f32 %v4599_v41 }
 0x3c2   :  { %762 = vrot.lane.b32.xlu1 %v5290_v20, %s5838_s16  ;;  %5309 = vpow2.f32 %v4600_v42 }
 0x3c3   :  { %v5292_v34 = vpop.eup %5291  ;;  %5311 = vpow2.f32 %v4602_v15  ;;  %v4596_v15 = vmul.f32 -1.442695, %v444_v19 }
 0x3c4   :  { %v5294_v36 = vpop.eup %5293  ;;  %5313 = vpow2.f32 %v4601_v46 }
 0x3c5   :  { %766 = vrot.lane.b32.xlu0 %v5294_v36, %s5838_s16  ;;  %v5296_v6 = vpop.eup %5295  ;;  %5315 = vpow2.f32 %v4604_v16 }
 0x3c6   :  { %764 = vrot.lane.b32.xlu1 %v5292_v34, %s5838_s16  ;;  %v5298_v37 = vpop.eup %5297 }
 0x3c7   :  { %v5300_v39 = vpop.eup %5299 }
 0x3c8   :  { %v5302_v12 = vpop.eup %5301 }
 0x3c9   :  { %768 = vrot.lane.b32.xlu0 %v5298_v37, %s5838_s16  ;;  %v5304_v52 = vpop.eup %5303 }
 0x3ca   :  { %770 = vrot.lane.b32.xlu1 %v5296_v6, %s5838_s16  ;;  %v5306_v45 = vpop.eup %5305 }
 0x3cb   :  { %v714_v47 = vadd.f32 1.0, %v5306_v45  ;;  %v5308_v21 = vpop.eup %5307 }
 0x3cc   :  { %v5310_v22 = vpop.eup %5309  ;;  %v715_v53 = vadd.f32 1.0, %v5308_v21 }
 0x3cd   :  { %772 = vrot.lane.b32.xlu0 %v5302_v12, %s5838_s16  ;;  %5317 = vrcp.f32 %v714_v47  ;;  %v5312_v27 = vpop.eup %5311  ;;  %v716_v54 = vadd.f32 1.0, %v5310_v22 }
 0x3ce   :  { %774 = vrot.lane.b32.xlu1 %v5300_v39, %s5838_s16  ;;  %5319 = vpow2.f32 %v4603_v48  ;;  %v5314_v57 = vpop.eup %5313  ;;  %v718_v59 = vadd.f32 1.0, %v5312_v27 }
 0x3cf   :  { %5321 = vpow2.f32 %v4605_v49  ;;  %v5316_v58 = vpop.eup %5315  ;;  %v717_v63 = vadd.f32 1.0, %v5314_v57 }
 0x3d0   :  { %5323 = vrcp.f32 %v715_v53  ;;  %v720_v8 = vadd.f32 1.0, %v5316_v58 }
 0x3d1   :  { %776 = vrot.lane.b32.xlu0 %v5304_v52, %s5838_s16  ;;  %5325 = vrcp.f32 %v716_v54 }
 0x3d2   :  { %5327 = vrcp.f32 %v718_v59 }
 0x3d3   :  { %5329 = vrcp.f32 %v717_v63 }
 0x3d4   :  { %5331 = vrcp.f32 %v720_v8 }
 0x3d7   :  { %v6122_v60 = vpop.eup %5317 }
 0x3d8   :  { %v5320_v1 = vpop.eup %5319  ;;  %v746_v45 = vmul.f32 %v6122_v60, %v5974_v31 }
 0x3d9   :  { %v719_v9 = vadd.f32 1.0, %v5320_v1  ;;  %v5322_v10 = vpop.eup %5321 }
 0x3da   :  { %v721_v14 = vadd.f32 1.0, %v5322_v10  ;;  %v6131_v18 = vpop.eup %5323 }
 0x3db   :  { %5333 = vrcp.f32 %v719_v9  ;;  %v6135_v23 = vpop.eup %5325  ;;  %v747_v49 = vmul.f32 %v6131_v18, %v5979_v35 }
 0x3dc   :  { %5335 = vrcp.f32 %v721_v14  ;;  %v6140_v28 = vpop.eup %5327  ;;  %v748_v27 = vmul.f32 %v6135_v23, %v5983_v38 }
 0x3dd   :  { %5337 = vtanh.f32 %v444_v19  ;;  %v6143_v30 = vpop.eup %5329  ;;  %v750_v31 = vmul.f32 %v6140_v28, %v5990_v44 }
 0x3de   :  { %v6148_v34 = vpop.eup %5331  ;;  %5339 = vpow2.f32 %v4596_v15  ;;  %v749_v35 = vmul.f32 %v6143_v30, %v5988_v43 }
 0x3df   :  { %v752_v38 = vmul.f32 %v6148_v34, %v5998_v51 }
 0x3e5   :  { %v6151_v6 = vpop.eup %5333 }
 0x3e6   :  { %v6157_v52 = vpop.eup %5335  ;;  %v751_v8 = vmul.f32 %v6151_v6, %v5996_v50 }
 0x3e7   :  { %v5338_v41 = vpop.eup %5337 }
 0x3e8   :  { %v5340_v47 = vpop.eup %5339 }
 0x3e9   :  { %v450_v48 = vadd.f32 1.0, %v5340_v47 }
 0x434   :  { %v763_v61 = vpop.permute.xlu1 %762 }
 0x435   :  { %v786_v2 = vmul.f32 %v6122_v60, %v763_v61 }
 0x437   :  { %802 = vrot.lane.b32.xlu1 %v786_v2, %s5839_s21  ;;  %v767_v24 = vpop.permute.xlu0 %766 }
 0x438   :  { %v765_v20 = vpop.permute.xlu1 %764  ;;  %v788_v26 = vmul.f32 %v6135_v23, %v767_v24 }
 0x439   :  { %v787_v25 = vmul.f32 %v6131_v18, %v765_v20  ;;  %v753_v20 = vmul.f32 %v6157_v52, %v6004_v56 }
 0x43a   :  { %806 = vrot.lane.b32.xlu0 %v788_v26, %s5839_s21 }
 0x43b   :  { %804 = vrot.lane.b32.xlu1 %v787_v25, %s5839_s21  ;;  %v769_v55 = vpop.permute.xlu0 %768 }
 0x43c   :  { %v771_v29 = vpop.permute.xlu1 %770  ;;  %v789_v33 = vmul.f32 %v6143_v30, %v769_v55 }
 0x43d   :  { %v790_v32 = vmul.f32 %v6140_v28, %v771_v29 }
 0x43e   :  { %808 = vrot.lane.b32.xlu0 %v789_v33, %s5839_s21 }
 0x43f   :  { %810 = vrot.lane.b32.xlu1 %v790_v32, %s5839_s21  ;;  %v773_v37 = vpop.permute.xlu0 %772 }
 0x440   :  { %v775_v36 = vpop.permute.xlu1 %774  ;;  %v791_v12 = vmul.f32 %v6151_v6, %v773_v37 }
 0x441   :  { %v792_v39 = vmul.f32 %v6148_v34, %v775_v36 }
 0x442   :  { %812 = vrot.lane.b32.xlu0 %v791_v12, %s5839_s21 }
 0x443   :  { %814 = vrot.lane.b32.xlu1 %v792_v39, %s5839_s21  ;;  %v777_v40 = vpop.permute.xlu0 %776 }
 0x444   :  { %v793_v42 = vmul.f32 %v6157_v52, %v777_v40 }
 0x446   :  { %816 = vrot.lane.b32.xlu0 %v793_v42, %s5839_s21 }
 0x447   :  { %456 = vrot.lane.b32.xlu1 %v5338_v41, %s5838_s16 }
 0x4a9   :  { %v803_v46 = vpop.permute.xlu1 %802 }
 0x4aa   :  { %v6164_v16 = vadd.f32 %v803_v46, %v746_v45 }
 0x4ac   :  { %5341 = vtanh.f32 %v6164_v16  ;;  %v807_v22 = vpop.permute.xlu0 %806 }
 0x4ad   :  { %v805_v21 = vpop.permute.xlu1 %804  ;;  %5343 = vrcp.f32 %v450_v48  ;;  %v6176_v57 = vadd.f32 %v807_v22, %v748_v27 }
 0x4ae   :  { %v6169_v53 = vadd.f32 %v805_v21, %v747_v49 }
 0x4b0   :  { %5345 = vtanh.f32 %v6169_v53  ;;  %v809_v59 = vpop.permute.xlu0 %808 }
 0x4b1   :  { %v811_v58 = vpop.permute.xlu1 %810  ;;  %v6187_v44 = vadd.f32 %v809_v59, %v749_v35 }
 0x4b2   :  { %v6178_v61 = vadd.f32 %v811_v58, %v750_v31 }
 0x4b4   :  { %5347 = vtanh.f32 %v6178_v61  ;;  %v813_v1 = vpop.permute.xlu0 %812 }
 0x4b5   :  { %5349 = vtanh.f32 %v6176_v57  ;;  %v815_v63 = vpop.permute.xlu1 %814  ;;  %v6197_v43 = vadd.f32 %v813_v1, %v751_v8 }
 0x4b6   :  { %v5342_v54 = vpop.eup %5341  ;;  %v6189_v2 = vadd.f32 %v815_v63, %v752_v38 }
 0x4b7   :  { %850 = vrot.lane.b32.xlu1 %v5342_v54, %s5838_s16  ;;  %v6194_v9 = vpop.eup %5343 }
 0x4b8   :  { %5351 = vtanh.f32 %v6189_v2  ;;  %v817_v14 = vpop.permute.xlu0 %816  ;;  %v454_v36 = vmul.f32 0.0, %v6194_v9 }
 0x4b9   :  { %5353 = vtanh.f32 %v6187_v44  ;;  %v457_v51 = vpop.permute.xlu1 %456  ;;  %v6205_v50 = vadd.f32 %v817_v14, %v753_v20 }
 0x4ba   :  { %v5346_v10 = vpop.eup %5345  ;;  %v459_v19 = vmul.f32 %v6194_v9, %v457_v51  ;;  %5355 = vtanh.f32 %v6197_v43 }
 0x4bb   :  { %852 = vrot.lane.b32.xlu1 %v5346_v10, %s5838_s16  ;;  %5357 = vtanh.f32 %v6205_v50 }
 0x4bc   :  { %461 = vrot.lane.b32.xlu0 %v459_v19, %s5839_s21  ;;  %v1122_v19 = vld [vmem:[%s7603_s0 + $0x2] sm:$0x1] }
 0x4be   :  { %v5348_v24 = vpop.eup %5347 }
 0x4bf   :  { %v5350_v25 = vpop.eup %5349  ;;  %858 = vrot.lane.b32.xlu1 %v5348_v24, %s5838_s16 }
 0x4c0   :  { %854 = vrot.lane.b32.xlu0 %v5350_v25, %s5838_s16 }
 0x4c2   :  { %v5352_v26 = vpop.eup %5351 }
 0x4c3   :  { %v5354_v29 = vpop.eup %5353  ;;  %862 = vrot.lane.b32.xlu1 %v5352_v26, %s5838_s16 }
 0x4c4   :  { %856 = vrot.lane.b32.xlu0 %v5354_v29, %s5838_s16  ;;  %v5356_v56 = vpop.eup %5355  ;;  %v1123_v29 = vld [vmem:[%s7603_s0 + $0xa] sm:$0x1] }
 0x4c5   :  { %v5358_v55 = vpop.eup %5357 }
 0x4c8   :  { %860 = vrot.lane.b32.xlu0 %v5356_v56, %s5838_s16 }
 0x4cc   :  { %864 = vrot.lane.b32.xlu0 %v5358_v55, %s5838_s16  ;;  %v1124_v55 = vld [vmem:[%s7603_s0 + $0x12] sm:$0x1] }
 0x529   :  { %v851_v32 = vpop.permute.xlu1 %850 }
 0x52a   :  { %v874_v47 = vmul.f32 %v6122_v60, %v851_v32 }
 0x52d   :  { %v853_v33 = vpop.permute.xlu1 %852 }
 0x52e   :  { %v462_v37 = vpop.permute.xlu0 %461  ;;  %v875_v12 = vmul.f32 %v6131_v18, %v853_v33 }
 0x52f   :  { %v6215_v39 = vadd.f32 %v462_v37, %v454_v36  ;;  %v1126_v36 = vld [vmem:[%s7603_s0 + $0x22] sm:$0x1] }
 0x530   :  { %v890_v15 = vrot.slane %v875_v12, 7 }
 0x531   :  { %5359 = vtanh.f32 %v6215_v39  ;;  %v859_v41 = vpop.permute.xlu1 %858 }
 0x532   :  { %v855_v40 = vpop.permute.xlu0 %854  ;;  %v878_v49 = vmul.f32 %v6140_v28, %v859_v41  ;;  %v891_v21 = vsel %vm343_vm1, %v890_v15, %v874_v47 }
 0x533   :  { %v876_v42 = vmul.f32 %v6135_v23, %v855_v40  ;;  %v1125_v40 = vld [vmem:[%s7603_s0 + $0x1a] sm:$0x1] }
 0x534   :  { %v896_v59 = vrot.slane %v878_v49, 4 }
 0x535   :  { %v892_v45 = vrot.slane %v876_v42, 6  ;;  %v863_v22 = vpop.permute.xlu1 %862 }
 0x536   :  { %v857_v46 = vpop.permute.xlu0 %856  ;;  %v880_v35 = vmul.f32 %v6148_v34, %v863_v22 }
 0x537   :  { %v877_v48 = vmul.f32 %v6143_v30, %v857_v46  ;;  %v893_v18 = vsel %vm346_vm2, %v892_v45, %v891_v21  ;;  %v1128_v45 = vld [vmem:[%s7603_s0 + $0x32] sm:$0x1] }
 0x538   :  { %v900_v1 = vrot.slane %v880_v35, 2 }
 0x539   :  { %v894_v27 = vrot.slane %v877_v48, 5  ;;  %v1127_v48 = vld [vmem:[%s7603_s0 + $0x2a] sm:$0x1] }
 0x53a   :  { %v861_v31 = vpop.permute.xlu0 %860 }
 0x53b   :  { %v5360_v54 = vpop.eup %5359  ;;  %v895_v58 = vsel %vm349_vm3, %v894_v27, %v893_v18  ;;  %v879_v23 = vmul.f32 %v6151_v6, %v861_v31  ;;  %v1129_v27 = vld [vmem:[%s7603_s0 + $0x3a] sm:$0x1] }
 0x53c   :  { %467 = vrot.lane.b32.xlu1 %v5360_v54, %s5838_s16  ;;  %v897_v28 = vsel %vm352_vm4, %v896_v59, %v895_v58 }
 0x53d   :  { %v898_v60 = vrot.slane %v879_v23, 3 }
 0x53e   :  { %v865_v30 = vpop.permute.xlu0 %864 }
 0x53f   :  { %v881_v38 = vmul.f32 %v6157_v52, %v865_v30  ;;  %v899_v63 = vsel %vm355_vm5, %v898_v60, %v897_v28 }
 0x540   :  { %v901_v51 = vsel %vm358_vm6, %v900_v1, %v899_v63 }
 0x541   :  { %v902_v8 = vrot.slane %v881_v38, 1 }
 0x543   :  { %v903_v10 = vsel %vm361_vm7, %v902_v8, %v901_v51 }
 0x544   :  { %904 = vrot.lane.b32.xlu0 %v903_v10, %s5839_s21 }
 0x5ae   :  { %v468_v6 = vpop.permute.xlu1 %467 }
 0x5af   :  { %v6236_v34 = vmul.f32 %v6194_v9, %v468_v6 }
 0x5b1   :  { %907 = vrot.lane.b32.xlu1 %v6236_v34, %s5838_s16 }
 0x5b6   :  { %v905_v14 = vpop.permute.xlu0 %904 }
 0x5b7   :  { %4876 = vmatmul.mubr.msk.f32.vlgmr.msra.gmra.mrb[2].mxu1 %vm44_vm8, %v905_v14 }
 0x5b8   :  { %5111 = vmatpush3.bf16.msra.mxu1 %v6019_v62  ;;  %4894 = vmatprep.mubr.msk.f32.mxu1 %vm5836_vm0, %v5837_v4 }
 0x5b9   :  { %5112 = vmatprep.subr.bf16.mxu1 %v5835_v0 }
 0x5bc   :  { %5114 = vmatpush3.bf16.msra.mxu1 %v6026_v3 }
 0x5bd   :  { %5115 = vmatprep.subr.bf16.mxu1 %v5835_v0 }
 0x5c0   :  { %5117 = vmatpush3.bf16.msra.mxu1 %v6038_v11 }
 0x5c1   :  { %5118 = vmatprep.subr.bf16.mxu1 %v5835_v0 }
 0x5c4   :  { %5120 = vmatpush3.bf16.msra.mxu1 %v6048_v17 }
 0x5c5   :  { %5139 = vmatprep.subr.bf16.mxu1 %v5835_v0 }
 0x623   :  { %v908_v52 = vpop.permute.xlu1 %907 }
 0x624   :  { %v910_v9 = vsel %vm44_vm8, %v905_v14, %v908_v52 }
 0x625   :  { %4865 = vmatmul.mubr.msk.f32.vlgmr.msra.gmra.mrb[4].mxu0 %vm373_vm9, %v910_v9 }
 0x626   :  { %5123 = vmatpush3.bf16.msra.mxu0 %v5888_v5  ;;  %4905 = vmatprep.mubr.msk.f32.mxu0 %vm5836_vm0, %v5837_v4 }
 0x627   :  { %5124 = vmatprep.subr.bf16.mxu0 %v5835_v0 }
 0x62a   :  { %5126 = vmatpush3.bf16.msra.mxu0 %v5897_v7 }
 0x62b   :  { %5127 = vmatprep.subr.bf16.mxu0 %v5835_v0 }
 0x68a   :  { %v1198_v20 = vpop.f32.mrb[2].mxu1 }
 0x68b   :  { %v4877_v24 = vpop.f32.mrb[3].mxu1  ;;  %v1218_v25 = vadd.f32 %v1198_v20, %v1122_v19  ;;  %v1203_v26 = vrot.slane %v1198_v20, 1  ;;  %v1204_v56 = vrot.slane %v1198_v20, 2  ;;  %v1206_v32 = vrot.slane %v1198_v20, 4 }
 0x68c   :  { %v1205_v37 = vrot.slane %v1198_v20, 3  ;;  %v1208_v41 = vrot.slane %v1198_v20, 6  ;;  %v1207_v46 = vrot.slane %v1198_v20, 5  ;;  %v1209_v21 = vrot.slane %v1198_v20, 7 }
 0x68d   :  { %5361 = vtanh.f32 %v1218_v25  ;;  %v1219_v33 = vadd.f32 %v1203_v26, %v1123_v29  ;;  %v1220_v12 = vadd.f32 %v1204_v56, %v1124_v55  ;;  %v1222_v42 = vadd.f32 %v1206_v32, %v1126_v36 }
 0x68e   :  { %v1221_v47 = vadd.f32 %v1205_v37, %v1125_v40  ;;  %v1224_v49 = vadd.f32 %v1208_v41, %v1128_v45  ;;  %v1223_v22 = vadd.f32 %v1207_v46, %v1127_v48  ;;  %v1225_v18 = vadd.f32 %v1209_v21, %v1129_v27 }
 0x68f   :  { %5363 = vtanh.f32 %v1219_v33  ;;  %v4609_v30 = vmul.f32 -1.442695, %v1218_v25  ;;  %v4610_v28 = vmul.f32 -1.442695, %v1219_v33  ;;  %v4611_v38 = vmul.f32 -1.442695, %v1220_v12 }
 0x690   :  { %5365 = vtanh.f32 %v1220_v12  ;;  %v4613_v51 = vmul.f32 -1.442695, %v1222_v42  ;;  %v4612_v6 = vmul.f32 -1.442695, %v1221_v47  ;;  %v4615_v14 = vmul.f32 -1.442695, %v1224_v49 }
 0x691   :  { %5367 = vtanh.f32 %v1222_v42  ;;  %v4614_v9 = vmul.f32 -1.442695, %v1223_v22  ;;  %v4616_v20 = vmul.f32 -1.442695, %v1225_v18 }
 0x692   :  { %5369 = vtanh.f32 %v1221_v47 }
 0x693   :  { %5371 = vtanh.f32 %v1224_v49 }
 0x694   :  { %5373 = vtanh.f32 %v1223_v22 }
 0x695   :  { %5375 = vtanh.f32 %v1225_v18 }
 0x696   :  { %5377 = vpow2.f32 %v4609_v30 }
 0x697   :  { %v5362_v15 = vpop.eup %5361  ;;  %5379 = vpow2.f32 %v4610_v28 }
 0x698   :  { %1298 = vrot.lane.b32.xlu0 %v5362_v15, %s5838_s16  ;;  %5381 = vpow2.f32 %v4611_v38 }
 0x699   :  { %v5364_v31 = vpop.eup %5363 }
 0x69a   :  { %v5366_v54 = vpop.eup %5365 }
 0x69b   :  { %1302 = vrot.lane.b32.xlu1 %v5366_v54, %s5838_s16  ;;  %v5368_v58 = vpop.eup %5367 }
 0x69c   :  { %1300 = vrot.lane.b32.xlu0 %v5364_v31, %s5838_s16  ;;  %v5370_v23 = vpop.eup %5369 }
 0x69d   :  { %v5372_v59 = vpop.eup %5371 }
 0x69e   :  { %v5374_v35 = vpop.eup %5373 }
 0x69f   :  { %1304 = vrot.lane.b32.xlu1 %v5370_v23, %s5838_s16  ;;  %v5376_v60 = vpop.eup %5375 }
 0x6a0   :  { %1306 = vrot.lane.b32.xlu0 %v5368_v58, %s5838_s16  ;;  %v5378_v10 = vpop.eup %5377 }
 0x6a1   :  { %v1250_v52 = vadd.f32 1.0, %v5378_v10  ;;  %v5380_v19 = vpop.eup %5379 }
 0x6a2   :  { %v5382_v24 = vpop.eup %5381  ;;  %v1251_v26 = vadd.f32 1.0, %v5380_v19 }
 0x6a3   :  { %1308 = vrot.lane.b32.xlu1 %v5374_v35, %s5838_s16  ;;  %v1252_v56 = vadd.f32 1.0, %v5382_v24 }
 0x6a4   :  { %1310 = vrot.lane.b32.xlu0 %v5372_v59, %s5838_s16 }
 0x6a7   :  { %1312 = vrot.lane.b32.xlu1 %v5376_v60, %s5838_s16 }
 0x6f8   :  { %v980_v63 = vpop.f32.mrb[4].mxu0 }
 0x6f9   :  { %v6292_v1 = vadd.f32 %v6129_v13, %v980_v63  ;;  %v4866_v8 = vpop.f32.mrb[5].mxu0 }
 0x6fb   :  { %5383 = vtanh.f32 %v6292_v1 }
 0x6fc   :  { %5385 = vpow2.f32 %v4613_v51 }
 0x6fd   :  { %5387 = vpow2.f32 %v4612_v6  ;;  %v4607_v6 = vmul.f32 -1.442695, %v6292_v1 }
 0x6fe   :  { %5389 = vpow2.f32 %v4615_v14 }
 0x6ff   :  { %5391 = vrcp.f32 %v1250_v52 }
 0x700   :  { %5393 = vpow2.f32 %v4614_v9 }
 0x701   :  { %5395 = vpow2.f32 %v4616_v20 }
 0x702   :  { %5397 = vrcp.f32 %v1251_v26 }
 0x703   :  { %5399 = vrcp.f32 %v1252_v56 }
 0x705   :  { %v5384_v25 = vpop.eup %5383 }
 0x706   :  { %993 = vrot.lane.b32.xlu0 %v5384_v25, %s5838_s16  ;;  %v5386_v29 = vpop.eup %5385 }
 0x707   :  { %v5388_v55 = vpop.eup %5387  ;;  %v1254_v33 = vadd.f32 1.0, %v5386_v29 }
 0x708   :  { %v5390_v32 = vpop.eup %5389  ;;  %v1253_v12 = vadd.f32 1.0, %v5388_v55 }
 0x709   :  { %v6296_v36 = vpop.eup %5391  ;;  %5401 = vrcp.f32 %v1254_v33  ;;  %v1256_v42 = vadd.f32 1.0, %v5390_v32 }
 0x70a   :  { %v1299_v37 = vpop.permute.xlu0 %1298  ;;  %v5394_v40 = vpop.eup %5393  ;;  %5403 = vrcp.f32 %v1253_v12  ;;  %v1282_v24 = vmul.f32 %v6296_v36, %v6164_v16 }
 0x70b   :  { %v1322_v41 = vmul.f32 %v6296_v36, %v1299_v37  ;;  %v1255_v15 = vadd.f32 1.0, %v5394_v40  ;;  %v5396_v45 = vpop.eup %5395  ;;  %5405 = vrcp.f32 %v1256_v42 }
 0x70c   :  { %v1257_v46 = vadd.f32 1.0, %v5396_v45  ;;  %v6300_v47 = vpop.eup %5397 }
 0x70d   :  { %1338 = vrot.lane.b32.xlu1 %v1322_v41, %s5839_s21  ;;  %5407 = vrcp.f32 %v1255_v15  ;;  %v6302_v49 = vpop.eup %5399  ;;  %v1303_v21 = vpop.permute.xlu1 %1302  ;;  %v1283_v1 = vmul.f32 %v6300_v47, %v6169_v53 }
 0x70e   :  { %v1301_v48 = vpop.permute.xlu0 %1300  ;;  %v1324_v27 = vmul.f32 %v6302_v49, %v1303_v21  ;;  %5409 = vrcp.f32 %v1257_v46  ;;  %v1284_v29 = vmul.f32 %v6302_v49, %v6176_v57 }
 0x70f   :  { %v1323_v22 = vmul.f32 %v6300_v47, %v1301_v48  ;;  %5411 = vpow2.f32 %v4607_v6 }
 0x710   :  { %1342 = vrot.lane.b32.xlu0 %v1324_v27, %s5839_s21 }
 0x711   :  { %1340 = vrot.lane.b32.xlu1 %v1323_v22, %s5839_s21  ;;  %v1305_v58 = vpop.permute.xlu1 %1304 }
 0x712   :  { %v1307_v31 = vpop.permute.xlu0 %1306 }
 0x713   :  { %v6307_v18 = vpop.eup %5401 }
 0x714   :  { %v6310_v54 = vpop.eup %5403  ;;  %v1326_v23 = vmul.f32 %v6307_v18, %v1307_v31  ;;  %v1286_v16 = vmul.f32 %v6307_v18, %v6178_v61 }
 0x715   :  { %v1325_v59 = vmul.f32 %v6310_v54, %v1305_v58  ;;  %v6315_v35 = vpop.eup %5405  ;;  %v1309_v28 = vpop.permute.xlu1 %1308  ;;  %v1285_v53 = vmul.f32 %v6310_v54, %v6187_v44 }
 0x716   :  { %1346 = vrot.lane.b32.xlu1 %v1326_v23, %s5839_s21  ;;  %v1311_v60 = vpop.permute.xlu0 %1310  ;;  %v1288_v42 = vmul.f32 %v6315_v35, %v6189_v2 }
 0x717   :  { %1344 = vrot.lane.b32.xlu0 %v1325_v59, %s5839_s21  ;;  %v6318_v30 = vpop.eup %5407  ;;  %v1328_v38 = vmul.f32 %v6315_v35, %v1311_v60 }
 0x718   :  { %v1327_v63 = vmul.f32 %v6318_v30, %v1309_v28  ;;  %v6324_v8 = vpop.eup %5409  ;;  %v1287_v61 = vmul.f32 %v6318_v30, %v6197_v43 }
 0x719   :  { %v1313_v51 = vpop.permute.xlu1 %1312  ;;  %v5412_v14 = vpop.eup %5411  ;;  %v1289_v48 = vmul.f32 %v6324_v8, %v6205_v50 }
 0x71a   :  { %1350 = vrot.lane.b32.xlu1 %v1328_v38, %s5839_s21  ;;  %v1329_v10 = vmul.f32 %v6324_v8, %v1313_v51  ;;  %v987_v52 = vadd.f32 1.0, %v5412_v14 }
 0x71b   :  { %1348 = vrot.lane.b32.xlu0 %v1327_v63, %s5839_s21 }
 0x71c   :  { %5413 = vrcp.f32 %v987_v52 }
 0x71f   :  { %1352 = vrot.lane.b32.xlu0 %v1329_v10, %s5839_s21 }
 0x726   :  { %v6329_v9 = vpop.eup %5413 }
 0x727   :  { %v991_v59 = vmul.f32 %v6329_v9, %v6215_v39 }
 0x778   :  { %v994_v19 = vpop.permute.xlu0 %993 }
 0x779   :  { %v996_v20 = vmul.f32 %v6329_v9, %v994_v19 }
 0x77b   :  { %998 = vrot.lane.b32.xlu1 %v996_v20, %s5839_s21 }
 0x77f   :  { %v1339_v25 = vpop.permute.xlu1 %1338 }
 0x780   :  { %v6335_v26 = vadd.f32 %v1339_v25, %v1282_v24 }
 0x782   :  { %5415 = vtanh.f32 %v6335_v26  ;;  %v1343_v55 = vpop.permute.xlu0 %1342 }
 0x783   :  { %v1341_v56 = vpop.permute.xlu1 %1340  ;;  %v6344_v33 = vadd.f32 %v1343_v55, %v1284_v29 }
 0x784   :  { %v6342_v32 = vadd.f32 %v1341_v56, %v1283_v1 }
 0x786   :  { %5417 = vtanh.f32 %v6342_v32 }
 0x787   :  { %5419 = vtanh.f32 %v6344_v33 }
 0x788   :  { %v1347_v12 = vpop.permute.xlu1 %1346 }
 0x789   :  { %v1345_v40 = vpop.permute.xlu0 %1344  ;;  %v6352_v57 = vadd.f32 %v1347_v12, %v1286_v16 }
 0x78a   :  { %v6355_v41 = vadd.f32 %v1345_v40, %v1285_v53 }
 0x78b   :  { %5421 = vtanh.f32 %v6352_v57 }
 0x78c   :  { %v5416_v37 = vpop.eup %5415  ;;  %5423 = vtanh.f32 %v6355_v41  ;;  %v1351_v15 = vpop.permute.xlu1 %1350 }
 0x78d   :  { %1386 = vrot.lane.b32.xlu0 %v5416_v37, %s5838_s16  ;;  %v1349_v44 = vpop.permute.xlu0 %1348  ;;  %v6363_v45 = vadd.f32 %v1351_v15, %v1288_v42 }
 0x78e   :  { %v6365_v46 = vadd.f32 %v1349_v44, %v1287_v61 }
 0x78f   :  { %5425 = vtanh.f32 %v6363_v45 }
 0x790   :  { %5427 = vtanh.f32 %v6365_v46  ;;  %v5418_v21 = vpop.eup %5417 }
 0x791   :  { %v1353_v2 = vpop.permute.xlu0 %1352  ;;  %v5420_v22 = vpop.eup %5419  ;;  %1388 = vrot.lane.b32.xlu0 %v5418_v21, %s5838_s16 }
 0x792   :  { %v6371_v27 = vadd.f32 %v1353_v2, %v1289_v48  ;;  %1390 = vrot.lane.b32.xlu1 %v5420_v22, %s5838_s16  ;;  %v1658_v2 = vld [vmem:[%s7603_s0 + $0x3] sm:$0x1] }
 0x794   :  { %5429 = vtanh.f32 %v6371_v27 }
 0x795   :  { %v5422_v43 = vpop.eup %5421 }
 0x796   :  { %v5424_v31 = vpop.eup %5423  ;;  %1394 = vrot.lane.b32.xlu0 %v5422_v43, %s5838_s16 }
 0x797   :  { %1392 = vrot.lane.b32.xlu1 %v5424_v31, %s5838_s16 }
 0x799   :  { %v5426_v58 = vpop.eup %5425 }
 0x79a   :  { %v5428_v23 = vpop.eup %5427  ;;  %1398 = vrot.lane.b32.xlu0 %v5426_v58, %s5838_s16 }
 0x79b   :  { %1396 = vrot.lane.b32.xlu1 %v5428_v23, %s5838_s16  ;;  %v1659_v23 = vld [vmem:[%s7603_s0 + $0xb] sm:$0x1] }
 0x79e   :  { %v5430_v50 = vpop.eup %5429 }
 0x79f   :  { %1400 = vrot.lane.b32.xlu1 %v5430_v50, %s5838_s16 }
 0x7ed   :  { %v999_v60 = vpop.permute.xlu1 %998 }
 0x7ee   :  { %v6383_v28 = vadd.f32 %v999_v60, %v991_v59  ;;  %v1660_v59 = vld [vmem:[%s7603_s0 + $0x13] sm:$0x1] }
 0x7f0   :  { %5431 = vtanh.f32 %v6383_v28 }
 0x7fa   :  { %v5432_v38 = vpop.eup %5431 }
 0x7fb   :  { %1004 = vrot.lane.b32.xlu0 %v5432_v38, %s5838_s16 }
 0x7ff   :  { %v1387_v63 = vpop.permute.xlu0 %1386 }
 0x800   :  { %v1410_v52 = vmul.f32 %v6296_v36, %v1387_v63  ;;  %v1662_v63 = vld [vmem:[%s7603_s0 + $0x23] sm:$0x1] }
 0x803   :  { %v1389_v51 = vpop.permute.xlu0 %1388 }
 0x804   :  { %v1391_v10 = vpop.permute.xlu1 %1390  ;;  %v1411_v6 = vmul.f32 %v6300_v47, %v1389_v51 }
 0x805   :  { %v1412_v14 = vmul.f32 %v6302_v49, %v1391_v10 }
 0x806   :  { %v1426_v19 = vrot.slane %v1411_v6, 7  ;;  %v1661_v6 = vld [vmem:[%s7603_s0 + $0x1b] sm:$0x1] }
 0x807   :  { %v1428_v39 = vrot.slane %v1412_v14, 6 }
 0x808   :  { %v1395_v20 = vpop.permute.xlu0 %1394  ;;  %v1427_v24 = vsel %vm343_vm1, %v1426_v19, %v1410_v52 }
 0x809   :  { %v1393_v25 = vpop.permute.xlu1 %1392  ;;  %v1414_v1 = vmul.f32 %v6307_v18, %v1395_v20  ;;  %v1429_v56 = vsel %vm346_vm2, %v1428_v39, %v1427_v24  ;;  %v1664_v20 = vld [vmem:[%s7603_s0 + $0x33] sm:$0x1] }
 0x80a   :  { %v1413_v29 = vmul.f32 %v6310_v54, %v1393_v25  ;;  %v1663_v25 = vld [vmem:[%s7603_s0 + $0x2b] sm:$0x1] }
 0x80b   :  { %v1432_v55 = vrot.slane %v1414_v1, 4 }
 0x80c   :  { %v1430_v16 = vrot.slane %v1413_v29, 5  ;;  %v1399_v37 = vpop.permute.xlu0 %1398 }
 0x80d   :  { %v1397_v47 = vpop.permute.xlu1 %1396  ;;  %v1416_v49 = vmul.f32 %v6315_v35, %v1399_v37 }
 0x80e   :  { %v1431_v36 = vsel %vm349_vm3, %v1430_v16, %v1429_v56  ;;  %v1415_v53 = vmul.f32 %v6318_v30, %v1397_v47 }
 0x80f   :  { %v1433_v12 = vsel %vm352_vm4, %v1432_v55, %v1431_v36  ;;  %v1436_v40 = vrot.slane %v1416_v49, 2  ;;  %v1665_v55 = vld [vmem:[%s7603_s0 + $0x3b] sm:$0x1] }
 0x810   :  { %v1434_v42 = vrot.slane %v1415_v53, 3 }
 0x811   :  { %v1401_v61 = vpop.permute.xlu1 %1400 }
 0x812   :  { %v1417_v18 = vmul.f32 %v6324_v8, %v1401_v61  ;;  %v1435_v54 = vsel %vm355_vm5, %v1434_v42, %v1433_v12 }
 0x813   :  { %v1437_v15 = vsel %vm358_vm6, %v1436_v40, %v1435_v54 }
 0x814   :  { %v1438_v44 = vrot.slane %v1417_v18, 1 }
 0x816   :  { %v1439_v48 = vsel %vm361_vm7, %v1438_v44, %v1437_v15 }
 0x817   :  { %1440 = vrot.lane.b32.xlu1 %v1439_v48, %s5839_s21 }
 0x86d   :  { %v1005_v35 = vpop.permute.xlu0 %1004 }
 0x86e   :  { %v6404_v21 = vmul.f32 %v6329_v9, %v1005_v35 }
 0x870   :  { %1443 = vrot.lane.b32.xlu0 %v6404_v21, %s5838_s16 }
 0x889   :  { %v1441_v30 = vpop.permute.xlu1 %1440 }
 0x88a   :  { %4906 = vmatmul.mubr.msk.f32.vlgmr.msra.gmra.mrb[6].mxu0 %vm44_vm8, %v1441_v30 }
 0x88b   :  { %5129 = vmatpush3.bf16.msra.mxu0 %v6019_v62  ;;  %4924 = vmatprep.mubr.msk.f32.mxu0 %vm5836_vm0, %v5837_v4 }
 0x88c   :  { %5130 = vmatprep.subr.bf16.mxu0 %v5835_v0 }
 0x88f   :  { %5132 = vmatpush3.bf16.msra.mxu0 %v6026_v3 }
 0x890   :  { %5133 = vmatprep.subr.bf16.mxu0 %v5835_v0 }
 0x893   :  { %5135 = vmatpush3.bf16.msra.mxu0 %v6038_v11 }
 0x894   :  { %5136 = vmatprep.subr.bf16.mxu0 %v5835_v0 }
 0x897   :  { %5138 = vmatpush3.bf16.msra.mxu0 %v6048_v17 }
 0x898   :  { %5157 = vmatprep.subr.bf16.mxu0 %v5835_v0 }
 0x8e2   :  { %v1444_v8 = vpop.permute.xlu0 %1443 }
 0x8e3   :  { %v1446_v9 = vsel %vm44_vm8, %v1441_v30, %v1444_v8 }
 0x8e4   :  { %4895 = vmatmul.mubr.msk.f32.vlgmr.msra.gmra.mrb[4].mxu1 %vm373_vm9, %v1446_v9 }
 0x8e5   :  { %5141 = vmatpush3.bf16.msra.mxu1 %v5888_v5  ;;  %4935 = vmatprep.mubr.msk.f32.mxu1 %vm5836_vm0, %v5837_v4 }
 0x8e6   :  { %5142 = vmatprep.subr.bf16.mxu1 %v5835_v0 }
 0x8e9   :  { %5144 = vmatpush3.bf16.msra.mxu1 %v5897_v7 }
 0x8ea   :  { %5145 = vmatprep.subr.bf16.mxu1 %v5835_v0 }
 0x95d   :  { %v1734_v22 = vpop.f32.mrb[6].mxu0 }
 0x95e   :  { %v4907_v43 = vpop.f32.mrb[7].mxu0  ;;  %v1754_v31 = vadd.f32 %v1734_v22, %v1658_v2  ;;  %v1739_v58 = vrot.slane %v1734_v22, 1  ;;  %v1740_v50 = vrot.slane %v1734_v22, 2  ;;  %v1742_v60 = vrot.slane %v1734_v22, 4 }
 0x95f   :  { %v1741_v51 = vrot.slane %v1734_v22, 3  ;;  %v1744_v14 = vrot.slane %v1734_v22, 6  ;;  %v1743_v39 = vrot.slane %v1734_v22, 5  ;;  %v1745_v29 = vrot.slane %v1734_v22, 7 }
 0x960   :  { %5433 = vtanh.f32 %v1754_v31  ;;  %v1755_v38 = vadd.f32 %v1739_v58, %v1659_v23  ;;  %v1756_v10 = vadd.f32 %v1740_v50, %v1660_v59  ;;  %v1758_v52 = vadd.f32 %v1742_v60, %v1662_v63 }
 0x961   :  { %v1757_v24 = vadd.f32 %v1741_v51, %v1661_v6  ;;  %v1760_v1 = vadd.f32 %v1744_v14, %v1664_v20  ;;  %v1759_v56 = vadd.f32 %v1743_v39, %v1663_v25  ;;  %v1761_v16 = vadd.f32 %v1745_v29, %v1665_v55 }
 0x962   :  { %5435 = vtanh.f32 %v1755_v38  ;;  %v4620_v15 = vmul.f32 -1.442695, %v1754_v31  ;;  %v4621_v44 = vmul.f32 -1.442695, %v1755_v38  ;;  %v4622_v48 = vmul.f32 -1.442695, %v1756_v10 }
 0x963   :  { %5437 = vtanh.f32 %v1756_v10  ;;  %v4624_v35 = vmul.f32 -1.442695, %v1758_v52  ;;  %v4623_v8 = vmul.f32 -1.442695, %v1757_v24  ;;  %v4626_v9 = vmul.f32 -1.442695, %v1760_v1 }
 0x964   :  { %5439 = vtanh.f32 %v1758_v52  ;;  %v4627_v22 = vmul.f32 -1.442695, %v1761_v16 }
 0x965   :  { %5441 = vtanh.f32 %v1757_v24 }
 0x966   :  { %5443 = vtanh.f32 %v1760_v1 }
 0x967   :  { %5445 = vtanh.f32 %v1759_v56 }
 0x968   :  { %5447 = vtanh.f32 %v1761_v16 }
 0x96a   :  { %v5434_v19 = vpop.eup %5433 }
 0x96b   :  { %1834 = vrot.lane.b32.xlu1 %v5434_v19, %s5838_s16 }
 0x96c   :  { %v5436_v37 = vpop.eup %5435 }
 0x96d   :  { %v5438_v47 = vpop.eup %5437 }
 0x96e   :  { %1838 = vrot.lane.b32.xlu0 %v5438_v47, %s5838_s16  ;;  %v5440_v49 = vpop.eup %5439 }
 0x96f   :  { %1836 = vrot.lane.b32.xlu1 %v5436_v37, %s5838_s16  ;;  %v5442_v36 = vpop.eup %5441 }
 0x970   :  { %v5444_v53 = vpop.eup %5443 }
 0x971   :  { %v5446_v12 = vpop.eup %5445 }
 0x972   :  { %1840 = vrot.lane.b32.xlu0 %v5442_v36, %s5838_s16  ;;  %v5448_v40 = vpop.eup %5447 }
 0x973   :  { %1842 = vrot.lane.b32.xlu1 %v5440_v49, %s5838_s16 }
 0x976   :  { %1844 = vrot.lane.b32.xlu0 %v5446_v12, %s5838_s16 }
 0x977   :  { %1846 = vrot.lane.b32.xlu1 %v5444_v53, %s5838_s16 }
 0x97a   :  { %1848 = vrot.lane.b32.xlu0 %v5448_v40, %s5838_s16 }
 0x9b7   :  { %v1516_v42 = vpop.f32.mrb[4].mxu1 }
 0x9b8   :  { %v6460_v61 = vadd.f32 %v6129_v13, %v1516_v42  ;;  %v4896_v18 = vpop.f32.mrb[5].mxu1  ;;  %v4625_v13 = vmul.f32 -1.442695, %v1759_v56 }
 0x9ba   :  { %5449 = vtanh.f32 %v6460_v61 }
 0x9bb   :  { %5451 = vpow2.f32 %v4620_v15 }
 0x9bc   :  { %5453 = vpow2.f32 %v4621_v44 }
 0x9bd   :  { %5455 = vpow2.f32 %v4622_v48 }
 0x9be   :  { %5457 = vpow2.f32 %v4624_v35 }
 0x9bf   :  { %5459 = vpow2.f32 %v4623_v8 }
 0x9c0   :  { %5461 = vpow2.f32 %v4626_v9 }
 0x9c4   :  { %v5450_v54 = vpop.eup %5449 }
 0x9c5   :  { %1529 = vrot.lane.b32.xlu1 %v5450_v54, %s5838_s16  ;;  %v5452_v30 = vpop.eup %5451 }
 0x9c6   :  { %v1786_v2 = vadd.f32 1.0, %v5452_v30  ;;  %v5454_v43 = vpop.eup %5453  ;;  %v4618_v30 = vmul.f32 -1.442695, %v6460_v61 }
 0x9c7   :  { %v5456_v58 = vpop.eup %5455  ;;  %v1787_v31 = vadd.f32 1.0, %v5454_v43 }
 0x9c8   :  { %5463 = vrcp.f32 %v1786_v2  ;;  %v5458_v23 = vpop.eup %5457  ;;  %v1788_v50 = vadd.f32 1.0, %v5456_v58 }
 0x9c9   :  { %5465 = vpow2.f32 %v4625_v13  ;;  %v5460_v59 = vpop.eup %5459  ;;  %v1790_v38 = vadd.f32 1.0, %v5458_v23 }
 0x9ca   :  { %5467 = vpow2.f32 %v4627_v22  ;;  %v5462_v60 = vpop.eup %5461  ;;  %v1789_v10 = vadd.f32 1.0, %v5460_v59 }
 0x9cb   :  { %5469 = vrcp.f32 %v1787_v31  ;;  %v1792_v52 = vadd.f32 1.0, %v5462_v60 }
 0x9cc   :  { %5471 = vrcp.f32 %v1788_v50 }
 0x9cd   :  { %5473 = vrcp.f32 %v1790_v38 }
 0x9ce   :  { %5475 = vrcp.f32 %v1789_v10 }
 0x9cf   :  { %5477 = vrcp.f32 %v1792_v52 }
 0x9d2   :  { %v6464_v63 = vpop.eup %5463 }
 0x9d3   :  { %v5466_v6 = vpop.eup %5465  ;;  %v1818_v43 = vmul.f32 %v6464_v63, %v6335_v26 }
 0x9d4   :  { %v1791_v19 = vadd.f32 1.0, %v5466_v6  ;;  %v5468_v20 = vpop.eup %5467 }
 0x9d5   :  { %v1793_v39 = vadd.f32 1.0, %v5468_v20  ;;  %v6468_v24 = vpop.eup %5469 }
 0x9d6   :  { %5479 = vrcp.f32 %v1791_v19  ;;  %v6470_v1 = vpop.eup %5471  ;;  %v1819_v61 = vmul.f32 %v6468_v24, %v6342_v32 }
 0x9d7   :  { %5481 = vrcp.f32 %v1793_v39  ;;  %v6475_v16 = vpop.eup %5473  ;;  %v1820_v23 = vmul.f32 %v6470_v1, %v6344_v33 }
 0x9d8   :  { %v6478_v47 = vpop.eup %5475  ;;  %5483 = vpow2.f32 %v4618_v30  ;;  %v1822_v26 = vmul.f32 %v6475_v16, %v6352_v57 }
 0x9d9   :  { %v6483_v12 = vpop.eup %5477  ;;  %v1821_v32 = vmul.f32 %v6478_v47, %v6355_v41 }
 0x9da   :  { %v1824_v52 = vmul.f32 %v6483_v12, %v6363_v45 }
 0x9dd   :  { %v1835_v51 = vpop.permute.xlu1 %1834 }
 0x9de   :  { %v1858_v14 = vmul.f32 %v6464_v63, %v1835_v51 }
 0x9e0   :  { %1874 = vrot.lane.b32.xlu0 %v1858_v14, %s5839_s21  ;;  %v1839_v29 = vpop.permute.xlu0 %1838  ;;  %v6486_v42 = vpop.eup %5479 }
 0x9e1   :  { %v1837_v25 = vpop.permute.xlu1 %1836  ;;  %v1860_v55 = vmul.f32 %v6470_v1, %v1839_v29  ;;  %v6492_v44 = vpop.eup %5481  ;;  %v1823_v57 = vmul.f32 %v6486_v42, %v6365_v46 }
 0x9e2   :  { %v1859_v56 = vmul.f32 %v6468_v24, %v1837_v25  ;;  %v5484_v8 = vpop.eup %5483  ;;  %v1825_v25 = vmul.f32 %v6492_v44, %v6371_v27 }
 0x9e3   :  { %1878 = vrot.lane.b32.xlu1 %v1860_v55, %s5839_s21  ;;  %v1523_v9 = vadd.f32 1.0, %v5484_v8 }
 0x9e4   :  { %1876 = vrot.lane.b32.xlu0 %v1859_v56, %s5839_s21  ;;  %v1841_v49 = vpop.permute.xlu0 %1840 }
 0x9e5   :  { %v1843_v37 = vpop.permute.xlu1 %1842  ;;  %v1861_v53 = vmul.f32 %v6478_v47, %v1841_v49  ;;  %5485 = vrcp.f32 %v1523_v9 }
 0x9e6   :  { %v1862_v36 = vmul.f32 %v6475_v16, %v1843_v37 }
 0x9e7   :  { %1880 = vrot.lane.b32.xlu1 %v1861_v53, %s5839_s21 }
 0x9e8   :  { %1882 = vrot.lane.b32.xlu0 %v1862_v36, %s5839_s21  ;;  %v1845_v18 = vpop.permute.xlu0 %1844 }
 0x9e9   :  { %v1847_v40 = vpop.permute.xlu1 %1846  ;;  %v1863_v15 = vmul.f32 %v6486_v42, %v1845_v18 }
 0x9ea   :  { %v1864_v54 = vmul.f32 %v6483_v12, %v1847_v40 }
 0x9eb   :  { %1884 = vrot.lane.b32.xlu1 %v1863_v15, %s5839_s21 }
 0x9ec   :  { %1886 = vrot.lane.b32.xlu0 %v1864_v54, %s5839_s21  ;;  %v1849_v48 = vpop.permute.xlu0 %1848 }
 0x9ed   :  { %v1865_v35 = vmul.f32 %v6492_v44, %v1849_v48 }
 0x9ef   :  { %1888 = vrot.lane.b32.xlu1 %v1865_v35, %s5839_s21  ;;  %v6497_v2 = vpop.eup %5485 }
 0x9f0   :  { %v1527_v53 = vmul.f32 %v6497_v2, %v6383_v28 }
 0xa37   :  { %v1530_v13 = vpop.permute.xlu1 %1529 }
 0xa38   :  { %v1532_v22 = vmul.f32 %v6497_v2, %v1530_v13 }
 0xa3a   :  { %1534 = vrot.lane.b32.xlu0 %v1532_v22, %s5839_s21 }
 0xa52   :  { %v1875_v58 = vpop.permute.xlu0 %1874 }
 0xa53   :  { %v6503_v31 = vadd.f32 %v1875_v58, %v1818_v43 }
 0xa55   :  { %5487 = vtanh.f32 %v6503_v31  ;;  %v1879_v59 = vpop.permute.xlu1 %1878 }
 0xa56   :  { %v1877_v50 = vpop.permute.xlu0 %1876  ;;  %v6512_v38 = vadd.f32 %v1879_v59, %v1820_v23 }
 0xa57   :  { %v6510_v60 = vadd.f32 %v1877_v50, %v1819_v61 }
 0xa59   :  { %5489 = vtanh.f32 %v6510_v60  ;;  %v1881_v6 = vpop.permute.xlu1 %1880 }
 0xa5a   :  { %5491 = vtanh.f32 %v6512_v38  ;;  %v1883_v10 = vpop.permute.xlu0 %1882  ;;  %v6523_v14 = vadd.f32 %v1881_v6, %v1821_v32 }
 0xa5b   :  { %v6520_v33 = vadd.f32 %v1883_v10, %v1822_v26 }
 0xa5d   :  { %5493 = vtanh.f32 %v6520_v33  ;;  %v1885_v41 = vpop.permute.xlu1 %1884 }
 0xa5e   :  { %5495 = vtanh.f32 %v6523_v14  ;;  %v1887_v19 = vpop.permute.xlu0 %1886  ;;  %v6533_v39 = vadd.f32 %v1885_v41, %v1823_v57 }
 0xa5f   :  { %v5488_v51 = vpop.eup %5487  ;;  %v6531_v20 = vadd.f32 %v1887_v19, %v1824_v52 }
 0xa60   :  { %1922 = vrot.lane.b32.xlu1 %v5488_v51, %s5838_s16 }
 0xa61   :  { %5497 = vtanh.f32 %v6531_v20  ;;  %v1889_v45 = vpop.permute.xlu1 %1888 }
 0xa62   :  { %5499 = vtanh.f32 %v6533_v39  ;;  %v6539_v55 = vadd.f32 %v1889_v45, %v1825_v25  ;;  %v2194_v45 = vld [vmem:[%s7603_s0 + $0x4] sm:$0x1] }
 0xa63   :  { %v5490_v29 = vpop.eup %5489 }
 0xa64   :  { %v5492_v56 = vpop.eup %5491  ;;  %1924 = vrot.lane.b32.xlu1 %v5490_v29, %s5838_s16  ;;  %5501 = vtanh.f32 %v6539_v55 }
 0xa65   :  { %1926 = vrot.lane.b32.xlu0 %v5492_v56, %s5838_s16 }
 0xa67   :  { %v5494_v46 = vpop.eup %5493 }
 0xa68   :  { %v5496_v37 = vpop.eup %5495  ;;  %1930 = vrot.lane.b32.xlu1 %v5494_v46, %s5838_s16 }
 0xa69   :  { %1928 = vrot.lane.b32.xlu0 %v5496_v37, %s5838_s16 }
 0xa6b   :  { %v5498_v49 = vpop.eup %5497 }
 0xa6c   :  { %v5500_v36 = vpop.eup %5499  ;;  %1934 = vrot.lane.b32.xlu1 %v5498_v49, %s5838_s16 }
 0xa6d   :  { %1932 = vrot.lane.b32.xlu0 %v5500_v36, %s5838_s16  ;;  %v2195_v36 = vld [vmem:[%s7603_s0 + $0xc] sm:$0x1] }
 0xa6e   :  { %v5502_v27 = vpop.eup %5501 }
 0xa71   :  { %1936 = vrot.lane.b32.xlu0 %v5502_v27, %s5838_s16 }
 0xaac   :  { %v1535_v40 = vpop.permute.xlu0 %1534 }
 0xaad   :  { %v6551_v18 = vadd.f32 %v1535_v40, %v1527_v53  ;;  %v2196_v53 = vld [vmem:[%s7603_s0 + $0x14] sm:$0x1] }
 0xaaf   :  { %5503 = vtanh.f32 %v6551_v18 }
 0xab9   :  { %v5504_v54 = vpop.eup %5503 }
 0xaba   :  { %1540 = vrot.lane.b32.xlu1 %v5504_v54, %s5838_s16 }
 0xad2   :  { %v1923_v15 = vpop.permute.xlu1 %1922 }
 0xad3   :  { %v1946_v9 = vmul.f32 %v6464_v63, %v1923_v15  ;;  %v2198_v15 = vld [vmem:[%s7603_s0 + $0x24] sm:$0x1] }
 0xad6   :  { %v1925_v48 = vpop.permute.xlu1 %1924 }
 0xad7   :  { %v1927_v35 = vpop.permute.xlu0 %1926  ;;  %v1947_v30 = vmul.f32 %v6468_v24, %v1925_v48 }
 0xad8   :  { %v1948_v8 = vmul.f32 %v6470_v1, %v1927_v35 }
 0xad9   :  { %v1962_v13 = vrot.slane %v1947_v30, 7  ;;  %v2197_v30 = vld [vmem:[%s7603_s0 + $0x1c] sm:$0x1] }
 0xada   :  { %v1931_v22 = vpop.permute.xlu1 %1930  ;;  %v1964_v28 = vrot.slane %v1948_v8, 6 }
 0xadb   :  { %v1963_v43 = vsel %vm343_vm1, %v1962_v13, %v1946_v9  ;;  %v1929_v58 = vpop.permute.xlu0 %1928  ;;  %v1950_v61 = vmul.f32 %v6475_v16, %v1931_v22  ;;  %v2200_v22 = vld [vmem:[%s7603_s0 + $0x34] sm:$0x1] }
 0xadc   :  { %v1949_v23 = vmul.f32 %v6478_v47, %v1929_v58  ;;  %v1965_v50 = vsel %vm346_vm2, %v1964_v28, %v1963_v43  ;;  %v2199_v58 = vld [vmem:[%s7603_s0 + $0x2c] sm:$0x1] }
 0xadd   :  { %v1968_v59 = vrot.slane %v1950_v61, 4 }
 0xade   :  { %v1966_v26 = vrot.slane %v1949_v23, 5  ;;  %v1935_v51 = vpop.permute.xlu1 %1934 }
 0xadf   :  { %v1933_v24 = vpop.permute.xlu0 %1932  ;;  %v1952_v1 = vmul.f32 %v6483_v12, %v1935_v51 }
 0xae0   :  { %v1967_v63 = vsel %vm349_vm3, %v1966_v26, %v1965_v50  ;;  %v1951_v32 = vmul.f32 %v6486_v42, %v1933_v24 }
 0xae1   :  { %v1969_v10 = vsel %vm352_vm4, %v1968_v59, %v1967_v63  ;;  %v1972_v6 = vrot.slane %v1952_v1, 2  ;;  %v2201_v59 = vld [vmem:[%s7603_s0 + $0x3c] sm:$0x1] }
 0xae2   :  { %v1970_v52 = vrot.slane %v1951_v32, 3 }
 0xae3   :  { %v1937_v57 = vpop.permute.xlu0 %1936 }
 0xae4   :  { %v1971_v16 = vsel %vm355_vm5, %v1970_v52, %v1969_v10  ;;  %v1953_v47 = vmul.f32 %v6492_v44, %v1937_v57  ;;  %v6630_v57 = vld [vmem:[%s7605_s3] ss:$0 sm:$0xff] }
 0xae5   :  { %v1973_v19 = vsel %vm358_vm6, %v1972_v6, %v1971_v16 }
 0xae6   :  { %v1974_v41 = vrot.slane %v1953_v47, 1 }
 0xae8   :  { %v1975_v25 = vsel %vm361_vm7, %v1974_v41, %v1973_v19 }
 0xae9   :  { %1976 = vrot.lane.b32.xlu0 %v1975_v25, %s5839_s21 }
 0xb2c   :  { %v1541_v12 = vpop.permute.xlu1 %1540 }
 0xb2d   :  { %v6572_v29 = vmul.f32 %v6497_v2, %v1541_v12 }
 0xb2f   :  { %1979 = vrot.lane.b32.xlu1 %v6572_v29, %s5838_s16 }
 0xb5b   :  { %v1977_v42 = vpop.permute.xlu0 %1976 }
 0xb5c   :  { %4936 = vmatmul.mubr.msk.f32.vlgmr.msra.gmra.mrb[6].mxu1 %vm44_vm8, %v1977_v42 }
 0xb5d   :  { %5147 = vmatpush3.bf16.msra.mxu1 %v6019_v62  ;;  %4954 = vmatprep.mubr.msk.f32.mxu1 %vm5836_vm0, %v5837_v4 }
 0xb5e   :  { %5148 = vmatprep.subr.bf16.mxu1 %v5835_v0 }
 0xb61   :  { %5150 = vmatpush3.bf16.msra.mxu1 %v6026_v3 }
 0xb62   :  { %5151 = vmatprep.subr.bf16.mxu1 %v5835_v0 }
 0xb65   :  { %5153 = vmatpush3.bf16.msra.mxu1 %v6038_v11 }
 0xb66   :  { %5154 = vmatprep.subr.bf16.mxu1 %v5835_v0 }
 0xb69   :  { %5156 = vmatpush3.bf16.msra.mxu1 %v6048_v17 }
 0xb6a   :  { %5175 = vmatprep.subr.bf16.mxu1 %v5835_v0 }
 0xba1   :  { %v1980_v44 = vpop.permute.xlu1 %1979 }
 0xba2   :  { %v1982_v2 = vsel %vm44_vm8, %v1977_v42, %v1980_v44 }
 0xba3   :  { %4925 = vmatmul.mubr.msk.f32.vlgmr.msra.gmra.mrb[8].mxu0 %vm373_vm9, %v1982_v2 }
 0xba4   :  { %5159 = vmatpush3.bf16.msra.mxu0 %v5888_v5  ;;  %4965 = vmatprep.mubr.msk.f32.mxu0 %vm5836_vm0, %v5837_v4 }
 0xba5   :  { %5160 = vmatprep.subr.bf16.mxu0 %v5835_v0 }
 0xba8   :  { %5162 = vmatpush3.bf16.msra.mxu0 %v5897_v7 }
 0xba9   :  { %5163 = vmatprep.subr.bf16.mxu0 %v5835_v0 }
 0xc2f   :  { %v2270_v56 = vpop.f32.mrb[6].mxu1 }
 0xc30   :  { %v4937_v46 = vpop.f32.mrb[7].mxu1  ;;  %v2290_v37 = vadd.f32 %v2270_v56, %v2194_v45  ;;  %v2275_v49 = vrot.slane %v2270_v56, 1  ;;  %v2276_v27 = vrot.slane %v2270_v56, 2  ;;  %v2278_v40 = vrot.slane %v2270_v56, 4 }
 0xc31   :  { %v2277_v48 = vrot.slane %v2270_v56, 3  ;;  %v2280_v8 = vrot.slane %v2270_v56, 6  ;;  %v2279_v28 = vrot.slane %v2270_v56, 5  ;;  %v2281_v23 = vrot.slane %v2270_v56, 7 }
 0xc32   :  { %5505 = vtanh.f32 %v2290_v37  ;;  %v2291_v54 = vadd.f32 %v2275_v49, %v2195_v36  ;;  %v2292_v35 = vadd.f32 %v2276_v27, %v2196_v53  ;;  %v2294_v9 = vadd.f32 %v2278_v40, %v2198_v15 }
 0xc33   :  { %v2293_v43 = vadd.f32 %v2277_v48, %v2197_v30  ;;  %v2296_v61 = vadd.f32 %v2280_v8, %v2200_v22  ;;  %v2295_v50 = vadd.f32 %v2279_v28, %v2199_v58  ;;  %v2297_v26 = vadd.f32 %v2281_v23, %v2201_v59 }
 0xc34   :  { %5507 = vtanh.f32 %v2291_v54  ;;  %v4631_v41 = vmul.f32 -1.442695, %v2290_v37  ;;  %v4632_v25 = vmul.f32 -1.442695, %v2291_v54  ;;  %v4633_v12 = vmul.f32 -1.442695, %v2292_v35 }
 0xc35   :  { %5509 = vtanh.f32 %v2292_v35  ;;  %v4635_v42 = vmul.f32 -1.442695, %v2294_v9  ;;  %v4634_v2 = vmul.f32 -1.442695, %v2293_v43  ;;  %v4637_v45 = vmul.f32 -1.442695, %v2296_v61 }
 0xc36   :  { %5511 = vtanh.f32 %v2294_v9  ;;  %v4636_v46 = vmul.f32 -1.442695, %v2295_v50  ;;  %v4638_v49 = vmul.f32 -1.442695, %v2297_v26 }
 0xc37   :  { %5513 = vtanh.f32 %v2293_v43 }
 0xc38   :  { %5515 = vtanh.f32 %v2296_v61 }
 0xc39   :  { %5517 = vtanh.f32 %v2295_v50 }
 0xc3a   :  { %5519 = vtanh.f32 %v2297_v26 }
 0xc3c   :  { %v5506_v13 = vpop.eup %5505 }
 0xc3d   :  { %2370 = vrot.lane.b32.xlu0 %v5506_v13, %s5838_s16 }
 0xc3e   :  { %v5508_v51 = vpop.eup %5507 }
 0xc3f   :  { %v5510_v24 = vpop.eup %5509 }
 0xc40   :  { %2374 = vrot.lane.b32.xlu1 %v5510_v24, %s5838_s16  ;;  %v5512_v1 = vpop.eup %5511 }
 0xc41   :  { %2372 = vrot.lane.b32.xlu0 %v5508_v51, %s5838_s16  ;;  %v5514_v63 = vpop.eup %5513 }
 0xc42   :  { %v5516_v32 = vpop.eup %5515 }
 0xc43   :  { %v5518_v10 = vpop.eup %5517 }
 0xc44   :  { %2376 = vrot.lane.b32.xlu1 %v5514_v63, %s5838_s16  ;;  %v5520_v6 = vpop.eup %5519 }
 0xc45   :  { %2378 = vrot.lane.b32.xlu0 %v5512_v1, %s5838_s16 }
 0xc48   :  { %2380 = vrot.lane.b32.xlu1 %v5518_v10, %s5838_s16 }
 0xc49   :  { %2382 = vrot.lane.b32.xlu0 %v5516_v32, %s5838_s16 }
 0xc4c   :  { %2384 = vrot.lane.b32.xlu1 %v5520_v6, %s5838_s16 }
 0xc76   :  { %v2052_v52 = vpop.f32.mrb[8].mxu0 }
 0xc77   :  { %v6633_v16 = vadd.f32 %v6630_v57, %v2052_v52  ;;  %v4926_v47 = vpop.f32.mrb[9].mxu0 }
 0xc79   :  { %5521 = vtanh.f32 %v6633_v16 }
 0xc7a   :  { %5523 = vpow2.f32 %v4631_v41 }
 0xc7b   :  { %5525 = vpow2.f32 %v4632_v25 }
 0xc7c   :  { %5527 = vpow2.f32 %v4633_v12 }
 0xc7d   :  { %5529 = vpow2.f32 %v4635_v42 }
 0xc7e   :  { %5531 = vpow2.f32 %v4634_v2 }
 0xc7f   :  { %5533 = vpow2.f32 %v4637_v45  ;;  %v4629_v45 = vmul.f32 -1.442695, %v6633_v16 }
 0xc83   :  { %v5522_v19 = vpop.eup %5521 }
 0xc84   :  { %2065 = vrot.lane.b32.xlu0 %v5522_v19, %s5838_s16  ;;  %v5524_v44 = vpop.eup %5523 }
 0xc85   :  { %v2322_v56 = vadd.f32 1.0, %v5524_v44  ;;  %v5526_v36 = vpop.eup %5525 }
 0xc86   :  { %v5528_v27 = vpop.eup %5527  ;;  %v2323_v37 = vadd.f32 1.0, %v5526_v36 }
 0xc87   :  { %5535 = vrcp.f32 %v2322_v56  ;;  %v5530_v53 = vpop.eup %5529  ;;  %v2324_v40 = vadd.f32 1.0, %v5528_v27 }
 0xc88   :  { %5537 = vpow2.f32 %v4636_v46  ;;  %v5532_v54 = vpop.eup %5531  ;;  %v2326_v48 = vadd.f32 1.0, %v5530_v53 }
 0xc89   :  { %5539 = vpow2.f32 %v4638_v49  ;;  %v5534_v15 = vpop.eup %5533  ;;  %v2325_v8 = vadd.f32 1.0, %v5532_v54 }
 0xc8a   :  { %5541 = vrcp.f32 %v2323_v37  ;;  %v2328_v22 = vadd.f32 1.0, %v5534_v15 }
 0xc8b   :  { %5543 = vrcp.f32 %v2324_v40 }
 0xc8c   :  { %5545 = vrcp.f32 %v2326_v48 }
 0xc8d   :  { %5547 = vrcp.f32 %v2325_v8 }
 0xc8e   :  { %5549 = vrcp.f32 %v2328_v22 }
 0xc91   :  { %v6637_v35 = vpop.eup %5535 }
 0xc92   :  { %v5538_v9 = vpop.eup %5537  ;;  %v2354_v37 = vmul.f32 %v6637_v35, %v6503_v31 }
 0xc93   :  { %v2327_v28 = vadd.f32 1.0, %v5538_v9  ;;  %v5540_v43 = vpop.eup %5539 }
 0xc94   :  { %v2329_v58 = vadd.f32 1.0, %v5540_v43  ;;  %v6641_v61 = vpop.eup %5541 }
 0xc95   :  { %5551 = vrcp.f32 %v2327_v28  ;;  %v6643_v50 = vpop.eup %5543  ;;  %v2355_v16 = vmul.f32 %v6641_v61, %v6510_v60 }
 0xc96   :  { %5553 = vrcp.f32 %v2329_v58  ;;  %v6648_v24 = vpop.eup %5545  ;;  %v2356_v54 = vmul.f32 %v6643_v50, %v6512_v38 }
 0xc97   :  { %v6651_v63 = vpop.eup %5547  ;;  %5555 = vpow2.f32 %v4629_v45  ;;  %v2358_v31 = vmul.f32 %v6648_v24, %v6520_v33 }
 0xc98   :  { %v6656_v52 = vpop.eup %5549  ;;  %v2357_v60 = vmul.f32 %v6651_v63, %v6523_v14 }
 0xc99   :  { %v2360_v43 = vmul.f32 %v6656_v52, %v6531_v20 }
 0xc9f   :  { %v6659_v19 = vpop.eup %5551 }
 0xca0   :  { %v6665_v42 = vpop.eup %5553  ;;  %v2359_v33 = vmul.f32 %v6659_v19, %v6533_v39 }
 0xca1   :  { %v5556_v56 = vpop.eup %5555 }
 0xca2   :  { %v2059_v46 = vadd.f32 1.0, %v5556_v56 }
 0xca4   :  { %5557 = vrcp.f32 %v2059_v46 }
 0xcae   :  { %v6670_v49 = vpop.eup %5557 }
 0xcaf   :  { %v2371_v30 = vpop.permute.xlu0 %2370 }
 0xcb0   :  { %v2394_v13 = vmul.f32 %v6637_v35, %v2371_v30 }
 0xcb2   :  { %2410 = vrot.lane.b32.xlu1 %v2394_v13, %s5839_s21  ;;  %v2375_v59 = vpop.permute.xlu1 %2374 }
 0xcb3   :  { %v2373_v23 = vpop.permute.xlu0 %2372  ;;  %v2396_v51 = vmul.f32 %v6643_v50, %v2375_v59 }
 0xcb4   :  { %v2395_v26 = vmul.f32 %v6641_v61, %v2373_v23 }
 0xcb5   :  { %2414 = vrot.lane.b32.xlu0 %v2396_v51, %s5839_s21 }
 0xcb6   :  { %2412 = vrot.lane.b32.xlu1 %v2395_v26, %s5839_s21  ;;  %v2377_v32 = vpop.permute.xlu1 %2376  ;;  %v2361_v26 = vmul.f32 %v6665_v42, %v6539_v55 }
 0xcb7   :  { %v2379_v1 = vpop.permute.xlu0 %2378  ;;  %v2397_v6 = vmul.f32 %v6651_v63, %v2377_v32 }
 0xcb8   :  { %v2398_v10 = vmul.f32 %v6648_v24, %v2379_v1 }
 0xcb9   :  { %2416 = vrot.lane.b32.xlu0 %v2397_v6, %s5839_s21 }
 0xcba   :  { %2418 = vrot.lane.b32.xlu1 %v2398_v10, %s5839_s21  ;;  %v2381_v41 = vpop.permute.xlu1 %2380 }
 0xcbb   :  { %v2383_v47 = vpop.permute.xlu0 %2382  ;;  %v2399_v12 = vmul.f32 %v6659_v19, %v2381_v41  ;;  %v2063_v41 = vmul.f32 %v6670_v49, %v6551_v18 }
 0xcbc   :  { %v2400_v25 = vmul.f32 %v6656_v52, %v2383_v47 }
 0xcbd   :  { %2420 = vrot.lane.b32.xlu0 %v2399_v12, %s5839_s21 }
 0xcbe   :  { %2422 = vrot.lane.b32.xlu1 %v2400_v25, %s5839_s21  ;;  %v2385_v44 = vpop.permute.xlu1 %2384 }
 0xcbf   :  { %v2401_v2 = vmul.f32 %v6665_v42, %v2385_v44 }
 0xcc1   :  { %2424 = vrot.lane.b32.xlu0 %v2401_v2, %s5839_s21 }
 0xcf6   :  { %v2066_v36 = vpop.permute.xlu0 %2065 }
 0xcf7   :  { %v2068_v27 = vmul.f32 %v6670_v49, %v2066_v36 }
 0xcf9   :  { %2070 = vrot.lane.b32.xlu1 %v2068_v27, %s5839_s21 }
 0xd24   :  { %v2411_v53 = vpop.permute.xlu1 %2410 }
 0xd25   :  { %v6676_v40 = vadd.f32 %v2411_v53, %v2354_v37 }
 0xd27   :  { %5559 = vtanh.f32 %v6676_v40  ;;  %v2415_v48 = vpop.permute.xlu0 %2414 }
 0xd28   :  { %v2413_v15 = vpop.permute.xlu1 %2412  ;;  %v6685_v8 = vadd.f32 %v2415_v48, %v2356_v54 }
 0xd29   :  { %v6683_v30 = vadd.f32 %v2413_v15, %v2355_v16 }
 0xd2b   :  { %5561 = vtanh.f32 %v6683_v30  ;;  %v2417_v22 = vpop.permute.xlu0 %2416 }
 0xd2c   :  { %5563 = vtanh.f32 %v6685_v8  ;;  %v2419_v13 = vpop.permute.xlu1 %2418  ;;  %v6696_v28 = vadd.f32 %v2417_v22, %v2357_v60 }
 0xd2d   :  { %v6693_v38 = vadd.f32 %v2419_v13, %v2358_v31 }
 0xd2f   :  { %5565 = vtanh.f32 %v6693_v38  ;;  %v2421_v14 = vpop.permute.xlu0 %2420 }
 0xd30   :  { %5567 = vtanh.f32 %v6696_v28  ;;  %v2423_v58 = vpop.permute.xlu1 %2422  ;;  %v6706_v59 = vadd.f32 %v2421_v14, %v2359_v33 }
 0xd31   :  { %v5560_v9 = vpop.eup %5559  ;;  %v6704_v23 = vadd.f32 %v2423_v58, %v2360_v43 }
 0xd32   :  { %2458 = vrot.lane.b32.xlu0 %v5560_v9, %s5838_s16 }
 0xd33   :  { %5569 = vtanh.f32 %v6704_v23  ;;  %v2425_v20 = vpop.permute.xlu0 %2424 }
 0xd34   :  { %5571 = vtanh.f32 %v6706_v59  ;;  %v6712_v32 = vadd.f32 %v2425_v20, %v2361_v26 }
 0xd35   :  { %v5562_v51 = vpop.eup %5561 }
 0xd36   :  { %v5564_v1 = vpop.eup %5563  ;;  %2460 = vrot.lane.b32.xlu0 %v5562_v51, %s5838_s16  ;;  %5573 = vtanh.f32 %v6712_v32 }
 0xd37   :  { %2462 = vrot.lane.b32.xlu1 %v5564_v1, %s5838_s16 }
 0xd39   :  { %v5566_v39 = vpop.eup %5565 }
 0xd3a   :  { %v5568_v10 = vpop.eup %5567  ;;  %2466 = vrot.lane.b32.xlu0 %v5566_v39, %s5838_s16  ;;  %v2730_v39 = vld [vmem:[%s7603_s0 + $0x5] sm:$0x1] }
 0xd3b   :  { %2464 = vrot.lane.b32.xlu1 %v5568_v10, %s5838_s16 }
 0xd3d   :  { %v5570_v6 = vpop.eup %5569 }
 0xd3e   :  { %v5572_v47 = vpop.eup %5571  ;;  %2470 = vrot.lane.b32.xlu0 %v5570_v6, %s5838_s16 }
 0xd3f   :  { %2468 = vrot.lane.b32.xlu1 %v5572_v47, %s5838_s16 }
 0xd40   :  { %v5574_v55 = vpop.eup %5573 }
 0xd43   :  { %2472 = vrot.lane.b32.xlu1 %v5574_v55, %s5838_s16 }
 0xd6b   :  { %v2071_v25 = vpop.permute.xlu1 %2070 }
 0xd6c   :  { %v6724_v12 = vadd.f32 %v2071_v25, %v2063_v41  ;;  %v2731_v41 = vld [vmem:[%s7603_s0 + $0xd] sm:$0x1] }
 0xd6e   :  { %5575 = vtanh.f32 %v6724_v12 }
 0xd78   :  { %v5576_v44 = vpop.eup %5575 }
 0xd79   :  { %2076 = vrot.lane.b32.xlu0 %v5576_v44, %s5838_s16  ;;  %v2732_v44 = vld [vmem:[%s7603_s0 + $0x15] sm:$0x1] }
 0xda4   :  { %v2459_v2 = vpop.permute.xlu0 %2458 }
 0xda5   :  { %v2482_v27 = vmul.f32 %v6637_v35, %v2459_v2 }
 0xda8   :  { %v2461_v45 = vpop.permute.xlu0 %2460 }
 0xda9   :  { %v2463_v56 = vpop.permute.xlu1 %2462  ;;  %v2483_v46 = vmul.f32 %v6641_v61, %v2461_v45 }
 0xdaa   :  { %v2484_v36 = vmul.f32 %v6643_v50, %v2463_v56  ;;  %v2734_v56 = vld [vmem:[%s7603_s0 + $0x25] sm:$0x1] }
 0xdab   :  { %v2498_v37 = vrot.slane %v2483_v46, 7 }
 0xdac   :  { %v2467_v53 = vpop.permute.xlu0 %2466  ;;  %v2500_v18 = vrot.slane %v2484_v36, 6 }
 0xdad   :  { %v2499_v16 = vsel %vm343_vm1, %v2498_v37, %v2482_v27  ;;  %v2465_v54 = vpop.permute.xlu1 %2464  ;;  %v2486_v15 = vmul.f32 %v6648_v24, %v2467_v53  ;;  %v2733_v27 = vld [vmem:[%s7603_s0 + $0x1d] sm:$0x1] }
 0xdae   :  { %v2485_v48 = vmul.f32 %v6651_v63, %v2465_v54  ;;  %v2501_v31 = vsel %vm346_vm2, %v2500_v18, %v2499_v16  ;;  %v2736_v16 = vld [vmem:[%s7603_s0 + $0x35] sm:$0x1] }
 0xdaf   :  { %v2504_v9 = vrot.slane %v2486_v15, 4 }
 0xdb0   :  { %v2502_v60 = vrot.slane %v2485_v48, 5  ;;  %v2471_v13 = vpop.permute.xlu0 %2470  ;;  %v2735_v48 = vld [vmem:[%s7603_s0 + $0x2d] sm:$0x1] }
 0xdb1   :  { %v2469_v61 = vpop.permute.xlu1 %2468  ;;  %v2488_v50 = vmul.f32 %v6656_v52, %v2471_v13  ;;  %v2737_v13 = vld [vmem:[%s7603_s0 + $0x3d] sm:$0x1] }
 0xdb2   :  { %v2503_v35 = vsel %vm349_vm3, %v2502_v60, %v2501_v31  ;;  %v2487_v22 = vmul.f32 %v6659_v19, %v2469_v61 }
 0xdb3   :  { %v2505_v43 = vsel %vm352_vm4, %v2504_v9, %v2503_v35  ;;  %v2508_v33 = vrot.slane %v2488_v50, 2 }
 0xdb4   :  { %v2506_v58 = vrot.slane %v2487_v22, 3 }
 0xdb5   :  { %v2473_v14 = vpop.permute.xlu1 %2472 }
 0xdb6   :  { %v2507_v24 = vsel %vm355_vm5, %v2506_v58, %v2505_v43  ;;  %v2489_v63 = vmul.f32 %v6665_v42, %v2473_v14 }
 0xdb7   :  { %v2509_v26 = vsel %vm358_vm6, %v2508_v33, %v2507_v24 }
 0xdb8   :  { %v2510_v51 = vrot.slane %v2489_v63, 1 }
 0xdba   :  { %v2511_v20 = vsel %vm361_vm7, %v2510_v51, %v2509_v26 }
 0xdbb   :  { %2512 = vrot.lane.b32.xlu1 %v2511_v20, %s5839_s21 }
 0xdeb   :  { %v2077_v52 = vpop.permute.xlu0 %2076 }
 0xdec   :  { %v6745_v1 = vmul.f32 %v6670_v49, %v2077_v52 }
 0xdee   :  { %2515 = vrot.lane.b32.xlu0 %v6745_v1, %s5838_s16 }
 0xe2d   :  { %v2513_v19 = vpop.permute.xlu1 %2512 }
 0xe2e   :  { %4966 = vmatmul.mubr.msk.f32.vlgmr.msra.gmra.mrb[10].mxu0 %vm44_vm8, %v2513_v19 }
 0xe2f   :  { %5165 = vmatpush3.bf16.msra.mxu0 %v6019_v62  ;;  %4984 = vmatprep.mubr.msk.f32.mxu0 %vm5836_vm0, %v5837_v4 }
 0xe30   :  { %5166 = vmatprep.subr.bf16.mxu0 %v5835_v0 }
 0xe33   :  { %5168 = vmatpush3.bf16.msra.mxu0 %v6026_v3 }
 0xe34   :  { %5169 = vmatprep.subr.bf16.mxu0 %v5835_v0 }
 0xe37   :  { %5171 = vmatpush3.bf16.msra.mxu0 %v6038_v11 }
 0xe38   :  { %5172 = vmatprep.subr.bf16.mxu0 %v5835_v0 }
 0xe3b   :  { %5174 = vmatpush3.bf16.msra.mxu0 %v6048_v17 }
 0xe3c   :  { %5193 = vmatprep.subr.bf16.mxu0 %v5835_v0 }
 0xe60   :  { %v2516_v42 = vpop.permute.xlu0 %2515 }
 0xe61   :  { %v2518_v49 = vsel %vm44_vm8, %v2513_v19, %v2516_v42 }
 0xe62   :  { %4955 = vmatmul.mubr.msk.f32.vlgmr.msra.gmra.mrb[8].mxu1 %vm373_vm9, %v2518_v49 }
 0xe63   :  { %5177 = vmatpush3.bf16.msra.mxu1 %v5888_v5  ;;  %4995 = vmatprep.mubr.msk.f32.mxu1 %vm5836_vm0, %v5837_v4 }
 0xe64   :  { %5178 = vmatprep.subr.bf16.mxu1 %v5835_v0 }
 0xe67   :  { %5180 = vmatpush3.bf16.msra.mxu1 %v5897_v7 }
 0xe68   :  { %5181 = vmatprep.subr.bf16.mxu1 %v5835_v0 }
 0xf01   :  { %v2806_v10 = vpop.f32.mrb[10].mxu0 }
 0xf02   :  { %v4967_v6 = vpop.f32.mrb[11].mxu0  ;;  %v2826_v47 = vadd.f32 %v2806_v10, %v2730_v39  ;;  %v2811_v55 = vrot.slane %v2806_v10, 1  ;;  %v2812_v25 = vrot.slane %v2806_v10, 2  ;;  %v2814_v2 = vrot.slane %v2806_v10, 4 }
 0xf03   :  { %v2813_v46 = vrot.slane %v2806_v10, 3  ;;  %v2816_v37 = vrot.slane %v2806_v10, 6  ;;  %v2815_v54 = vrot.slane %v2806_v10, 5  ;;  %v2817_v9 = vrot.slane %v2806_v10, 7 }
 0xf04   :  { %5577 = vtanh.f32 %v2826_v47  ;;  %v2827_v45 = vadd.f32 %v2811_v55, %v2731_v41  ;;  %v2828_v36 = vadd.f32 %v2812_v25, %v2732_v44  ;;  %v2830_v53 = vadd.f32 %v2814_v2, %v2734_v56 }
 0xf05   :  { %v2829_v15 = vadd.f32 %v2813_v46, %v2733_v27  ;;  %v2832_v31 = vadd.f32 %v2816_v37, %v2736_v16  ;;  %v2831_v60 = vadd.f32 %v2815_v54, %v2735_v48  ;;  %v2833_v61 = vadd.f32 %v2817_v9, %v2737_v13 }
 0xf06   :  { %5579 = vtanh.f32 %v2827_v45  ;;  %v4642_v20 = vmul.f32 -1.442695, %v2826_v47  ;;  %v4643_v52 = vmul.f32 -1.442695, %v2827_v45  ;;  %v4644_v19 = vmul.f32 -1.442695, %v2828_v36 }
 0xf07   :  { %5581 = vtanh.f32 %v2828_v36  ;;  %v4646_v42 = vmul.f32 -1.442695, %v2830_v53  ;;  %v4645_v39 = vmul.f32 -1.442695, %v2829_v15  ;;  %v4648_v10 = vmul.f32 -1.442695, %v2832_v31 }
 0xf08   :  { %5583 = vtanh.f32 %v2830_v53  ;;  %v4647_v55 = vmul.f32 -1.442695, %v2831_v60  ;;  %v4649_v41 = vmul.f32 -1.442695, %v2833_v61 }
 0xf09   :  { %5585 = vtanh.f32 %v2829_v15 }
 0xf0a   :  { %5587 = vtanh.f32 %v2832_v31 }
 0xf0b   :  { %5589 = vtanh.f32 %v2831_v60 }
 0xf0c   :  { %5591 = vtanh.f32 %v2833_v61 }
 0xf0e   :  { %v5578_v18 = vpop.eup %5577 }
 0xf0f   :  { %2906 = vrot.lane.b32.xlu1 %v5578_v18, %s5838_s16 }
 0xf10   :  { %v5580_v50 = vpop.eup %5579 }
 0xf11   :  { %v5582_v35 = vpop.eup %5581 }
 0xf12   :  { %2910 = vrot.lane.b32.xlu0 %v5582_v35, %s5838_s16  ;;  %v5584_v22 = vpop.eup %5583 }
 0xf13   :  { %2908 = vrot.lane.b32.xlu1 %v5580_v50, %s5838_s16  ;;  %v5586_v43 = vpop.eup %5585 }
 0xf14   :  { %v5588_v33 = vpop.eup %5587 }
 0xf15   :  { %v5590_v14 = vpop.eup %5589 }
 0xf16   :  { %2912 = vrot.lane.b32.xlu0 %v5586_v43, %s5838_s16  ;;  %v5592_v26 = vpop.eup %5591 }
 0xf17   :  { %2914 = vrot.lane.b32.xlu1 %v5584_v22, %s5838_s16 }
 0xf1a   :  { %2916 = vrot.lane.b32.xlu0 %v5590_v14, %s5838_s16 }
 0xf1b   :  { %2918 = vrot.lane.b32.xlu1 %v5588_v33, %s5838_s16 }
 0xf1e   :  { %2920 = vrot.lane.b32.xlu0 %v5592_v26, %s5838_s16 }
 0xf35   :  { %v2588_v58 = vpop.f32.mrb[8].mxu1 }
 0xf36   :  { %v2589_v24 = vadd.f32 %v6630_v57, %v2588_v58  ;;  %v4956_v63 = vpop.f32.mrb[9].mxu1 }
 0xf38   :  { %5593 = vtanh.f32 %v2589_v24  ;;  %v4640_v27 = vmul.f32 -1.442695, %v2589_v24 }
 0xf39   :  { %5595 = vpow2.f32 %v4642_v20 }
 0xf3a   :  { %5597 = vpow2.f32 %v4643_v52 }
 0xf3b   :  { %5599 = vpow2.f32 %v4644_v19 }
 0xf3c   :  { %5601 = vpow2.f32 %v4646_v42 }
 0xf3d   :  { %5603 = vpow2.f32 %v4645_v39 }
 0xf3e   :  { %5605 = vpow2.f32 %v4648_v10 }
 0xf42   :  { %v5594_v51 = vpop.eup %5593 }
 0xf43   :  { %2601 = vrot.lane.b32.xlu1 %v5594_v51, %s5838_s16  ;;  %v5596_v49 = vpop.eup %5595 }
 0xf44   :  { %v2858_v6 = vadd.f32 1.0, %v5596_v49  ;;  %v5598_v25 = vpop.eup %5597 }
 0xf45   :  { %v5600_v44 = vpop.eup %5599  ;;  %v2859_v2 = vadd.f32 1.0, %v5598_v25 }
 0xf46   :  { %5607 = vrcp.f32 %v2858_v6  ;;  %v5602_v47 = vpop.eup %5601  ;;  %v2860_v45 = vadd.f32 1.0, %v5600_v44 }
 0xf47   :  { %5609 = vpow2.f32 %v4647_v55  ;;  %v5604_v56 = vpop.eup %5603  ;;  %v2862_v46 = vadd.f32 1.0, %v5602_v47 }
 0xf48   :  { %5611 = vpow2.f32 %v4649_v41  ;;  %v5606_v36 = vpop.eup %5605  ;;  %v2861_v18 = vadd.f32 1.0, %v5604_v56 }
 0xf49   :  { %5613 = vrcp.f32 %v2859_v2  ;;  %v2864_v15 = vadd.f32 1.0, %v5606_v36 }
 0xf4a   :  { %5615 = vrcp.f32 %v2860_v45 }
 0xf4b   :  { %5617 = vrcp.f32 %v2862_v46 }
 0xf4c   :  { %5619 = vpow2.f32 %v4640_v27 }
 0xf4d   :  { %5621 = vrcp.f32 %v2861_v18 }
 0xf4e   :  { %5623 = vrcp.f32 %v2864_v15 }
 0xf50   :  { %v6802_v37 = vpop.eup %5607 }
 0xf51   :  { %v5610_v16 = vpop.eup %5609  ;;  %v2890_v47 = vmul.f32 %v6802_v37, %v6676_v40 }
 0xf52   :  { %v2863_v48 = vadd.f32 1.0, %v5610_v16  ;;  %v5612_v31 = vpop.eup %5611 }
 0xf53   :  { %v2865_v9 = vadd.f32 1.0, %v5612_v31  ;;  %v6806_v60 = vpop.eup %5613 }
 0xf54   :  { %5625 = vrcp.f32 %v2863_v48  ;;  %v6808_v61 = vpop.eup %5615  ;;  %v2891_v56 = vmul.f32 %v6806_v60, %v6683_v30 }
 0xf55   :  { %v6812_v43 = vpop.eup %5617  ;;  %5627 = vrcp.f32 %v2865_v9  ;;  %v2892_v46 = vmul.f32 %v6808_v61, %v6685_v8 }
 0xf56   :  { %v5620_v33 = vpop.eup %5619  ;;  %v2894_v40 = vmul.f32 %v6812_v43, %v6693_v38 }
 0xf57   :  { %v6816_v14 = vpop.eup %5621  ;;  %v2595_v51 = vadd.f32 1.0, %v5620_v33 }
 0xf58   :  { %v6821_v20 = vpop.eup %5623  ;;  %v2893_v30 = vmul.f32 %v6816_v14, %v6696_v28 }
 0xf59   :  { %5629 = vrcp.f32 %v2595_v51  ;;  %v2896_v31 = vmul.f32 %v6821_v20, %v6704_v23 }
 0xf5e   :  { %v6824_v19 = vpop.eup %5625 }
 0xf5f   :  { %v6830_v10 = vpop.eup %5627  ;;  %v2895_v38 = vmul.f32 %v6824_v19, %v6706_v59 }
 0xf63   :  { %v6834_v41 = vpop.eup %5629 }
 0xf81   :  { %v2907_v53 = vpop.permute.xlu1 %2906 }
 0xf82   :  { %v2930_v54 = vmul.f32 %v6802_v37, %v2907_v53 }
 0xf84   :  { %2946 = vrot.lane.b32.xlu0 %v2930_v54, %s5839_s21  ;;  %v2911_v50 = vpop.permute.xlu0 %2910 }
 0xf85   :  { %v2909_v13 = vpop.permute.xlu1 %2908  ;;  %v2932_v22 = vmul.f32 %v6808_v61, %v2911_v50 }
 0xf86   :  { %v2931_v35 = vmul.f32 %v6806_v60, %v2909_v13 }
 0xf87   :  { %2950 = vrot.lane.b32.xlu1 %v2932_v22, %s5839_s21 }
 0xf88   :  { %2948 = vrot.lane.b32.xlu0 %v2931_v35, %s5839_s21  ;;  %v2913_v24 = vpop.permute.xlu0 %2912  ;;  %v2897_v35 = vmul.f32 %v6830_v10, %v6712_v32  ;;  %v2599_v32 = vmul.f32 %v6834_v41, %v6724_v12 }
 0xf89   :  { %v2915_v58 = vpop.permute.xlu1 %2914  ;;  %v2933_v26 = vmul.f32 %v6816_v14, %v2913_v24 }
 0xf8a   :  { %v2934_v63 = vmul.f32 %v6812_v43, %v2915_v58 }
 0xf8b   :  { %2952 = vrot.lane.b32.xlu1 %v2933_v26, %s5839_s21 }
 0xf8c   :  { %2954 = vrot.lane.b32.xlu0 %v2934_v63, %s5839_s21  ;;  %v2917_v42 = vpop.permute.xlu0 %2916 }
 0xf8d   :  { %v2919_v52 = vpop.permute.xlu1 %2918  ;;  %v2935_v39 = vmul.f32 %v6824_v19, %v2917_v42 }
 0xf8e   :  { %v2936_v49 = vmul.f32 %v6821_v20, %v2919_v52 }
 0xf8f   :  { %2956 = vrot.lane.b32.xlu1 %v2935_v39, %s5839_s21 }
 0xf90   :  { %2958 = vrot.lane.b32.xlu0 %v2936_v49, %s5839_s21  ;;  %v2921_v6 = vpop.permute.xlu0 %2920 }
 0xf91   :  { %v2937_v55 = vmul.f32 %v6830_v10, %v2921_v6 }
 0xf93   :  { %2960 = vrot.lane.b32.xlu1 %v2937_v55, %s5839_s21 }
 0xfb5   :  { %v2602_v25 = vpop.permute.xlu1 %2601 }
 0xfb6   :  { %v2604_v44 = vmul.f32 %v6834_v41, %v2602_v25 }
 0xfb8   :  { %2606 = vrot.lane.b32.xlu0 %v2604_v44, %s5839_s21 }
 0xff6   :  { %v2947_v2 = vpop.permute.xlu0 %2946 }
 0xff7   :  { %v6840_v45 = vadd.f32 %v2947_v2, %v2890_v47 }
 0xff9   :  { %5631 = vtanh.f32 %v6840_v45  ;;  %v2951_v27 = vpop.permute.xlu1 %2950 }
 0xffa   :  { %v2949_v36 = vpop.permute.xlu0 %2948  ;;  %v6849_v18 = vadd.f32 %v2951_v27, %v2892_v46 }
 0xffb   :  { %v6847_v53 = vadd.f32 %v2949_v36, %v2891_v56 }
 0xffd   :  { %5633 = vtanh.f32 %v6847_v53  ;;  %v2953_v15 = vpop.permute.xlu1 %2952 }
 0xffe   :  { %5635 = vtanh.f32 %v6849_v18  ;;  %v2955_v54 = vpop.permute.xlu0 %2954  ;;  %v6860_v48 = vadd.f32 %v2953_v15, %v2893_v30 }
 0xfff   :  { %v6857_v8 = vadd.f32 %v2955_v54, %v2894_v40 }
0x1001   :  { %5637 = vtanh.f32 %v6857_v8  ;;  %v2957_v28 = vpop.permute.xlu1 %2956 }
0x1002   :  { %5639 = vtanh.f32 %v6860_v48  ;;  %v2959_v9 = vpop.permute.xlu0 %2958  ;;  %v6870_v50 = vadd.f32 %v2957_v28, %v2895_v38 }
0x1003   :  { %v5632_v16 = vpop.eup %5631  ;;  %v6868_v13 = vadd.f32 %v2959_v9, %v2896_v31 }
0x1004   :  { %2994 = vrot.lane.b32.xlu1 %v5632_v16, %s5838_s16 }
0x1005   :  { %5641 = vtanh.f32 %v6868_v13  ;;  %v2961_v23 = vpop.permute.xlu1 %2960 }
0x1006   :  { %5643 = vtanh.f32 %v6870_v50  ;;  %v6876_v58 = vadd.f32 %v2961_v23, %v2897_v35 }
0x1007   :  { %v5634_v22 = vpop.eup %5633 }
0x1008   :  { %v5636_v33 = vpop.eup %5635  ;;  %2996 = vrot.lane.b32.xlu1 %v5634_v22, %s5838_s16  ;;  %5645 = vtanh.f32 %v6876_v58 }
0x1009   :  { %2998 = vrot.lane.b32.xlu0 %v5636_v33, %s5838_s16 }
0x100b   :  { %v5638_v59 = vpop.eup %5637 }
0x100c   :  { %v5640_v24 = vpop.eup %5639  ;;  %3002 = vrot.lane.b32.xlu1 %v5638_v59, %s5838_s16 }
0x100d   :  { %3000 = vrot.lane.b32.xlu0 %v5640_v24, %s5838_s16 }
0x100f   :  { %v5642_v63 = vpop.eup %5641 }
0x1010   :  { %v5644_v51 = vpop.eup %5643  ;;  %3006 = vrot.lane.b32.xlu1 %v5642_v63, %s5838_s16 }
0x1011   :  { %3004 = vrot.lane.b32.xlu0 %v5644_v51, %s5838_s16  ;;  %v3267_v51 = vld [vmem:[%s7603_s0 + $0xe] sm:$0x1] }
0x1012   :  { %v5646_v42 = vpop.eup %5645 }
0x1015   :  { %3008 = vrot.lane.b32.xlu0 %v5646_v42, %s5838_s16 }
0x102a   :  { %v2607_v26 = vpop.permute.xlu0 %2606 }
0x102b   :  { %v6886_v52 = vadd.f32 %v2607_v26, %v2599_v32 }
0x102d   :  { %5647 = vtanh.f32 %v6886_v52 }
0x1037   :  { %v5648_v49 = vpop.eup %5647 }
0x1038   :  { %2612 = vrot.lane.b32.xlu1 %v5648_v49, %s5838_s16 }
0x1076   :  { %v2995_v39 = vpop.permute.xlu1 %2994 }
0x1077   :  { %v3018_v44 = vmul.f32 %v6802_v37, %v2995_v39 }
0x107a   :  { %v2997_v6 = vpop.permute.xlu1 %2996 }
0x107b   :  { %v2999_v12 = vpop.permute.xlu0 %2998  ;;  %v3019_v55 = vmul.f32 %v6806_v60, %v2997_v6 }
0x107c   :  { %v3020_v25 = vmul.f32 %v6808_v61, %v2999_v12 }
0x107d   :  { %v3034_v47 = vrot.slane %v3019_v55, 7  ;;  %v3270_v55 = vld [vmem:[%s7603_s0 + $0x26] sm:$0x1] }
0x107e   :  { %v3003_v2 = vpop.permute.xlu1 %3002  ;;  %v3036_v56 = vrot.slane %v3020_v25, 6 }
0x107f   :  { %v3035_v46 = vsel %vm343_vm1, %v3034_v47, %v3018_v44  ;;  %v3001_v36 = vpop.permute.xlu0 %3000  ;;  %v3022_v27 = vmul.f32 %v6812_v43, %v3003_v2  ;;  %v3269_v47 = vld [vmem:[%s7603_s0 + $0x1e] sm:$0x1] }
0x1080   :  { %v3021_v40 = vmul.f32 %v6816_v14, %v3001_v36  ;;  %v3037_v16 = vsel %vm346_vm2, %v3036_v56, %v3035_v46  ;;  %v3272_v36 = vld [vmem:[%s7603_s0 + $0x36] sm:$0x1] }
0x1081   :  { %v3040_v30 = vrot.slane %v3022_v27, 4 }
0x1082   :  { %v3038_v54 = vrot.slane %v3021_v40, 5  ;;  %v3007_v15 = vpop.permute.xlu1 %3006 }
0x1083   :  { %v3005_v60 = vpop.permute.xlu0 %3004  ;;  %v3024_v61 = vmul.f32 %v6821_v20, %v3007_v15 }
0x1084   :  { %v3039_v37 = vsel %vm349_vm3, %v3038_v54, %v3037_v16  ;;  %v3023_v31 = vmul.f32 %v6824_v19, %v3005_v60  ;;  %v3271_v16 = vld [vmem:[%s7603_s0 + $0x2e] sm:$0x1]  ;;  %v3273_v60 = vld [vmem:[%s7603_s0 + $0x3e] sm:$0x1] }
0x1085   :  { %v3041_v38 = vsel %vm352_vm4, %v3040_v30, %v3039_v37  ;;  %v3044_v9 = vrot.slane %v3024_v61, 2 }
0x1086   :  { %v3042_v28 = vrot.slane %v3023_v31, 3 }
0x1087   :  { %v3009_v35 = vpop.permute.xlu0 %3008 }
0x1088   :  { %v3043_v43 = vsel %vm355_vm5, %v3042_v28, %v3041_v38  ;;  %v3025_v14 = vmul.f32 %v6830_v10, %v3009_v35 }
0x1089   :  { %v3045_v22 = vsel %vm358_vm6, %v3044_v9, %v3043_v43 }
0x108a   :  { %v3046_v23 = vrot.slane %v3025_v14, 1 }
0x108c   :  { %v3047_v33 = vsel %vm361_vm7, %v3046_v23, %v3045_v22 }
0x108d   :  { %3048 = vrot.lane.b32.xlu0 %v3047_v33, %s5839_s21 }
0x10aa   :  { %v2613_v20 = vpop.permute.xlu1 %2612 }
0x10ab   :  { %v6909_v59 = vmul.f32 %v6834_v41, %v2613_v20  ;;  %v3266_v41 = vld [vmem:[%s7603_s0 + $0x6] sm:$0x1] }
0x10ad   :  { %3051 = vrot.lane.b32.xlu1 %v6909_v59, %s5838_s16 }
0x10ff   :  { %v3049_v19 = vpop.permute.xlu0 %3048 }
0x1100   :  { %4996 = vmatmul.mubr.msk.f32.vlgmr.msra.gmra.mrb[10].mxu1 %vm44_vm8, %v3049_v19 }
0x1101   :  { %5183 = vmatpush3.bf16.msra.mxu1 %v6019_v62  ;;  %5014 = vmatprep.mubr.msk.f32.mxu1 %vm5836_vm0, %v5837_v4 }
0x1102   :  { %5184 = vmatprep.subr.bf16.mxu1 %v5835_v0 }
0x1105   :  { %5186 = vmatpush3.bf16.msra.mxu1 %v6026_v3 }
0x1106   :  { %5187 = vmatprep.subr.bf16.mxu1 %v5835_v0 }
0x1109   :  { %5189 = vmatpush3.bf16.msra.mxu1 %v6038_v11 }
0x110a   :  { %5190 = vmatprep.subr.bf16.mxu1 %v5835_v0 }
0x110d   :  { %5192 = vmatpush3.bf16.msra.mxu1 %v6048_v17 }
0x111f   :  { %v3052_v10 = vpop.permute.xlu1 %3051 }
0x1120   :  { %v3054_v24 = vsel %vm44_vm8, %v3049_v19, %v3052_v10 }
0x1121   :  { %4985 = vmatmul.mubr.msk.f32.vlgmr.msra.gmra.mrb[12].mxu0 %vm373_vm9, %v3054_v24 }
0x1122   :  { %5195 = vmatpush3.bf16.msra.mxu0 %v5888_v5  ;;  %5025 = vmatprep.mubr.msk.f32.mxu0 %vm5836_vm0, %v5837_v4 }
0x1123   :  { %5196 = vmatprep.subr.bf16.mxu0 %v5835_v0 }
0x1126   :  { %5198 = vmatpush3.bf16.msra.mxu0 %v5897_v7  ;;  %v3268_v7 = vld [vmem:[%s7603_s0 + $0x16] sm:$0x1] }
0x1127   :  { %5199 = vmatprep.subr.bf16.mxu0 %v5835_v0 }
0x11d3   :  { %v3342_v5 = vpop.f32.mrb[10].mxu1 }
0x11d4   :  { %v4997_v32 = vpop.f32.mrb[11].mxu1  ;;  %v3362_v63 = vadd.f32 %v3342_v5, %v3266_v41  ;;  %v3347_v26 = vrot.slane %v3342_v5, 1  ;;  %v3348_v42 = vrot.slane %v3342_v5, 2  ;;  %v3350_v6 = vrot.slane %v3342_v5, 4 }
0x11d5   :  { %v3349_v25 = vrot.slane %v3342_v5, 3  ;;  %v3352_v2 = vrot.slane %v3342_v5, 6  ;;  %v3351_v27 = vrot.slane %v3342_v5, 5  ;;  %v3353_v54 = vrot.slane %v3342_v5, 7 }
0x11d6   :  { %5649 = vtanh.f32 %v3362_v63  ;;  %v3363_v12 = vadd.f32 %v3347_v26, %v3267_v51  ;;  %v3364_v44 = vadd.f32 %v3348_v42, %v3268_v7  ;;  %v3366_v56 = vadd.f32 %v3350_v6, %v3270_v55 }
0x11d7   :  { %v3365_v40 = vadd.f32 %v3349_v25, %v3269_v47  ;;  %v3368_v30 = vadd.f32 %v3352_v2, %v3272_v36  ;;  %v3367_v15 = vadd.f32 %v3351_v27, %v3271_v16  ;;  %v3369_v37 = vadd.f32 %v3353_v54, %v3273_v60 }
0x11d8   :  { %5651 = vtanh.f32 %v3363_v12  ;;  %v4653_v22 = vmul.f32 -1.442695, %v3362_v63  ;;  %v4654_v23 = vmul.f32 -1.442695, %v3363_v12  ;;  %v4655_v33 = vmul.f32 -1.442695, %v3364_v44 }
0x11d9   :  { %5653 = vtanh.f32 %v3364_v44  ;;  %v4657_v20 = vmul.f32 -1.442695, %v3366_v56  ;;  %v4656_v10 = vmul.f32 -1.442695, %v3365_v40  ;;  %v4659_v24 = vmul.f32 -1.442695, %v3368_v30 }
0x11da   :  { %5655 = vtanh.f32 %v3366_v56  ;;  %v4658_v5 = vmul.f32 -1.442695, %v3367_v15  ;;  %v4660_v26 = vmul.f32 -1.442695, %v3369_v37 }
0x11db   :  { %5657 = vtanh.f32 %v3365_v40 }
0x11dc   :  { %5659 = vtanh.f32 %v3368_v30 }
0x11dd   :  { %5661 = vtanh.f32 %v3367_v15 }
0x11e0   :  { %v5650_v46 = vpop.eup %5649 }
0x11e1   :  { %3442 = vrot.lane.b32.xlu0 %v5650_v46, %s5838_s16 }
0x11e2   :  { %v5652_v31 = vpop.eup %5651 }
0x11e3   :  { %v5654_v38 = vpop.eup %5653 }
0x11e4   :  { %3446 = vrot.lane.b32.xlu1 %v5654_v38, %s5838_s16  ;;  %v5656_v9 = vpop.eup %5655 }
0x11e5   :  { %3444 = vrot.lane.b32.xlu0 %v5652_v31, %s5838_s16  ;;  %v5658_v28 = vpop.eup %5657 }
0x11e6   :  { %v5660_v35 = vpop.eup %5659 }
0x11e7   :  { %v5662_v43 = vpop.eup %5661 }
0x11e8   :  { %3448 = vrot.lane.b32.xlu1 %v5658_v28, %s5838_s16 }
0x11e9   :  { %3450 = vrot.lane.b32.xlu0 %v5656_v9, %s5838_s16 }
0x11ec   :  { %3452 = vrot.lane.b32.xlu1 %v5662_v43, %s5838_s16 }
0x11ed   :  { %3454 = vrot.lane.b32.xlu0 %v5660_v35, %s5838_s16 }
0x11f4   :  { %v3124_v49 = vpop.f32.mrb[12].mxu0 }
0x11f5   :  { %v4986_v39 = vpop.f32.mrb[13].mxu0  ;;  %v3125_v61 = vadd.f32 %v6630_v57, %v3124_v49 }
0x11f7   :  { %5663 = vtanh.f32 %v3125_v61  ;;  %v4651_v32 = vmul.f32 -1.442695, %v3125_v61 }
0x11f8   :  { %5665 = vtanh.f32 %v3369_v37 }
0x11f9   :  { %5667 = vpow2.f32 %v4653_v22 }
0x11fa   :  { %5669 = vpow2.f32 %v4654_v23 }
0x11fb   :  { %5671 = vpow2.f32 %v4655_v33 }
0x11fc   :  { %5673 = vpow2.f32 %v4657_v20 }
0x11fd   :  { %5675 = vpow2.f32 %v4656_v10 }
0x11fe   :  { %5677 = vpow2.f32 %v4659_v24 }
0x1201   :  { %v5664_v57 = vpop.eup %5663 }
0x1202   :  { %v5666_v14 = vpop.eup %5665  ;;  %3137 = vrot.lane.b32.xlu0 %v5664_v57, %s5838_s16 }
0x1203   :  { %3456 = vrot.lane.b32.xlu1 %v5666_v14, %s5838_s16  ;;  %v5668_v19 = vpop.eup %5667 }
0x1204   :  { %v3394_v41 = vadd.f32 1.0, %v5668_v19  ;;  %v5670_v51 = vpop.eup %5669 }
0x1205   :  { %v5672_v63 = vpop.eup %5671  ;;  %v3395_v42 = vadd.f32 1.0, %v5670_v51 }
0x1206   :  { %5679 = vrcp.f32 %v3394_v41  ;;  %v5674_v49 = vpop.eup %5673  ;;  %v3396_v7 = vadd.f32 1.0, %v5672_v63 }
0x1207   :  { %5681 = vpow2.f32 %v4658_v5  ;;  %v5676_v39 = vpop.eup %5675  ;;  %v3398_v12 = vadd.f32 1.0, %v5674_v49 }
0x1208   :  { %5683 = vpow2.f32 %v4651_v32  ;;  %v5678_v6 = vpop.eup %5677  ;;  %v3397_v44 = vadd.f32 1.0, %v5676_v39 }
0x1209   :  { %5685 = vpow2.f32 %v4660_v26  ;;  %v3400_v56 = vadd.f32 1.0, %v5678_v6 }
0x120a   :  { %5687 = vrcp.f32 %v3395_v42 }
0x120b   :  { %5689 = vrcp.f32 %v3396_v7 }
0x120c   :  { %5691 = vrcp.f32 %v3398_v12 }
0x120d   :  { %5693 = vrcp.f32 %v3397_v44 }
0x120e   :  { %5695 = vrcp.f32 %v3400_v56 }
0x1210   :  { %v6965_v55 = vpop.eup %5679 }
0x1211   :  { %v5682_v47 = vpop.eup %5681  ;;  %v3426_v26 = vmul.f32 %v6965_v55, %v6840_v45 }
0x1212   :  { %v5684_v46 = vpop.eup %5683  ;;  %v3399_v36 = vadd.f32 1.0, %v5682_v47 }
0x1213   :  { %v5686_v27 = vpop.eup %5685  ;;  %v3131_v40 = vadd.f32 1.0, %v5684_v46 }
0x1214   :  { %5697 = vrcp.f32 %v3399_v36  ;;  %v3401_v16 = vadd.f32 1.0, %v5686_v27  ;;  %v6969_v30 = vpop.eup %5687 }
0x1215   :  { %v6971_v15 = vpop.eup %5689  ;;  %5699 = vrcp.f32 %v3131_v40  ;;  %v3427_v42 = vmul.f32 %v6969_v30, %v6847_v53 }
0x1216   :  { %5701 = vrcp.f32 %v3401_v16  ;;  %v6976_v31 = vpop.eup %5691  ;;  %v3428_v49 = vmul.f32 %v6971_v15, %v6849_v18 }
0x1217   :  { %v6979_v9 = vpop.eup %5693  ;;  %v3430_v45 = vmul.f32 %v6976_v31, %v6857_v8 }
0x1218   :  { %v6984_v57 = vpop.eup %5695  ;;  %v3429_v53 = vmul.f32 %v6979_v9, %v6860_v48 }
0x1219   :  { %v3432_v56 = vmul.f32 %v6984_v57, %v6868_v13 }
0x121e   :  { %v6987_v22 = vpop.eup %5697 }
0x121f   :  { %v6992_v19 = vpop.eup %5699  ;;  %v3431_v8 = vmul.f32 %v6987_v22, %v6870_v50 }
0x1220   :  { %v6995_v24 = vpop.eup %5701  ;;  %v3135_v40 = vmul.f32 %v6992_v19, %v6886_v52 }
0x1221   :  { %v3433_v13 = vmul.f32 %v6995_v24, %v6876_v58 }
0x1253   :  { %v3443_v25 = vpop.permute.xlu0 %3442 }
0x1254   :  { %v3466_v2 = vmul.f32 %v6965_v55, %v3443_v25 }
0x1256   :  { %3482 = vrot.lane.b32.xlu1 %v3466_v2, %s5839_s21  ;;  %v3447_v60 = vpop.permute.xlu1 %3446 }
0x1257   :  { %v3445_v54 = vpop.permute.xlu0 %3444  ;;  %v3468_v37 = vmul.f32 %v6971_v15, %v3447_v60 }
0x1258   :  { %v3467_v61 = vmul.f32 %v6969_v30, %v3445_v54 }
0x1259   :  { %3486 = vrot.lane.b32.xlu0 %v3468_v37, %s5839_s21 }
0x125a   :  { %3484 = vrot.lane.b32.xlu1 %v3467_v61, %s5839_s21  ;;  %v3449_v28 = vpop.permute.xlu1 %3448 }
0x125b   :  { %v3451_v38 = vpop.permute.xlu0 %3450  ;;  %v3469_v43 = vmul.f32 %v6979_v9, %v3449_v28 }
0x125c   :  { %v3470_v35 = vmul.f32 %v6976_v31, %v3451_v38 }
0x125d   :  { %3488 = vrot.lane.b32.xlu0 %v3469_v43, %s5839_s21 }
0x125e   :  { %3490 = vrot.lane.b32.xlu1 %v3470_v35, %s5839_s21  ;;  %v3453_v23 = vpop.permute.xlu1 %3452 }
0x125f   :  { %v3455_v14 = vpop.permute.xlu0 %3454  ;;  %v3471_v20 = vmul.f32 %v6987_v22, %v3453_v23 }
0x1260   :  { %v3472_v33 = vmul.f32 %v6984_v57, %v3455_v14 }
0x1261   :  { %3492 = vrot.lane.b32.xlu0 %v3471_v20, %s5839_s21 }
0x1262   :  { %3494 = vrot.lane.b32.xlu1 %v3472_v33, %s5839_s21 }
0x1274   :  { %v3138_v10 = vpop.permute.xlu0 %3137 }
0x1275   :  { %v3457_v41 = vpop.permute.xlu1 %3456  ;;  %v3140_v5 = vmul.f32 %v6992_v19, %v3138_v10 }
0x1276   :  { %v3473_v32 = vmul.f32 %v6995_v24, %v3457_v41 }
0x1277   :  { %3142 = vrot.lane.b32.xlu1 %v3140_v5, %s5839_s21 }
0x1278   :  { %3496 = vrot.lane.b32.xlu0 %v3473_v32, %s5839_s21 }
0x12c8   :  { %v3483_v51 = vpop.permute.xlu1 %3482 }
0x12c9   :  { %v7003_v63 = vadd.f32 %v3483_v51, %v3426_v26 }
0x12cb   :  { %5703 = vtanh.f32 %v7003_v63  ;;  %v3487_v39 = vpop.permute.xlu0 %3486 }
0x12cc   :  { %v3485_v7 = vpop.permute.xlu1 %3484  ;;  %v7012_v12 = vadd.f32 %v3487_v39, %v3428_v49 }
0x12cd   :  { %v7010_v6 = vadd.f32 %v3485_v7, %v3427_v42 }
0x12cf   :  { %5705 = vtanh.f32 %v7010_v6  ;;  %v3489_v47 = vpop.permute.xlu0 %3488 }
0x12d0   :  { %5707 = vtanh.f32 %v7012_v12  ;;  %v3491_v44 = vpop.permute.xlu1 %3490  ;;  %v7023_v2 = vadd.f32 %v3489_v47, %v3429_v53 }
0x12d1   :  { %v7020_v18 = vadd.f32 %v3491_v44, %v3430_v45 }
0x12d3   :  { %5709 = vtanh.f32 %v7020_v18  ;;  %v3493_v48 = vpop.permute.xlu0 %3492 }
0x12d4   :  { %5711 = vtanh.f32 %v7023_v2  ;;  %v3495_v46 = vpop.permute.xlu1 %3494  ;;  %v7033_v27 = vadd.f32 %v3493_v48, %v3431_v8 }
0x12d5   :  { %v5704_v25 = vpop.eup %5703  ;;  %v7031_v36 = vadd.f32 %v3495_v46, %v3432_v56 }
0x12d6   :  { %3530 = vrot.lane.b32.xlu0 %v5704_v25, %s5838_s16 }
0x12d7   :  { %5713 = vtanh.f32 %v7031_v36 }
0x12d8   :  { %5715 = vtanh.f32 %v7033_v27 }
0x12d9   :  { %v5706_v54 = vpop.eup %5705 }
0x12da   :  { %v5708_v61 = vpop.eup %5707  ;;  %3532 = vrot.lane.b32.xlu0 %v5706_v54, %s5838_s16 }
0x12db   :  { %3534 = vrot.lane.b32.xlu1 %v5708_v61, %s5838_s16 }
0x12dd   :  { %v5710_v52 = vpop.eup %5709 }
0x12de   :  { %v5712_v38 = vpop.eup %5711  ;;  %3538 = vrot.lane.b32.xlu0 %v5710_v52, %s5838_s16 }
0x12df   :  { %3536 = vrot.lane.b32.xlu1 %v5712_v38, %s5838_s16 }
0x12e1   :  { %v5714_v58 = vpop.eup %5713 }
0x12e2   :  { %v5716_v28 = vpop.eup %5715  ;;  %3542 = vrot.lane.b32.xlu0 %v5714_v58, %s5838_s16 }
0x12e3   :  { %3540 = vrot.lane.b32.xlu1 %v5716_v28, %s5838_s16  ;;  %v3806_v28 = vld [vmem:[%s7603_s0 + $0x27] sm:$0x1] }
0x12e9   :  { %v3143_v16 = vpop.permute.xlu1 %3142 }
0x12ea   :  { %v3497_v60 = vpop.permute.xlu0 %3496  ;;  %v7041_v50 = vadd.f32 %v3143_v16, %v3135_v40 }
0x12eb   :  { %v7043_v37 = vadd.f32 %v3497_v60, %v3433_v13 }
0x12ec   :  { %5717 = vtanh.f32 %v7041_v50 }
0x12ed   :  { %5719 = vtanh.f32 %v7043_v37 }
0x12f6   :  { %v5718_v35 = vpop.eup %5717 }
0x12f7   :  { %v5720_v43 = vpop.eup %5719  ;;  %3148 = vrot.lane.b32.xlu0 %v5718_v35, %s5838_s16 }
0x12f8   :  { %3544 = vrot.lane.b32.xlu1 %v5720_v43, %s5838_s16 }
0x1348   :  { %v3531_v14 = vpop.permute.xlu0 %3530 }
0x1349   :  { %v3554_v41 = vmul.f32 %v6965_v55, %v3531_v14  ;;  %v3805_v14 = vld [vmem:[%s7603_s0 + $0x1f] sm:$0x1] }
0x134c   :  { %v3533_v23 = vpop.permute.xlu0 %3532 }
0x134d   :  { %v3535_v33 = vpop.permute.xlu1 %3534  ;;  %v3555_v20 = vmul.f32 %v6969_v30, %v3533_v23 }
0x134e   :  { %v3556_v10 = vmul.f32 %v6971_v15, %v3535_v33 }
0x134f   :  { %v3570_v5 = vrot.slane %v3555_v20, 7 }
0x1350   :  { %v3539_v32 = vpop.permute.xlu0 %3538  ;;  %v3572_v26 = vrot.slane %v3556_v10, 6  ;;  %v3808_v10 = vld [vmem:[%s7603_s0 + $0x37] sm:$0x1] }
0x1351   :  { %v3571_v51 = vsel %vm343_vm1, %v3570_v5, %v3554_v41  ;;  %v3537_v42 = vpop.permute.xlu1 %3536  ;;  %v3558_v49 = vmul.f32 %v6976_v31, %v3539_v32  ;;  %v3807_v32 = vld [vmem:[%s7603_s0 + $0x2f] sm:$0x1] }
0x1352   :  { %v3557_v7 = vmul.f32 %v6979_v9, %v3537_v42  ;;  %v3573_v39 = vsel %vm346_vm2, %v3572_v26, %v3571_v51 }
0x1353   :  { %v3576_v45 = vrot.slane %v3558_v49, 4  ;;  %v3809_v49 = vld [vmem:[%s7603_s0 + $0x3f] sm:$0x1] }
0x1354   :  { %v3574_v25 = vrot.slane %v3557_v7, 5  ;;  %v3543_v53 = vpop.permute.xlu0 %3542  ;;  %v7116_v7 = vld [vmem:[%s7605_s3] ss:$0 sm:$0xff] }
0x1355   :  { %v3541_v30 = vpop.permute.xlu1 %3540  ;;  %v3560_v15 = vmul.f32 %v6984_v57, %v3543_v53 }
0x1356   :  { %v3575_v55 = vsel %vm349_vm3, %v3574_v25, %v3573_v39  ;;  %v3559_v44 = vmul.f32 %v6987_v22, %v3541_v30 }
0x1357   :  { %v3577_v47 = vsel %vm352_vm4, %v3576_v45, %v3575_v55  ;;  %v3580_v56 = vrot.slane %v3560_v15, 2 }
0x1358   :  { %v3578_v8 = vrot.slane %v3559_v44, 3 }
0x135a   :  { %v3579_v48 = vsel %vm355_vm5, %v3578_v8, %v3577_v47 }
0x135b   :  { %v3581_v13 = vsel %vm358_vm6, %v3580_v56, %v3579_v48 }
0x1369   :  { %v3149_v46 = vpop.permute.xlu0 %3148 }
0x136a   :  { %v3545_v31 = vpop.permute.xlu1 %3544  ;;  %v7067_v9 = vmul.f32 %v6992_v19, %v3149_v46 }
0x136b   :  { %v3561_v40 = vmul.f32 %v6995_v24, %v3545_v31  ;;  %v3802_v24 = vld [vmem:[%s7603_s0 + $0x7] sm:$0x1] }
0x136c   :  { %3587 = vrot.lane.b32.xlu0 %v7067_v9, %s5838_s16 }
0x136d   :  { %v3582_v57 = vrot.slane %v3561_v40, 1 }
0x136f   :  { %v3583_v22 = vsel %vm361_vm7, %v3582_v57, %v3581_v13 }
0x1370   :  { %3584 = vrot.lane.b32.xlu1 %v3583_v22, %s5839_s21 }
0x13de   :  { %v3588_v16 = vpop.permute.xlu0 %3587 }
0x13e2   :  { %v3585_v54 = vpop.permute.xlu1 %3584 }
0x13e3   :  { %5026 = vmatmul.mubr.msk.f32.vlgmr.msra.gmra.mrb[14].mxu0 %vm44_vm8, %v3585_v54  ;;  %v3590_v19 = vsel %vm44_vm8, %v3585_v54, %v3588_v16 }
0x13e4   :  { %5015 = vmatmul.mubr.msk.f32.vlgmr.msra.gmra.mrb[12].mxu1 %vm373_vm9, %v3590_v19  ;;  %5201 = vmatpush3.bf16.msra.mxu0 %v6019_v62 }
0x13e5   :  { %5202 = vmatprep.subr.bf16.mxu0 %v5835_v0  ;;  %5044 = vmatprep.mubr.msk.f32.mxu0 %vm5836_vm0, %v5837_v4 }
0x13e8   :  { %5204 = vmatpush3.bf16.msra.mxu0 %v6026_v3  ;;  %v3803_v3 = vld [vmem:[%s7603_s0 + $0xf] sm:$0x1] }
0x13e9   :  { %5205 = vmatprep.subr.bf16.mxu0 %v5835_v0 }
0x13ec   :  { %5207 = vmatpush3.bf16.msra.mxu0 %v6038_v11 }
0x13ed   :  { %5208 = vmatprep.subr.bf16.mxu0 %v5835_v0  ;;  %v3804_v0 = vld [vmem:[%s7603_s0 + $0x17] sm:$0x1] }
0x13f0   :  { %5210 = vmatpush3.bf16.msra.mxu0 %v6048_v17 }
0x14b6   :  { %v3878_v62 = vpop.f32.mrb[14].mxu0 }
0x14b7   :  { %v5027_v60 = vpop.f32.mrb[15].mxu0  ;;  %v3660_v61 = vpop.f32.mrb[12].mxu1  ;;  %v3898_v52 = vadd.f32 %v3878_v62, %v3802_v24  ;;  %v3883_v4 = vrot.slane %v3878_v62, 1  ;;  %v3884_v11 = vrot.slane %v3878_v62, 2  ;;  %v3886_v17 = vrot.slane %v3878_v62, 4 }
0x14b8   :  { %v5016_v38 = vpop.f32.mrb[13].mxu1  ;;  %v3885_v35 = vrot.slane %v3878_v62, 3  ;;  %v3888_v23 = vrot.slane %v3878_v62, 6  ;;  %v3887_v41 = vrot.slane %v3878_v62, 5  ;;  %v3889_v51 = vrot.slane %v3878_v62, 7 }
0x14b9   :  { %5721 = vtanh.f32 %v3898_v52  ;;  %v3899_v58 = vadd.f32 %v3883_v4, %v3803_v3  ;;  %v3900_v43 = vadd.f32 %v3884_v11, %v3804_v0  ;;  %v3902_v33 = vadd.f32 %v3886_v17, %v3806_v28 }
0x14ba   :  { %v3901_v5 = vadd.f32 %v3885_v35, %v3805_v14  ;;  %v3904_v26 = vadd.f32 %v3888_v23, %v3808_v10  ;;  %v3903_v42 = vadd.f32 %v3887_v41, %v3807_v32  ;;  %v3661_v39 = vadd.f32 %v7116_v7, %v3660_v61 }
0x14bb   :  { %5723 = vtanh.f32 %v3899_v58  ;;  %v3905_v45 = vadd.f32 %v3889_v51, %v3809_v49  ;;  %v4664_v8 = vmul.f32 -1.442695, %v3898_v52  ;;  %v4665_v46 = vmul.f32 -1.442695, %v3899_v58 }
0x14bc   :  { %5725 = vtanh.f32 %v3900_v43  ;;  %v4666_v31 = vmul.f32 -1.442695, %v3900_v43  ;;  %v4668_v48 = vmul.f32 -1.442695, %v3902_v33  ;;  %v4667_v13 = vmul.f32 -1.442695, %v3901_v5 }
0x14bd   :  { %5727 = vtanh.f32 %v3902_v33  ;;  %v4670_v57 = vmul.f32 -1.442695, %v3904_v26  ;;  %v4669_v16 = vmul.f32 -1.442695, %v3903_v42  ;;  %v4662_v54 = vmul.f32 -1.442695, %v3661_v39 }
0x14be   :  { %5729 = vtanh.f32 %v3901_v5  ;;  %v4671_v19 = vmul.f32 -1.442695, %v3905_v45 }
0x14bf   :  { %5731 = vtanh.f32 %v3904_v26 }
0x14c0   :  { %5733 = vtanh.f32 %v3903_v42 }
0x14c1   :  { %5735 = vtanh.f32 %v3661_v39 }
0x14c2   :  { %5737 = vtanh.f32 %v3905_v45 }
0x14c3   :  { %v5722_v20 = vpop.eup %5721  ;;  %5739 = vpow2.f32 %v4664_v8 }
0x14c4   :  { %3978 = vrot.lane.b32.xlu1 %v5722_v20, %s5838_s16  ;;  %5741 = vpow2.f32 %v4665_v46 }
0x14c5   :  { %v5724_v25 = vpop.eup %5723  ;;  %5743 = vpow2.f32 %v4666_v31 }
0x14c6   :  { %v5726_v53 = vpop.eup %5725  ;;  %5745 = vpow2.f32 %v4668_v48 }
0x14c7   :  { %3982 = vrot.lane.b32.xlu0 %v5726_v53, %s5838_s16  ;;  %v5728_v30 = vpop.eup %5727  ;;  %5747 = vpow2.f32 %v4667_v13 }
0x14c8   :  { %3980 = vrot.lane.b32.xlu1 %v5724_v25, %s5838_s16  ;;  %v5730_v15 = vpop.eup %5729  ;;  %5749 = vpow2.f32 %v4670_v57 }
0x14c9   :  { %v5732_v55 = vpop.eup %5731 }
0x14ca   :  { %v5734_v44 = vpop.eup %5733 }
0x14cb   :  { %3984 = vrot.lane.b32.xlu0 %v5730_v15, %s5838_s16  ;;  %v5736_v47 = vpop.eup %5735 }
0x14cc   :  { %3986 = vrot.lane.b32.xlu1 %v5728_v30, %s5838_s16  ;;  %v5738_v56 = vpop.eup %5737 }
0x14cd   :  { %v5740_v40 = vpop.eup %5739 }
0x14ce   :  { %v3930_v22 = vadd.f32 1.0, %v5740_v40  ;;  %v5742_v24 = vpop.eup %5741 }
0x14cf   :  { %3988 = vrot.lane.b32.xlu0 %v5734_v44, %s5838_s16  ;;  %v5744_v62 = vpop.eup %5743  ;;  %v3931_v60 = vadd.f32 1.0, %v5742_v24 }
0x14d0   :  { %3990 = vrot.lane.b32.xlu1 %v5732_v55, %s5838_s16  ;;  %5751 = vrcp.f32 %v3930_v22  ;;  %v5746_v61 = vpop.eup %5745  ;;  %v3932_v52 = vadd.f32 1.0, %v5744_v62 }
0x14d1   :  { %5753 = vpow2.f32 %v4669_v16  ;;  %v5748_v38 = vpop.eup %5747  ;;  %v3934_v3 = vadd.f32 1.0, %v5746_v61 }
0x14d2   :  { %5755 = vpow2.f32 %v4662_v54  ;;  %v5750_v4 = vpop.eup %5749  ;;  %v3933_v17 = vadd.f32 1.0, %v5748_v38 }
0x14d3   :  { %3992 = vrot.lane.b32.xlu0 %v5738_v56, %s5838_s16  ;;  %5757 = vpow2.f32 %v4671_v19  ;;  %v3936_v35 = vadd.f32 1.0, %v5750_v4 }
0x14d4   :  { %3673 = vrot.lane.b32.xlu1 %v5736_v47, %s5838_s16  ;;  %5759 = vrcp.f32 %v3931_v60 }
0x14d5   :  { %5761 = vrcp.f32 %v3932_v52 }
0x14d6   :  { %5763 = vrcp.f32 %v3934_v3 }
0x14d7   :  { %5765 = vrcp.f32 %v3933_v17 }
0x14d8   :  { %5767 = vrcp.f32 %v3936_v35 }
0x14da   :  { %v7127_v11 = vpop.eup %5751 }
0x14db   :  { %v5754_v58 = vpop.eup %5753  ;;  %v3962_v57 = vmul.f32 %v7127_v11, %v7003_v63 }
0x14dc   :  { %v5756_v43 = vpop.eup %5755  ;;  %v3935_v14 = vadd.f32 1.0, %v5754_v58 }
0x14dd   :  { %v5758_v23 = vpop.eup %5757  ;;  %v3667_v33 = vadd.f32 1.0, %v5756_v43 }
0x14de   :  { %5769 = vrcp.f32 %v3935_v14  ;;  %v3937_v20 = vadd.f32 1.0, %v5758_v23  ;;  %v7131_v10 = vpop.eup %5759 }
0x14df   :  { %v7133_v5 = vpop.eup %5761  ;;  %5771 = vrcp.f32 %v3667_v33  ;;  %v3963_v54 = vmul.f32 %v7131_v10, %v7010_v6 }
0x14e0   :  { %5773 = vrcp.f32 %v3937_v20  ;;  %v7138_v42 = vpop.eup %5763  ;;  %v3964_v19 = vmul.f32 %v7133_v5, %v7012_v12 }
0x14e1   :  { %v7141_v39 = vpop.eup %5765  ;;  %v3966_v52 = vmul.f32 %v7138_v42, %v7020_v18 }
0x14e2   :  { %v7146_v30 = vpop.eup %5767  ;;  %v3965_v63 = vmul.f32 %v7141_v39, %v7023_v2 }
0x14e3   :  { %v3968_v12 = vmul.f32 %v7146_v30, %v7031_v36 }
0x14e8   :  { %v7149_v55 = vpop.eup %5769 }
0x14e9   :  { %v7154_v8 = vpop.eup %5771  ;;  %v3967_v17 = vmul.f32 %v7149_v55, %v7033_v27 }
0x14ea   :  { %v7157_v31 = vpop.eup %5773  ;;  %v3671_v2 = vmul.f32 %v7154_v8, %v7041_v50 }
0x14eb   :  { %v3969_v43 = vmul.f32 %v7157_v31, %v7043_v37 }
0x1536   :  { %v3979_v0 = vpop.permute.xlu1 %3978 }
0x1537   :  { %v4002_v28 = vmul.f32 %v7127_v11, %v3979_v0 }
0x1539   :  { %4018 = vrot.lane.b32.xlu0 %v4002_v28, %s5839_s21  ;;  %v3983_v32 = vpop.permute.xlu0 %3982 }
0x153a   :  { %v3981_v41 = vpop.permute.xlu1 %3980  ;;  %v4004_v51 = vmul.f32 %v7133_v5, %v3983_v32 }
0x153b   :  { %v4003_v26 = vmul.f32 %v7131_v10, %v3981_v41 }
0x153c   :  { %4022 = vrot.lane.b32.xlu1 %v4004_v51, %s5839_s21 }
0x153d   :  { %4020 = vrot.lane.b32.xlu0 %v4003_v26, %s5839_s21  ;;  %v3985_v45 = vpop.permute.xlu0 %3984 }
0x153e   :  { %v3987_v49 = vpop.permute.xlu1 %3986  ;;  %v4005_v53 = vmul.f32 %v7141_v39, %v3985_v45 }
0x153f   :  { %v4006_v25 = vmul.f32 %v7138_v42, %v3987_v49 }
0x1540   :  { %4024 = vrot.lane.b32.xlu1 %v4005_v53, %s5839_s21 }
0x1541   :  { %4026 = vrot.lane.b32.xlu0 %v4006_v25, %s5839_s21  ;;  %v3989_v44 = vpop.permute.xlu0 %3988 }
0x1542   :  { %v3991_v15 = vpop.permute.xlu1 %3990  ;;  %v4007_v56 = vmul.f32 %v7149_v55, %v3989_v44 }
0x1543   :  { %v4008_v47 = vmul.f32 %v7146_v30, %v3991_v15 }
0x1544   :  { %4028 = vrot.lane.b32.xlu1 %v4007_v56, %s5839_s21 }
0x1545   :  { %4030 = vrot.lane.b32.xlu0 %v4008_v47, %s5839_s21  ;;  %v3993_v48 = vpop.permute.xlu0 %3992 }
0x1546   :  { %v3674_v46 = vpop.permute.xlu1 %3673  ;;  %v4009_v13 = vmul.f32 %v7157_v31, %v3993_v48 }
0x1547   :  { %v3676_v40 = vmul.f32 %v7154_v8, %v3674_v46 }
0x1548   :  { %4032 = vrot.lane.b32.xlu1 %v4009_v13, %s5839_s21 }
0x1549   :  { %3678 = vrot.lane.b32.xlu0 %v3676_v40, %s5839_s21 }
0x15ab   :  { %v4019_v22 = vpop.permute.xlu0 %4018 }
0x15ac   :  { %v4042_v16 = vadd.f32 %v4019_v22, %v3962_v57 }
0x15ae   :  { %5775 = vtanh.f32 %v4042_v16  ;;  %v4023_v62 = vpop.permute.xlu1 %4022 }
0x15af   :  { %v4021_v24 = vpop.permute.xlu0 %4020  ;;  %v4044_v61 = vadd.f32 %v4023_v62, %v3964_v19 }
0x15b0   :  { %v4043_v60 = vadd.f32 %v4021_v24, %v3963_v54 }
0x15b2   :  { %5777 = vtanh.f32 %v4043_v60  ;;  %v4025_v3 = vpop.permute.xlu1 %4024 }
0x15b3   :  { %5779 = vtanh.f32 %v4044_v61  ;;  %v4027_v4 = vpop.permute.xlu0 %4026  ;;  %v4045_v6 = vadd.f32 %v4025_v3, %v3965_v63 }
0x15b4   :  { %v4046_v0 = vadd.f32 %v4027_v4, %v3966_v52 }
0x15b6   :  { %5781 = vtanh.f32 %v4046_v0  ;;  %v4029_v58 = vpop.permute.xlu1 %4028 }
0x15b7   :  { %5783 = vtanh.f32 %v4045_v6  ;;  %v4031_v18 = vpop.permute.xlu0 %4030  ;;  %v4047_v35 = vadd.f32 %v4029_v58, %v3967_v17  ;;  %v476_v17 = vlaneseq }
0x15b8   :  { %v5776_v38 = vpop.eup %5775  ;;  %v4048_v28 = vadd.f32 %v4031_v18, %v3968_v12 }
0x15b9   :  { %4066 = vrot.lane.b32.xlu1 %v5776_v38, %s5838_s16 }
0x15ba   :  { %5785 = vtanh.f32 %v4048_v28  ;;  %v4033_v33 = vpop.permute.xlu1 %4032 }
0x15bb   :  { %5787 = vtanh.f32 %v4047_v35  ;;  %v3679_v14 = vpop.permute.xlu0 %3678  ;;  %v4049_v41 = vadd.f32 %v4033_v33, %v3969_v43  ;;  %v477_v35 = vshrl.u32 %v476_v17, 7 }
0x15bc   :  { %v5778_v23 = vpop.eup %5777  ;;  %v7182_v36 = vadd.f32 %v3679_v14, %v3671_v2 }
0x15bd   :  { %v5780_v20 = vpop.eup %5779  ;;  %4068 = vrot.lane.b32.xlu1 %v5778_v23, %s5838_s16 }
0x15be   :  { %4070 = vrot.lane.b32.xlu0 %v5780_v20, %s5838_s16  ;;  %5789 = vtanh.f32 %v7182_v36  ;;  %v7225_v20 = vsub.s32 0, %v477_v35 }
0x15bf   :  { %5791 = vtanh.f32 %v4049_v41 }
0x15c0   :  { %v5782_v27 = vpop.eup %5781 }
0x15c1   :  { %v5784_v50 = vpop.eup %5783  ;;  %4074 = vrot.lane.b32.xlu1 %v5782_v27, %s5838_s16 }
0x15c2   :  { %4072 = vrot.lane.b32.xlu0 %v5784_v50, %s5838_s16 }
0x15c4   :  { %v5786_v37 = vpop.eup %5785 }
0x15c5   :  { %v5788_v32 = vpop.eup %5787  ;;  %4078 = vrot.lane.b32.xlu1 %v5786_v37, %s5838_s16 }
0x15c6   :  { %4076 = vrot.lane.b32.xlu0 %v5788_v32, %s5838_s16 }
0x15c8   :  { %v5790_v26 = vpop.eup %5789 }
0x15c9   :  { %v5792_v51 = vpop.eup %5791  ;;  %3684 = vrot.lane.b32.xlu1 %v5790_v26, %s5838_s16 }
0x15ca   :  { %4080 = vrot.lane.b32.xlu0 %v5792_v51, %s5838_s16 }
0x162b   :  { %v4067_v49 = vpop.permute.xlu1 %4066 }
0x162c   :  { %v4090_v44 = vmul.f32 %v7127_v11, %v4067_v49 }
0x162f   :  { %v4069_v45 = vpop.permute.xlu1 %4068 }
0x1630   :  { %v4071_v25 = vpop.permute.xlu0 %4070  ;;  %v4091_v53 = vmul.f32 %v7131_v10, %v4069_v45 }
0x1631   :  { %v4092_v15 = vmul.f32 %v7133_v5, %v4071_v25 }
0x1632   :  { %v4106_v47 = vrot.slane %v4091_v53, 7 }
0x1633   :  { %v4075_v56 = vpop.permute.xlu1 %4074  ;;  %v4108_v46 = vrot.slane %v4092_v15, 6 }
0x1634   :  { %v4107_v48 = vsel %vm343_vm1, %v4106_v47, %v4090_v44  ;;  %v4073_v40 = vpop.permute.xlu0 %4072  ;;  %v4094_v13 = vmul.f32 %v7138_v42, %v4075_v56 }
0x1635   :  { %v4093_v57 = vmul.f32 %v7141_v39, %v4073_v40  ;;  %v4109_v22 = vsel %vm346_vm2, %v4108_v46, %v4107_v48 }
0x1636   :  { %v4112_v16 = vrot.slane %v4094_v13, 4 }
0x1637   :  { %v4110_v54 = vrot.slane %v4093_v57, 5  ;;  %v4079_v19 = vpop.permute.xlu1 %4078 }
0x1638   :  { %v4077_v10 = vpop.permute.xlu0 %4076  ;;  %v4096_v5 = vmul.f32 %v7146_v30, %v4079_v19 }
0x1639   :  { %v4111_v11 = vsel %vm349_vm3, %v4110_v54, %v4109_v22  ;;  %v4095_v24 = vmul.f32 %v7149_v55, %v4077_v10 }
0x163a   :  { %v4113_v62 = vsel %vm352_vm4, %v4112_v16, %v4111_v11  ;;  %v4116_v60 = vrot.slane %v4096_v5, 2 }
0x163b   :  { %v4114_v61 = vrot.slane %v4095_v24, 3  ;;  %v3685_v52 = vpop.permute.xlu1 %3684 }
0x163c   :  { %v4081_v42 = vpop.permute.xlu0 %4080  ;;  %v7205_v39 = vmul.f32 %v7154_v8, %v3685_v52  ;;  %v5840_v8 = vmov 1966171168  }
0x163d   :  { %v4115_v38 = vsel %vm355_vm5, %v4114_v61, %v4113_v62  ;;  %v4097_v63 = vmul.f32 %v7157_v31, %v4081_v42  ;;  %v474_v12 = vunpack.c.l.s4 %v5840_v8 }
0x163e   :  { %v4117_v4 = vsel %vm358_vm6, %v4116_v60, %v4115_v38  ;;  %4123 = vrot.lane.b32.xlu1 %v7205_v39, %s5838_s16 }
0x163f   :  { %v4118_v30 = vrot.slane %v4097_v63, 1  ;;  %v475_v28 = vunpack.c.0.s8 %v474_v12 }
0x1641   :  { %v4119_v55 = vsel %vm361_vm7, %v4118_v30, %v4117_v4  ;;  %v7217_v2 = vsub.s32 %v475_v28, %v477_v35 }
0x1642   :  { %4120 = vrot.lane.b32.xlu0 %v4119_v55, %s5839_s21 }
0x1643   :  { %v1016_v43 = vrot.slane %v6404_v21, %v7217_v2  ;;  %v2088_v23 = vrot.slane %v6745_v1, %v7217_v2  ;;  %v3160_v41 = vrot.slane %v7067_v9, %v7217_v2  ;;  %v479_v60 = vrot.slane %v6236_v34, %v7217_v2 }
0x1644   :  { %v1552_v38 = vrot.slane %v6572_v29, %v7217_v2  ;;  %v2624_v55 = vrot.slane %v6909_v59, %v7217_v2  ;;  %v3696_v8 = vrot.slane %v7205_v39, %v7217_v2 }
0x1645   :  { %v1032_v14 = vrot.slane %v1016_v43, %v7217_v2  ;;  %v1024_v50 = vcombine.high %v1016_v43, %v1016_v43  ;;  %v3176_v37 = vrot.slane %v3160_v41, %v7217_v2  ;;  %v2096_v26 = vcombine.high %v2088_v23, %v2088_v23 }
0x1646   :  { %v3168_v45 = vcombine.high %v3160_v41, %v3160_v41  ;;  %v495_v42 = vrot.slane %v479_v60, %v7217_v2  ;;  %v1568_v30 = vrot.slane %v1552_v38, %v7217_v2  ;;  %v1560_v35 = vcombine.high %v1552_v38, %v1552_v38 }
0x1647   :  { %v1061_v27 = vrot.slane %v1032_v14, %v7225_v20  ;;  %v3205_v51 = vrot.slane %v3176_v37, %v7225_v20  ;;  %v1046_v49 = vrot.slane %v1024_v50, %v7217_v2  ;;  %v2118_v53 = vrot.slane %v2096_v26, %v7217_v2 }
0x1648   :  { %v3190_v44 = vrot.slane %v3168_v45, %v7217_v2  ;;  %v1054_v56 = vcombine.high %v1032_v14, %v1032_v14  ;;  %v3198_v13 = vcombine.high %v3176_v37, %v3176_v37  ;;  %v1597_v12 = vrot.slane %v1568_v30, %v7225_v20 }
0x1649   :  { %v1065_v25 = vrot.slane %v1046_v49, %v7225_v20  ;;  %v2137_v15 = vrot.slane %v2118_v53, %v7225_v20  ;;  %v1056_v22 = vcombine.high %v1046_v49, %v1046_v49  ;;  %v2128_v54 = vcombine.high %v2118_v53, %v2118_v53 }
0x164a   :  { %v3209_v47 = vrot.slane %v3190_v44, %v7225_v20  ;;  %v1069_v46 = vrot.slane %v1054_v56, %v7225_v20  ;;  %v3213_v57 = vrot.slane %v3198_v13, %v7225_v20  ;;  %v3200_v10 = vcombine.high %v3190_v44, %v3190_v44 }
0x164b   :  { %v1073_v16 = vrot.slane %v1056_v22, %v7225_v20  ;;  %v2145_v19 = vrot.slane %v2128_v54, %v7225_v20  ;;  %v1582_v41 = vrot.slane %v1560_v35, %v7217_v2  ;;  %v3704_v50 = vcombine.high %v3696_v8, %v3696_v8 }
0x164c   :  { %v3217_v5 = vrot.slane %v3200_v10, %v7225_v20  ;;  %v517_v53 = vcombine.high %v495_v42, %v495_v42 }
0x164d   :  { %v1601_v37 = vrot.slane %v1582_v41, %v7225_v20  ;;  %v1592_v10 = vcombine.high %v1582_v41, %v1582_v41 }
0x164e   :  { %v532_v44 = vrot.slane %v517_v53, %v7225_v20 }
0x16b0   :  { %v4124_v3 = vpop.permute.xlu1 %4123 }
0x16b4   :  { %v4121_v0 = vpop.permute.xlu0 %4120 }
0x16b5   :  { %v4126_v6 = vsel %vm44_vm8, %v4121_v0, %v4124_v3  ;;  %v524_v3 = vrot.slane %v495_v42, %v7225_v20 }
0x16b6   :  { %5045 = vmatmul.mubr.msk.f32.vlgmr.msra.gmra.mrb[16].mxu0 %vm373_vm9, %v4126_v6  ;;  %v2640_v6 = vrot.slane %v2624_v55, %v7217_v2 }
0x1789   :  { %v4196_v31 = vpop.f32.mrb[16].mxu0 }
0x178a   :  { %v4197_v18 = vadd.f32 %v7116_v7, %v4196_v31  ;;  %v5046_v58 = vpop.f32.mrb[17].mxu0  ;;  %v2104_v7 = vrot.slane %v2088_v23, %v7217_v2  ;;  %v487_v31 = vcombine.high %v479_v60, %v479_v60  ;;  %v1545_v60 = vcombine.high %v6572_v29, %v6572_v29 }
0x178b   :  { %v2669_v58 = vrot.slane %v2640_v6, %v7225_v20  ;;  %v3689_v29 = vcombine.high %v7205_v39, %v7205_v39 }
0x178c   :  { %5793 = vtanh.f32 %v4197_v18  ;;  %v2133_v32 = vrot.slane %v2104_v7, %v7225_v20  ;;  %v2126_v48 = vcombine.high %v2104_v7, %v2104_v7  ;;  %v4673_v11 = vmul.f32 -1.442695, %v4197_v18 }
0x178d   :  { %v3712_v18 = vrot.slane %v3696_v8, %v7217_v2  ;;  %v509_v14 = vrot.slane %v487_v31, %v7217_v2  ;;  %v1559_v38 = vrot.slane %v1545_v60, %v7217_v2 }
0x178e   :  { %v2141_v40 = vrot.slane %v2126_v48, %v7225_v20  ;;  %5795 = vpow2.f32 %v4673_v11  ;;  %v2662_v48 = vcombine.high %v2640_v6, %v2640_v6  ;;  %v1609_v11 = vrot.slane %v1592_v10, %v7225_v20 }
0x178f   :  { %v3741_v43 = vrot.slane %v3712_v18, %v7225_v20  ;;  %v528_v7 = vrot.slane %v509_v14, %v7225_v20  ;;  %v3734_v13 = vcombine.high %v3712_v18, %v3712_v18  ;;  %v519_v54 = vcombine.high %v509_v14, %v509_v14 }
0x1790   :  { %v1561_v39 = vcombine.high %v1559_v38, %v1559_v38 }
0x1792   :  { %v1589_v35 = vrot.slane %v1561_v39, %v7217_v2 }
0x1794   :  { %v1617_v14 = vrot.slane %v1589_v35, %v7225_v20 }
0x1796   :  { %v5794_v33 = vpop.eup %5793 }
0x1797   :  { %4209 = vrot.lane.b32.xlu0 %v5794_v33, %s5838_s16  ;;  %v2632_v33 = vcombine.high %v2624_v55, %v2624_v55 }
0x1798   :  { %v5796_v24 = vpop.eup %5795 }
0x1799   :  { %v4203_v62 = vadd.f32 1.0, %v5796_v24 }
0x179b   :  { %1090 = vrot.lane.b32.xlu0 %v1061_v27, %s5839_s21  ;;  %5797 = vrcp.f32 %v4203_v62 }
0x179f   :  { %2162 = vrot.lane.b32.xlu0 %v2133_v32, %s5839_s21  ;;  %v2654_v32 = vrot.slane %v2632_v33, %v7217_v2 }
0x17a1   :  { %v2673_v49 = vrot.slane %v2654_v32, %v7225_v20  ;;  %v2664_v24 = vcombine.high %v2654_v32, %v2654_v32 }
0x17a3   :  { %3234 = vrot.lane.b32.xlu0 %v3205_v51, %s5839_s21  ;;  %v3726_v51 = vrot.slane %v3704_v50, %v7217_v2 }
0x17a5   :  { %v7260_v61 = vpop.eup %5797  ;;  %v3736_v42 = vcombine.high %v3726_v51, %v3726_v51 }
0x17a6   :  { %v4207_v53 = vmul.f32 %v7260_v61, %v7182_v36 }
0x17a7   :  { %1092 = vrot.lane.b32.xlu0 %v1065_v25, %s5839_s21  ;;  %v3745_v25 = vrot.slane %v3726_v51, %v7225_v20 }
0x17ab   :  { %2164 = vrot.lane.b32.xlu0 %v2137_v15, %s5839_s21 }
0x17af   :  { %3236 = vrot.lane.b32.xlu0 %v3209_v47, %s5839_s21  ;;  %v1590_v47 = vcombine.high %v1568_v30, %v1568_v30 }
0x17b3   :  { %1094 = vrot.lane.b32.xlu0 %v1069_v46, %s5839_s21  ;;  %v1605_v46 = vrot.slane %v1590_v47, %v7225_v20  ;;  %v1593_v47 = vcombine.high %v1589_v35, %v1589_v35 }
0x17b7   :  { %2166 = vrot.lane.b32.xlu0 %v2141_v40, %s5839_s21 }
0x17bb   :  { %3238 = vrot.lane.b32.xlu0 %v3213_v57, %s5839_s21  ;;  %v2677_v57 = vrot.slane %v2662_v48, %v7225_v20 }
0x17bf   :  { %1096 = vrot.lane.b32.xlu0 %v1073_v16, %s5839_s21  ;;  %v3749_v16 = vrot.slane %v3734_v13, %v7225_v20 }
0x17c3   :  { %2168 = vrot.lane.b32.xlu0 %v2145_v19, %s5839_s21  ;;  %v536_v19 = vrot.slane %v519_v54, %v7225_v20 }
0x17c7   :  { %3240 = vrot.lane.b32.xlu0 %v3217_v5, %s5839_s21  ;;  %v472_v5 = vcombine.high %v6236_v34, %v6236_v34  ;;  %v2617_v34 = vcombine.high %v6909_v59, %v6909_v59 }
0x17c9   :  { %v486_v62 = vrot.slane %v472_v5, %v7217_v2  ;;  %v2631_v30 = vrot.slane %v2617_v34, %v7217_v2 }
0x17cb   :  { %v2647_v6 = vrot.slane %v2631_v30, %v7217_v2  ;;  %v488_v8 = vcombine.high %v486_v62, %v486_v62 }
0x17cd   :  { %v516_v18 = vrot.slane %v488_v8, %v7217_v2 }
0x1809   :  { %v4210_v52 = vpop.permute.xlu0 %4209 }
0x180a   :  { %v4212_v63 = vmul.f32 %v7260_v61, %v4210_v52  ;;  %v2681_v52 = vrot.slane %v2664_v24, %v7225_v20 }
0x180c   :  { %4214 = vrot.lane.b32.xlu1 %v4212_v63, %s5839_s21  ;;  %v3753_v63 = vrot.slane %v3736_v42, %v7225_v20 }
0x180d   :  { %v1091_v4 = vpop.permute.xlu0 %1090 }
0x180e   :  { %1114 = vst.msk [vmem:[#allocation2 + $0x1] sm:$0x1] %vm577_vm10, %v1091_v4  ;;  %v502_v4 = vrot.slane %v486_v62, %v7217_v2 }
0x1810   :  { %553 = vrot.lane.b32.xlu1 %v524_v3, %s5839_s21  ;;  %v540_v55 = vrot.slane %v502_v4, %v7225_v20  ;;  %v1575_v3 = vrot.slane %v1559_v38, %v7217_v2 }
0x1811   :  { %v2163_v0 = vpop.permute.xlu0 %2162 }
0x1812   :  { %2186 = vst.msk [vmem:[#allocation2 + $0x3] sm:$0x1] %vm577_vm10, %v2163_v0  ;;  %v3703_v0 = vrot.slane %v3689_v29, %v7217_v2  ;;  %v1613_v59 = vrot.slane %v1575_v3, %v7225_v20 }
0x1814   :  { %1626 = vrot.lane.b32.xlu1 %v1597_v12, %s5839_s21  ;;  %v3719_v12 = vrot.slane %v3703_v0, %v7217_v2 }
0x1815   :  { %v3235_v17 = vpop.permute.xlu0 %3234 }
0x1816   :  { %3258 = vst.msk [vmem:[#allocation2 + $0x5] sm:$0x1] %vm577_vm10, %v3235_v17  ;;  %v2685_v17 = vrot.slane %v2647_v6, %v7225_v20  ;;  %v3757_v31 = vrot.slane %v3719_v12, %v7225_v20 }
0x1818   :  { %2698 = vrot.lane.b32.xlu1 %v2669_v58, %s5839_s21  ;;  %v2633_v58 = vcombine.high %v2631_v30, %v2631_v30 }
0x1819   :  { %v1093_v28 = vpop.permute.xlu0 %1092 }
0x181a   :  { %1115 = vst.msk [vmem:[#allocation2 + $0x9] sm:$0x1] %vm577_vm10, %v1093_v28  ;;  %v544_v28 = vrot.slane %v516_v18, %v7225_v20 }
0x181c   :  { %3770 = vrot.lane.b32.xlu1 %v3741_v43, %s5839_s21  ;;  %v3705_v43 = vcombine.high %v3703_v0, %v3703_v0 }
0x181d   :  { %v2165_v23 = vpop.permute.xlu0 %2164 }
0x181e   :  { %2187 = vst.msk [vmem:[#allocation2 + $0xb] sm:$0x1] %vm577_vm10, %v2165_v23  ;;  %v2661_v23 = vrot.slane %v2633_v58, %v7217_v2 }
0x1820   :  { %555 = vrot.lane.b32.xlu1 %v528_v7, %s5839_s21  ;;  %v2689_v33 = vrot.slane %v2661_v23, %v7225_v20  ;;  %v3733_v7 = vrot.slane %v3705_v43, %v7217_v2  ;;  %v2665_v13 = vcombine.high %v2661_v23, %v2661_v23 }
0x1821   :  { %v3237_v27 = vpop.permute.xlu0 %3236 }
0x1822   :  { %3259 = vst.msk [vmem:[#allocation2 + $0xd] sm:$0x1] %vm577_vm10, %v3237_v27  ;;  %v3761_v41 = vrot.slane %v3733_v7, %v7225_v20  ;;  %v518_v27 = vcombine.high %v502_v4, %v502_v4  ;;  %v3737_v54 = vcombine.high %v3733_v7, %v3733_v7 }
0x1824   :  { %1628 = vrot.lane.b32.xlu1 %v1601_v37, %s5839_s21  ;;  %v548_v50 = vrot.slane %v518_v27, %v7225_v20  ;;  %v1591_v37 = vcombine.high %v1575_v3, %v1575_v3  ;;  %v3769_v5 = vrot.slane %v3737_v54, %v7225_v20 }
0x1825   :  { %v1095_v26 = vpop.permute.xlu0 %1094 }
0x1826   :  { %1116 = vst.msk [vmem:[#allocation2 + $0x11] sm:$0x1] %vm577_vm10, %v1095_v26  ;;  %v1621_v32 = vrot.slane %v1591_v37, %v7225_v20  ;;  %v2663_v26 = vcombine.high %v2647_v6, %v2647_v6 }
0x1828   :  { %2700 = vrot.lane.b32.xlu1 %v2673_v49, %s5839_s21  ;;  %v2693_v51 = vrot.slane %v2663_v26, %v7225_v20  ;;  %v3735_v49 = vcombine.high %v3719_v12, %v3719_v12 }
0x1829   :  { %v2167_v45 = vpop.permute.xlu0 %2166 }
0x182a   :  { %2188 = vst.msk [vmem:[#allocation2 + $0x13] sm:$0x1] %vm577_vm10, %v2167_v45  ;;  %v3765_v45 = vrot.slane %v3735_v49, %v7225_v20 }
0x182c   :  { %3772 = vrot.lane.b32.xlu1 %v3745_v25, %s5839_s21  ;;  %v520_v25 = vcombine.high %v516_v18, %v516_v18 }
0x182d   :  { %v3239_v15 = vpop.permute.xlu0 %3238 }
0x182e   :  { %3260 = vst.msk [vmem:[#allocation2 + $0x15] sm:$0x1] %vm577_vm10, %v3239_v15 }
0x1830   :  { %557 = vrot.lane.b32.xlu1 %v532_v44, %s5839_s21  ;;  %v552_v44 = vrot.slane %v520_v25, %v7225_v20 }
0x1831   :  { %v1097_v56 = vpop.permute.xlu0 %1096 }
0x1832   :  { %1117 = vst.msk [vmem:[#allocation2 + $0x19] sm:$0x1] %vm577_vm10, %v1097_v56 }
0x1834   :  { %1630 = vrot.lane.b32.xlu1 %v1605_v46, %s5839_s21  ;;  %v1009_v46 = vcombine.high %v6404_v21, %v6404_v21 }
0x1835   :  { %v2169_v40 = vpop.permute.xlu0 %2168 }
0x1836   :  { %2189 = vst.msk [vmem:[#allocation2 + $0x1b] sm:$0x1] %vm577_vm10, %v2169_v40  ;;  %v1625_v40 = vrot.slane %v1593_v47, %v7225_v20  ;;  %v1023_v36 = vrot.slane %v1009_v46, %v7217_v2 }
0x1838   :  { %2702 = vrot.lane.b32.xlu1 %v2677_v57, %s5839_s21  ;;  %v2081_v57 = vcombine.high %v6745_v1, %v6745_v1 }
0x1839   :  { %v3241_v22 = vpop.permute.xlu0 %3240 }
0x183a   :  { %3261 = vst.msk [vmem:[#allocation2 + $0x1d] sm:$0x1] %vm577_vm10, %v3241_v22  ;;  %v2095_v21 = vrot.slane %v2081_v57, %v7217_v2 }
0x183c   :  { %3774 = vrot.lane.b32.xlu1 %v3749_v16, %s5839_s21  ;;  %v2697_v16 = vrot.slane %v2665_v13, %v7225_v20 }
0x1840   :  { %559 = vrot.lane.b32.xlu1 %v536_v19, %s5839_s21  ;;  %v3153_v19 = vcombine.high %v7067_v9, %v7067_v9  ;;  %v1025_v9 = vcombine.high %v1023_v36, %v1023_v36 }
0x1842   :  { %v3167_v1 = vrot.slane %v3153_v19, %v7217_v2  ;;  %v1053_v29 = vrot.slane %v1025_v9, %v7217_v2  ;;  %v4349_v9 = vld [vmem:[%s7606_s4 + $0x18] sm:$0xff] }
0x1844   :  { %1632 = vrot.lane.b32.xlu1 %v1609_v11, %s5839_s21  ;;  %v1039_v11 = vrot.slane %v1023_v36, %v7217_v2  ;;  %v3183_v34 = vrot.slane %v3167_v1, %v7217_v2  ;;  %v1081_v0 = vrot.slane %v1053_v29, %v7225_v20  ;;  %v1057_v7 = vcombine.high %v1053_v29, %v1053_v29 }
0x1846   :  { %v1077_v60 = vrot.slane %v1039_v11, %v7225_v20  ;;  %v3221_v30 = vrot.slane %v3183_v34, %v7225_v20  ;;  %v1089_v27 = vrot.slane %v1057_v7, %v7225_v20 }
0x1848   :  { %2704 = vrot.lane.b32.xlu1 %v2681_v52, %s5839_s21  ;;  %v2111_v52 = vrot.slane %v2095_v21, %v7217_v2 }
0x184a   :  { %v2149_v38 = vrot.slane %v2111_v52, %v7225_v20 }
0x184c   :  { %3776 = vrot.lane.b32.xlu1 %v3753_v63, %s5839_s21  ;;  %v2097_v63 = vcombine.high %v2095_v21, %v2095_v21 }
0x1850   :  { %561 = vrot.lane.b32.xlu1 %v540_v55, %s5839_s21  ;;  %v3169_v55 = vcombine.high %v3167_v1, %v3167_v1 }
0x1852   :  { %v3197_v12 = vrot.slane %v3169_v55, %v7217_v2 }
0x1854   :  { %1634 = vrot.lane.b32.xlu1 %v1613_v59, %s5839_s21  ;;  %v2125_v59 = vrot.slane %v2097_v63, %v7217_v2  ;;  %v3225_v39 = vrot.slane %v3197_v12, %v7225_v20  ;;  %v3201_v26 = vcombine.high %v3197_v12, %v3197_v12 }
0x1856   :  { %v2153_v8 = vrot.slane %v2125_v59, %v7225_v20  ;;  %v3233_v49 = vrot.slane %v3201_v26, %v7225_v20 }
0x1858   :  { %2706 = vrot.lane.b32.xlu1 %v2685_v17, %s5839_s21 }
0x185c   :  { %3778 = vrot.lane.b32.xlu1 %v3757_v31, %s5839_s21  ;;  %v1055_v31 = vcombine.high %v1039_v11, %v1039_v11  ;;  %v4347_v11 = vld [vmem:[%s7606_s4 + $0x8] sm:$0xff] }
0x185e   :  { %v1085_v58 = vrot.slane %v1055_v31, %v7225_v20 }
0x1860   :  { %563 = vrot.lane.b32.xlu1 %v544_v28, %s5839_s21  ;;  %v2127_v28 = vcombine.high %v2111_v52, %v2111_v52 }
0x1862   :  { %v2157_v43 = vrot.slane %v2127_v28, %v7225_v20 }
0x1864   :  { %1636 = vrot.lane.b32.xlu1 %v1617_v14, %s5839_s21  ;;  %v3199_v14 = vcombine.high %v3183_v34, %v3183_v34 }
0x1868   :  { %2708 = vrot.lane.b32.xlu1 %v2689_v33, %s5839_s21  ;;  %v3229_v33 = vrot.slane %v3199_v14, %v7225_v20 }
0x186c   :  { %3780 = vrot.lane.b32.xlu1 %v3761_v41, %s5839_s21 }
0x1870   :  { %565 = vrot.lane.b32.xlu1 %v548_v50, %s5839_s21  ;;  %v2129_v50 = vcombine.high %v2125_v59, %v2125_v59 }
0x1874   :  { %1638 = vrot.lane.b32.xlu1 %v1621_v32, %s5839_s21  ;;  %v2161_v32 = vrot.slane %v2129_v50, %v7225_v20 }
0x1878   :  { %2710 = vrot.lane.b32.xlu1 %v2693_v51, %s5839_s21 }
0x187c   :  { %3782 = vrot.lane.b32.xlu1 %v3765_v45, %s5839_s21 }
0x187e   :  { %v4215_v15 = vpop.permute.xlu1 %4214 }
0x187f   :  { %v4217_v56 = vadd.f32 %v4215_v15, %v4207_v53 }
0x1880   :  { %567 = vrot.lane.b32.xlu1 %v552_v44, %s5839_s21 }
0x1881   :  { %5799 = vtanh.f32 %v4217_v56 }
0x1882   :  { %v554_v48 = vpop.permute.xlu1 %553 }
0x1883   :  { %578 = vst.msk [vmem:[#allocation2] sm:$0x1] %vm577_vm10, %v554_v48 }
0x1884   :  { %1640 = vrot.lane.b32.xlu1 %v1625_v40, %s5839_s21 }
0x1886   :  { %v1627_v22 = vpop.permute.xlu1 %1626 }
0x1887   :  { %1650 = vst.msk [vmem:[#allocation2 + $0x2] sm:$0x1] %vm577_vm10, %v1627_v22 }
0x1888   :  { %2712 = vrot.lane.b32.xlu1 %v2697_v16, %s5839_s21 }
0x188a   :  { %v2699_v10 = vpop.permute.xlu1 %2698 }
0x188b   :  { %v5800_v24 = vpop.eup %5799  ;;  %2722 = vst.msk [vmem:[#allocation2 + $0x4] sm:$0x1] %vm577_vm10, %v2699_v10 }
0x188c   :  { %4220 = vrot.lane.b32.xlu0 %v5800_v24, %s5838_s16  ;;  %3784 = vrot.lane.b32.xlu1 %v3769_v5, %s5839_s21  ;;  %v4346_v5 = vld [vmem:[%s7606_s4] sm:$0xff] }
0x188d   :  { %v5211_v1 = vpack.c.bf16 %v4347_v11, %v4346_v5 }
0x188e   :  { %v3771_v62 = vpop.permute.xlu1 %3770 }
0x188f   :  { %3794 = vst.msk [vmem:[#allocation2 + $0x6] sm:$0x1] %vm577_vm10, %v3771_v62  ;;  %5212 = vmatprep.subr.bf16.mxu1 %v5211_v1 }
0x1890   :  { %1098 = vrot.lane.b32.xlu0 %v1077_v60, %s5839_s21  ;;  %5214 = vmatpush3.bf16.msra.mxu1 %v5211_v1 }
0x1892   :  { %v556_v42 = vpop.permute.xlu1 %555 }
0x1893   :  { %579 = vst.msk [vmem:[#allocation2 + $0x8] sm:$0x1] %vm577_vm10, %v556_v42 }
0x1894   :  { %2170 = vrot.lane.b32.xlu0 %v2149_v38, %s5839_s21 }
0x1896   :  { %v1629_v4 = vpop.permute.xlu1 %1628 }
0x1897   :  { %1651 = vst.msk [vmem:[#allocation2 + $0xa] sm:$0x1] %vm577_vm10, %v1629_v4 }
0x1898   :  { %3242 = vrot.lane.b32.xlu0 %v3221_v30, %s5839_s21 }
0x189a   :  { %v2701_v3 = vpop.permute.xlu1 %2700 }
0x189b   :  { %2723 = vst.msk [vmem:[#allocation2 + $0xc] sm:$0x1] %vm577_vm10, %v2701_v3 }
0x189c   :  { %1100 = vrot.lane.b32.xlu0 %v1081_v0, %s5839_s21 }
0x189e   :  { %v3773_v6 = vpop.permute.xlu1 %3772 }
0x189f   :  { %3795 = vst.msk [vmem:[#allocation2 + $0xe] sm:$0x1] %vm577_vm10, %v3773_v6 }
0x18a0   :  { %2172 = vrot.lane.b32.xlu0 %v2153_v8, %s5839_s21 }
0x18a2   :  { %v558_v17 = vpop.permute.xlu1 %557 }
0x18a3   :  { %580 = vst.msk [vmem:[#allocation2 + $0x10] sm:$0x1] %vm577_vm10, %v558_v17 }
0x18a4   :  { %3244 = vrot.lane.b32.xlu0 %v3225_v39, %s5839_s21 }
0x18a6   :  { %v1631_v18 = vpop.permute.xlu1 %1630 }
0x18a7   :  { %1652 = vst.msk [vmem:[#allocation2 + $0x12] sm:$0x1] %vm577_vm10, %v1631_v18 }
0x18a8   :  { %1102 = vrot.lane.b32.xlu0 %v1085_v58, %s5839_s21 }
0x18aa   :  { %v2703_v35 = vpop.permute.xlu1 %2702 }
0x18ab   :  { %2724 = vst.msk [vmem:[#allocation2 + $0x14] sm:$0x1] %vm577_vm10, %v2703_v35 }
0x18ac   :  { %2174 = vrot.lane.b32.xlu0 %v2157_v43, %s5839_s21 }
0x18ae   :  { %v3775_v23 = vpop.permute.xlu1 %3774 }
0x18af   :  { %3796 = vst.msk [vmem:[#allocation2 + $0x16] sm:$0x1] %vm577_vm10, %v3775_v23 }
0x18b0   :  { %3246 = vrot.lane.b32.xlu0 %v3229_v33, %s5839_s21 }
0x18b2   :  { %v560_v41 = vpop.permute.xlu1 %559 }
0x18b3   :  { %581 = vst.msk [vmem:[#allocation2 + $0x18] sm:$0x1] %vm577_vm10, %v560_v41 }
0x18b4   :  { %1104 = vrot.lane.b32.xlu0 %v1089_v27, %s5839_s21 }
0x18b6   :  { %v1633_v37 = vpop.permute.xlu1 %1632 }
0x18b7   :  { %1653 = vst.msk [vmem:[#allocation2 + $0x1a] sm:$0x1] %vm577_vm10, %v1633_v37 }
0x18b8   :  { %2176 = vrot.lane.b32.xlu0 %v2161_v32, %s5839_s21 }
0x18ba   :  { %v2705_v51 = vpop.permute.xlu1 %2704 }
0x18bb   :  { %2725 = vst.msk [vmem:[#allocation2 + $0x1c] sm:$0x1] %vm577_vm10, %v2705_v51 }
0x18bc   :  { %3248 = vrot.lane.b32.xlu0 %v3233_v49, %s5839_s21 }
0x18be   :  { %v3777_v45 = vpop.permute.xlu1 %3776 }
0x18bf   :  { %3797 = vst.msk [vmem:[#allocation2 + $0x1e] sm:$0x1] %vm577_vm10, %v3777_v45 }
0x18c2   :  { %v562_v25 = vpop.permute.xlu1 %561 }
0x18c3   :  { %582 = vst.msk [vmem:[#allocation2 + $0x20] sm:$0x1] %vm577_vm10, %v562_v25 }
0x18c6   :  { %v1635_v53 = vpop.permute.xlu1 %1634 }
0x18c7   :  { %1654 = vst.msk [vmem:[#allocation2 + $0x22] sm:$0x1] %vm577_vm10, %v1635_v53 }
0x18ca   :  { %v2707_v15 = vpop.permute.xlu1 %2706 }
0x18cb   :  { %2726 = vst.msk [vmem:[#allocation2 + $0x24] sm:$0x1] %vm577_vm10, %v2707_v15 }
0x18ce   :  { %v3779_v44 = vpop.permute.xlu1 %3778 }
0x18cf   :  { %3798 = vst.msk [vmem:[#allocation2 + $0x26] sm:$0x1] %vm577_vm10, %v3779_v44 }
0x18d2   :  { %v564_v47 = vpop.permute.xlu1 %563 }
0x18d3   :  { %583 = vst.msk [vmem:[#allocation2 + $0x28] sm:$0x1] %vm577_vm10, %v564_v47 }
0x18d6   :  { %v1637_v56 = vpop.permute.xlu1 %1636 }
0x18d7   :  { %1655 = vst.msk [vmem:[#allocation2 + $0x2a] sm:$0x1] %vm577_vm10, %v1637_v56 }
0x18da   :  { %v2709_v46 = vpop.permute.xlu1 %2708 }
0x18db   :  { %2727 = vst.msk [vmem:[#allocation2 + $0x2c] sm:$0x1] %vm577_vm10, %v2709_v46 }
0x18de   :  { %v3781_v48 = vpop.permute.xlu1 %3780 }
0x18df   :  { %3799 = vst.msk [vmem:[#allocation2 + $0x2e] sm:$0x1] %vm577_vm10, %v3781_v48 }
0x18e2   :  { %v566_v40 = vpop.permute.xlu1 %565 }
0x18e3   :  { %584 = vst.msk [vmem:[#allocation2 + $0x30] sm:$0x1] %vm577_vm10, %v566_v40 }
0x18e6   :  { %v1639_v13 = vpop.permute.xlu1 %1638 }
0x18e7   :  { %1656 = vst.msk [vmem:[#allocation2 + $0x32] sm:$0x1] %vm577_vm10, %v1639_v13  ;;  %v4674_v13 = vld [vmem:[%s7607_s5] ss:$0 sm:$0xff] }
0x18ea   :  { %v2711_v36 = vpop.permute.xlu1 %2710 }
0x18eb   :  { %2728 = vst.msk [vmem:[#allocation2 + $0x34] sm:$0x1] %vm577_vm10, %v2711_v36 }
0x18ee   :  { %v3783_v57 = vpop.permute.xlu1 %3782 }
0x18ef   :  { %3800 = vst.msk [vmem:[#allocation2 + $0x36] sm:$0x1] %vm577_vm10, %v3783_v57 }
0x18f2   :  { %v568_v22 = vpop.permute.xlu1 %567 }
0x18f3   :  { %585 = vst.msk [vmem:[#allocation2 + $0x38] sm:$0x1] %vm577_vm10, %v568_v22 }
0x18f6   :  { %v1641_v16 = vpop.permute.xlu1 %1640 }
0x18f7   :  { %1657 = vst.msk [vmem:[#allocation2 + $0x3a] sm:$0x1] %vm577_vm10, %v1641_v16 }
0x18fa   :  { %v2713_v54 = vpop.permute.xlu1 %2712 }
0x18fb   :  { %2729 = vst.msk [vmem:[#allocation2 + $0x3c] sm:$0x1] %vm577_vm10, %v2713_v54 }
0x18fe   :  { %v4221_v21 = vpop.permute.xlu0 %4220  ;;  %v3785_v19 = vpop.permute.xlu1 %3784 }
0x18ff   :  { %v4223_v10 = vmul.f32 %v7260_v61, %v4221_v21  ;;  %3801 = vst.msk [vmem:[#allocation2 + $0x3e] sm:$0x1] %vm577_vm10, %v3785_v19  ;;  %v4348_v61 = vld [vmem:[%s7606_s4 + $0x10] sm:$0xff] }
0x1900   :  { %v5215_v42 = vpack.c.bf16 %v4349_v9, %v4348_v61 }
0x1901   :  { %v4232_v24 = vrot.slane %v4223_v10, %v7217_v2  ;;  %v4225_v38 = vcombine.high %v4223_v10, %v4223_v10 }
0x1902   :  { %v1099_v62 = vpop.permute.xlu0 %1098  ;;  %5216 = vmatprep.subr.bf16.mxu1 %v5215_v42 }
0x1903   :  { %v4240_v60 = vcombine.high %v4232_v24, %v4232_v24  ;;  %v4248_v52 = vrot.slane %v4232_v24, %v7217_v2  ;;  %1118 = vst.msk [vmem:[#allocation2 + $0x21] sm:$0x1] %vm577_vm10, %v1099_v62  ;;  %5218 = vmatpush3.bf16.msra.mxu1 %v5215_v42  ;;  %v4239_v30 = vrot.slane %v4225_v38, %v7217_v2 }
0x1905   :  { %v4262_v34 = vrot.slane %v4240_v60, %v7217_v2  ;;  %v4277_v63 = vrot.slane %v4248_v52, %v7225_v20  ;;  %v4270_v29 = vcombine.high %v4248_v52, %v4248_v52  ;;  %v4255_v0 = vrot.slane %v4239_v30, %v7217_v2 }
0x1906   :  { %v2171_v4 = vpop.permute.xlu0 %2170  ;;  %v4241_v8 = vcombine.high %v4239_v30, %v4239_v30 }
0x1907   :  { %2190 = vst.msk [vmem:[#allocation2 + $0x23] sm:$0x1] %vm577_vm10, %v2171_v4  ;;  %4306 = vrot.lane.b32.xlu0 %v4277_v63, %s5839_s21  ;;  %v4281_v3 = vrot.slane %v4262_v34, %v7225_v20  ;;  %v4285_v6 = vrot.slane %v4270_v29, %v7225_v20  ;;  %v4272_v12 = vcombine.high %v4262_v34, %v4262_v34 }
0x1908   :  { %v4293_v39 = vrot.slane %v4255_v0, %v7225_v20  ;;  %v4269_v31 = vrot.slane %v4241_v8, %v7217_v2  ;;  %v4271_v28 = vcombine.high %v4255_v0, %v4255_v0 }
0x1909   :  { %v4289_v58 = vrot.slane %v4272_v12, %v7225_v20 }
0x190a   :  { %v3243_v55 = vpop.permute.xlu0 %3242  ;;  %v4297_v43 = vrot.slane %v4269_v31, %v7225_v20  ;;  %v4301_v23 = vrot.slane %v4271_v28, %v7225_v20  ;;  %v4273_v33 = vcombine.high %v4269_v31, %v4269_v31 }
0x190b   :  { %3262 = vst.msk [vmem:[#allocation2 + $0x25] sm:$0x1] %vm577_vm10, %v3243_v55  ;;  %4308 = vrot.lane.b32.xlu0 %v4281_v3, %s5839_s21 }
0x190c   :  { %v4305_v7 = vrot.slane %v4273_v33, %v7225_v20 }
0x190e   :  { %v1101_v59 = vpop.permute.xlu0 %1100 }
0x190f   :  { %1119 = vst.msk [vmem:[#allocation2 + $0x29] sm:$0x1] %vm577_vm10, %v1101_v59  ;;  %4310 = vrot.lane.b32.xlu0 %v4285_v6, %s5839_s21 }
0x1912   :  { %v2173_v17 = vpop.permute.xlu0 %2172 }
0x1913   :  { %2191 = vst.msk [vmem:[#allocation2 + $0x2b] sm:$0x1] %vm577_vm10, %v2173_v17  ;;  %4314 = vrot.lane.b32.xlu0 %v4293_v39, %s5839_s21 }
0x1916   :  { %v3245_v18 = vpop.permute.xlu0 %3244 }
0x1917   :  { %3263 = vst.msk [vmem:[#allocation2 + $0x2d] sm:$0x1] %vm577_vm10, %v3245_v18  ;;  %4312 = vrot.lane.b32.xlu0 %v4289_v58, %s5839_s21 }
0x191a   :  { %v1103_v35 = vpop.permute.xlu0 %1102 }
0x191b   :  { %1120 = vst.msk [vmem:[#allocation2 + $0x31] sm:$0x1] %vm577_vm10, %v1103_v35  ;;  %4316 = vrot.lane.b32.xlu0 %v4297_v43, %s5839_s21 }
0x191e   :  { %v2175_v14 = vpop.permute.xlu0 %2174 }
0x191f   :  { %2192 = vst.msk [vmem:[#allocation2 + $0x33] sm:$0x1] %vm577_vm10, %v2175_v14  ;;  %4318 = vrot.lane.b32.xlu0 %v4301_v23, %s5839_s21 }
0x1922   :  { %v3247_v2 = vpop.permute.xlu0 %3246 }
0x1923   :  { %3264 = vst.msk [vmem:[#allocation2 + $0x35] sm:$0x1] %vm577_vm10, %v3247_v2  ;;  %4320 = vrot.lane.b32.xlu0 %v4305_v7, %s5839_s21 }
0x1926   :  { %v1105_v41 = vpop.permute.xlu0 %1104 }
0x1927   :  { %1121 = vst.msk [vmem:[#allocation2 + $0x39] sm:$0x1] %vm577_vm10, %v1105_v41 }
0x192a   :  { %v2177_v27 = vpop.permute.xlu0 %2176 }
0x192b   :  { %2193 = vst.msk [vmem:[#allocation2 + $0x3b] sm:$0x1] %vm577_vm10, %v2177_v27 }
0x192e   :  { %v3249_v50 = vpop.permute.xlu0 %3248 }
0x192f   :  { %3265 = vst.msk [vmem:[#allocation2 + $0x3d] sm:$0x1] %vm577_vm10, %v3249_v50 }
0x1979   :  { %v4307_v37 = vpop.permute.xlu0 %4306 }
0x197a   :  { %4330 = vst.msk [vmem:[#allocation2 + $0x7] sm:$0x1] %vm577_vm10, %v4307_v37 }
0x197d   :  { %v4309_v32 = vpop.permute.xlu0 %4308 }
0x197e   :  { %4331 = vst.msk [vmem:[#allocation2 + $0xf] sm:$0x1] %vm577_vm10, %v4309_v32 }
0x1981   :  { %v4311_v20 = vpop.permute.xlu0 %4310  ;;  %v4338_v26 = vld [vmem:[#allocation2] sm:$0xff] }
0x1982   :  { %4332 = vst.msk [vmem:[#allocation2 + $0x17] sm:$0x1] %vm577_vm10, %v4311_v20  ;;  %5055 = vmatprep.mubr.msk.f32.mxu1 %vm44_vm8, %v4338_v26 }
0x1985   :  { %v4315_v51 = vpop.permute.xlu0 %4314  ;;  %v4339_v49 = vld [vmem:[#allocation2 + $0x8] sm:$0xff] }
0x1986   :  { %4334 = vst.msk [vmem:[#allocation2 + $0x27] sm:$0x1] %vm577_vm10, %v4315_v51  ;;  %5056 = vmatmul.mubr.msk.f32.vlgmr.msra.gmra.mrb[14].mxu1 %vm44_vm8, %v4339_v49 }
0x1989   :  { %v4313_v45 = vpop.permute.xlu0 %4312  ;;  %v4340_v25 = vld [vmem:[#allocation2 + $0x10] sm:$0xff] }
0x198a   :  { %4333 = vst.msk [vmem:[#allocation2 + $0x1f] sm:$0x1] %vm577_vm10, %v4313_v45  ;;  %5058 = vmatprep.mubr.msk.f32.mxu1 %vm44_vm8, %v4340_v25 }
0x198d   :  { %v4317_v53 = vpop.permute.xlu0 %4316  ;;  %v4342_v47 = vld [vmem:[#allocation2 + $0x20] sm:$0xff] }
0x198e   :  { %4335 = vst.msk [vmem:[#allocation2 + $0x2f] sm:$0x1] %vm577_vm10, %v4317_v53 }
0x1991   :  { %v4319_v15 = vpop.permute.xlu0 %4318  ;;  %v4341_v44 = vld [vmem:[#allocation2 + $0x18] sm:$0xff] }
0x1992   :  { %4336 = vst.msk [vmem:[#allocation2 + $0x37] sm:$0x1] %vm577_vm10, %v4319_v15  ;;  %5059 = vmatmul.mubr.msk.f32.gmra.mrb[16].mxu1 %vm44_vm8, %v4341_v44 }
0x1993   :  { %5061 = vmatprep.mubr.msk.f32.mxu1 %vm44_vm8, %v4342_v47 }
0x1995   :  { %v4321_v56 = vpop.permute.xlu0 %4320  ;;  %v4343_v46 = vld [vmem:[#allocation2 + $0x28] sm:$0xff] }
0x1996   :  { %4337 = vst.msk [vmem:[#allocation2 + $0x3f] sm:$0x1] %vm577_vm10, %v4321_v56  ;;  %5062 = vmatmul.mubr.msk.f32.gmra.mrb[18].mxu1 %vm44_vm8, %v4343_v46 }
0x1999   :  { %v4344_v48 = vld [vmem:[#allocation2 + $0x30] sm:$0xff] }
0x199a   :  { %5064 = vmatprep.mubr.msk.f32.mxu1 %vm44_vm8, %v4344_v48 }
0x199d   :  { %v4345_v40 = vld [vmem:[#allocation2 + $0x38] sm:$0xff] }
0x199e   :  { %5065 = vmatmul.mubr.msk.f32.gmra.mrb[20].mxu1 %vm44_vm8, %v4345_v40 }
0x1a59   :  { %v5057_v36 = vpop.f32.mrb[14].mxu1 }
0x1a5a   :  { %v7514_v57 = vadd.f32 %v5057_v36, %v4674_v13  ;;  %v4447_v22 = vpop.f32.mrb[15].mxu1 }
0x1a5b   :  { %v7516_v16 = vadd.f32 %v4674_v13, %v4447_v22 }
0x1a5c   :  { %4488 = vmax.xlane.f32.xlu0 %v7514_v57 }
0x1a5d   :  { %4486 = vmax.xlane.f32.xlu1 %v7516_v16 }
0x1a65   :  { %v5060_v54 = vpop.f32.mrb[16].mxu1 }
0x1a66   :  { %v7520_v21 = vadd.f32 %v5060_v54, %v4674_v13  ;;  %v4457_v19 = vpop.f32.mrb[17].mxu1 }
0x1a67   :  { %v7522_v10 = vadd.f32 %v4674_v13, %v4457_v19 }
0x1a68   :  { %4492 = vmax.xlane.f32.xlu1 %v7520_v21 }
0x1a69   :  { %v5063_v5 = vpop.f32.mrb[18].mxu1  ;;  %4490 = vmax.xlane.f32.xlu0 %v7522_v10 }
0x1a6a   :  { %v7526_v11 = vadd.f32 %v5063_v5, %v4674_v13  ;;  %v4467_v24 = vpop.f32.mrb[19].mxu1 }
0x1a6b   :  { %v7528_v1 = vadd.f32 %v4674_v13, %v4467_v24 }
0x1a6c   :  { %4496 = vmax.xlane.f32.xlu1 %v7526_v11 }
0x1a6d   :  { %4494 = vmax.xlane.f32.xlu0 %v7528_v1 }
0x1a71   :  { %v5066_v62 = vpop.f32.mrb[20].mxu1 }
0x1a72   :  { %v7532_v60 = vadd.f32 %v5066_v62, %v4674_v13  ;;  %v4477_v52 = vpop.f32.mrb[21].mxu1 }
0x1a73   :  { %v7534_v61 = vadd.f32 %v4674_v13, %v4477_v52 }
0x1a74   :  { %4500 = vmax.xlane.f32.xlu1 %v7532_v60 }
0x1a75   :  { %4498 = vmax.xlane.f32.xlu0 %v7534_v61 }
0x1ae9   :  { %v4489_v9 = vpop.xlane.xlu0 %4488 }
0x1aea   :  { %v4503_v42 = vsub.f32 %v7514_v57, %v4489_v9  ;;  %v4487_v38 = vpop.xlane.xlu1 %4486 }
0x1aeb   :  { %v4502_v34 = vsub.f32 %v7516_v16, %v4487_v38 }
0x1aec   :  { %v4512_v63 = vmul.f32 1.442695, %v4503_v42 }
0x1aed   :  { %v4510_v4 = vmul.f32 1.442695, %v4502_v34 }
0x1aee   :  { %5801 = vpow2.f32 %v4512_v63 }
0x1aef   :  { %5803 = vpow2.f32 %v4510_v4 }
0x1af5   :  { %v7540_v30 = vpop.xlane.xlu1 %4492 }
0x1af6   :  { %v4505_v29 = vsub.f32 %v7520_v21, %v7540_v30  ;;  %v7544_v55 = vpop.xlane.xlu0 %4490 }
0x1af7   :  { %v4504_v3 = vsub.f32 %v7522_v10, %v7544_v55 }
0x1af8   :  { %v5802_v0 = vpop.eup %5801  ;;  %v4516_v59 = vmul.f32 1.442695, %v4505_v29 }
0x1af9   :  { %v5804_v6 = vpop.eup %5803  ;;  %v4514_v8 = vmul.f32 1.442695, %v4504_v3  ;;  %4528 = vadd.xlane.f32.xlu1 %v5802_v0  ;;  %v7548_v12 = vpop.xlane.xlu1 %4496 }
0x1afa   :  { %5805 = vpow2.f32 %v4516_v59  ;;  %v4507_v17 = vsub.f32 %v7526_v11, %v7548_v12  ;;  %v7552_v39 = vpop.xlane.xlu0 %4494  ;;  %4526 = vadd.xlane.f32.xlu0 %v5804_v6 }
0x1afb   :  { %5807 = vpow2.f32 %v4514_v8  ;;  %v4506_v31 = vsub.f32 %v7528_v1, %v7552_v39 }
0x1afc   :  { %v4520_v18 = vmul.f32 1.442695, %v4507_v17 }
0x1afd   :  { %v4518_v58 = vmul.f32 1.442695, %v4506_v31 }
0x1afe   :  { %5809 = vpow2.f32 %v4520_v18 }
0x1aff   :  { %5811 = vpow2.f32 %v4518_v58 }
0x1b01   :  { %v7556_v28 = vpop.xlane.xlu1 %4500 }
0x1b02   :  { %v4509_v35 = vsub.f32 %v7532_v60, %v7556_v28  ;;  %v7560_v43 = vpop.xlane.xlu0 %4498 }
0x1b03   :  { %v4508_v14 = vsub.f32 %v7534_v61, %v7560_v43 }
0x1b04   :  { %v5806_v23 = vpop.eup %5805  ;;  %v4524_v33 = vmul.f32 1.442695, %v4509_v35 }
0x1b05   :  { %v5808_v2 = vpop.eup %5807  ;;  %v4522_v7 = vmul.f32 1.442695, %v4508_v14  ;;  %4532 = vadd.xlane.f32.xlu1 %v5806_v23 }
0x1b06   :  { %5813 = vpow2.f32 %v4524_v33  ;;  %4530 = vadd.xlane.f32.xlu0 %v5808_v2 }
0x1b07   :  { %5815 = vpow2.f32 %v4522_v7 }
0x1b08   :  { %v5810_v41 = vpop.eup %5809 }
0x1b09   :  { %v5812_v27 = vpop.eup %5811  ;;  %4536 = vadd.xlane.f32.xlu1 %v5810_v41 }
0x1b0a   :  { %4534 = vadd.xlane.f32.xlu0 %v5812_v27 }
0x1b10   :  { %v5814_v50 = vpop.eup %5813 }
0x1b11   :  { %v5816_v37 = vpop.eup %5815  ;;  %4540 = vadd.xlane.f32.xlu1 %v5814_v50 }
0x1b12   :  { %4538 = vadd.xlane.f32.xlu0 %v5816_v37 }
0x1b86   :  { %v4529_v32 = vpop.xlane.xlu1 %4528 }
0x1b87   :  { %5817 = vlog2.f32 %v4529_v32  ;;  %v4527_v20 = vpop.xlane.xlu0 %4526 }
0x1b88   :  { %5819 = vlog2.f32 %v4527_v20 }
0x1b91   :  { %v5818_v26 = vpop.eup %5817 }
0x1b92   :  { %v5820_v51 = vpop.eup %5819  ;;  %v4545_v49 = vmul.f32 0.6931472, %v5818_v26  ;;  %v4533_v45 = vpop.xlane.xlu1 %4532 }
0x1b93   :  { %v4543_v25 = vmul.f32 0.6931472, %v5820_v51  ;;  %5821 = vlog2.f32 %v4533_v45  ;;  %v4531_v53 = vpop.xlane.xlu0 %4530 }
0x1b94   :  { %v4559_v15 = vadd.f32 %v4545_v49, %v4489_v9  ;;  %5823 = vlog2.f32 %v4531_v53 }
0x1b95   :  { %v4558_v44 = vadd.f32 %v4543_v25, %v4487_v38 }
0x1b96   :  { %v4567_v47 = vsub.f32 %v7514_v57, %v4559_v15  ;;  %v4537_v56 = vpop.xlane.xlu1 %4536 }
0x1b97   :  { %v4566_v46 = vsub.f32 %v7516_v16, %v4558_v44  ;;  %5825 = vlog2.f32 %v4537_v56  ;;  %v4535_v48 = vpop.xlane.xlu0 %4534 }
0x1b98   :  { %4575 = vst [vmem:[%s7608_s6 + $0x8] sm:$0xff] %v4567_v47  ;;  %5827 = vlog2.f32 %v4535_v48 }
0x1b99   :  { %4574 = vst [vmem:[%s7608_s6] sm:$0xff] %v4566_v46 }
0x1b9d   :  { %v5822_v40 = vpop.eup %5821 }
0x1b9e   :  { %v5824_v13 = vpop.eup %5823  ;;  %v4549_v36 = vmul.f32 0.6931472, %v5822_v40  ;;  %v4541_v22 = vpop.xlane.xlu1 %4540 }
0x1b9f   :  { %v4547_v54 = vmul.f32 0.6931472, %v5824_v13  ;;  %5829 = vlog2.f32 %v4541_v22  ;;  %v4539_v57 = vpop.xlane.xlu0 %4538 }
0x1ba0   :  { %v4561_v16 = vadd.f32 %v4549_v36, %v7540_v30  ;;  %5831 = vlog2.f32 %v4539_v57 }
0x1ba1   :  { %v5826_v19 = vpop.eup %5825  ;;  %v4560_v5 = vadd.f32 %v4547_v54, %v7544_v55 }
0x1ba2   :  { %v5828_v24 = vpop.eup %5827  ;;  %v4569_v62 = vsub.f32 %v7520_v21, %v4561_v16  ;;  %v4553_v52 = vmul.f32 0.6931472, %v5826_v19 }
0x1ba3   :  { %v4568_v9 = vsub.f32 %v7522_v10, %v4560_v5  ;;  %v4551_v42 = vmul.f32 0.6931472, %v5828_v24 }
0x1ba4   :  { %4577 = vst [vmem:[%s7608_s6 + $0x18] sm:$0xff] %v4569_v62  ;;  %v4563_v38 = vadd.f32 %v4553_v52, %v7548_v12 }
0x1ba5   :  { %4576 = vst [vmem:[%s7608_s6 + $0x10] sm:$0xff] %v4568_v9  ;;  %v4562_v34 = vadd.f32 %v4551_v42, %v7552_v39 }
0x1ba6   :  { %v4571_v63 = vsub.f32 %v7526_v11, %v4563_v38 }
0x1ba7   :  { %v4570_v21 = vsub.f32 %v7528_v1, %v4562_v34 }
0x1ba8   :  { %4579 = vst [vmem:[%s7608_s6 + $0x28] sm:$0xff] %v4571_v63 }
0x1ba9   :  { %v5830_v10 = vpop.eup %5829  ;;  %4578 = vst [vmem:[%s7608_s6 + $0x20] sm:$0xff] %v4570_v21 }
0x1baa   :  { %v5832_v4 = vpop.eup %5831  ;;  %v4557_v30 = vmul.f32 0.6931472, %v5830_v10 }
0x1bab   :  { %v4555_v29 = vmul.f32 0.6931472, %v5832_v4 }
0x1bac   :  { %v4565_v55 = vadd.f32 %v4557_v30, %v7556_v28 }
0x1bad   :  { %v4564_v3 = vadd.f32 %v4555_v29, %v7560_v43 }
0x1bae   :  { %v4573_v11 = vsub.f32 %v7532_v60, %v4565_v55 }
0x1baf   :  { %v4572_v1 = vsub.f32 %v7534_v61, %v4564_v3 }
0x1bb0   :  { %4581 = vst [vmem:[%s7608_s6 + $0x38] sm:$0xff] %v4573_v11 }
0x1bb1   :  { %4580 = vst [vmem:[%s7608_s6 + $0x30] sm:$0xff] %v4572_v1 }

</bundles_post_ra>
